<compile_context>
chip_gen: v7x
topology: tpu7x:2x2x1
jax: 0.10.0
libtpu: 0.0.40
codegen_flags: <defaults>
</compile_context>

<pallas_src>
import math
import numpy as np
import jax
import jax.numpy as jnp
from jax.experimental import pallas as pl
from jax.experimental.pallas import tpu as pltpu

# ---------------- configuration (small, consistent with the module) ----------------
B = 2                # batch
N_X = 16             # patch tokens (4x4 grid)
N_OBJ = 8            # object tokens
N_COL = 8            # color tokens
D = 32               # embed_dim
H = 4                # num_heads
DH = D // H          # head dim
MLP_HIDDEN = 4 * D   # mlp_ratio = 4.0
PATCH = 4            # patch_size -> num_classes = 2 * patch_size**2
NUM_CLASSES = 2 * PATCH * PATCH
DEPTH = 2            # transformer depth (small)
DEPTH_MLP = 2        # mlp decoder depth (small)
N_TOT = N_X + N_OBJ + N_COL
GRID_SIDE = int(math.isqrt(N_X))     # 4   (patch grid side)
IMG = GRID_SIDE * PATCH              # 16  (output image side)

WEIGHT_ORDER = ['tte_full', 'b_ln1_w', 'b_ln1_b', 'wq', 'wk', 'wv', 'wo', 'b_proj_b',
                'b_ln2_w', 'b_ln2_b', 'b_fc1_w', 'b_fc1_b', 'b_fc2_w', 'b_fc2_b',
                'm_fc1_w', 'm_fc1_b', 'm_fc2_w', 'm_fc2_b',
                'norm_w', 'norm_b', 'shift_S', 'tap_M', 'tap_bias',
                'biaff_w', 'biaff_b']


# ---------------- in-kernel helpers ----------------
def _layernorm(x, w, b, eps=1e-5):
    mu = jnp.mean(x, axis=-1, keepdims=True)
    var = jnp.mean((x - mu) ** 2, axis=-1, keepdims=True)
    return (x - mu) * jax.lax.rsqrt(var + eps) * w + b


def _gelu(x):
    # TODO(synk): nn.GELU (exact erf) approximated with tanh-GELU inside the kernel.
    c = math.sqrt(2.0 / math.pi)
    return 0.5 * x * (1.0 + jnp.tanh(c * (x + 0.044715 * x * x * x)))


# ---------------- single fused kernel ----------------
def fused_kernel(poc_ref, tte_ref,
                 ln1w_ref, ln1b_ref, wq_ref, wk_ref, wv_ref, wo_ref, projb_ref,
                 ln2w_ref, ln2b_ref, fc1w_ref, fc1b_ref, fc2w_ref, fc2b_ref,
                 mfc1w_ref, mfc1b_ref, mfc2w_ref, mfc2b_ref,
                 normw_ref, normb_ref,
                 shiftS_ref, tapM_ref, tapbias_ref,
                 biaffw_ref, biaffb_ref,
                 ptok_ref, occm_ref):
    # ---- token-type embedding add (inputs pre-concatenated, tte pre-broadcast) ----
    poc = poc_ref[...] + tte_ref[...]                                  # (N_TOT, D)

    # ---- transformer blocks (pre-LN ViT), unrolled over depth & heads ----
    for d in range(DEPTH):
        h1 = _layernorm(poc, ln1w_ref[d:d + 1, :], ln1b_ref[d:d + 1, :])
        attn_out = None
        for h in range(H):
            # per-head weights pre-sliced host-side -> no activation lane slices
            qh = jnp.dot(h1, wq_ref[d, h], preferred_element_type=jnp.float32)   # scale folded in
            kh = jnp.dot(h1, wk_ref[d, h], preferred_element_type=jnp.float32)
            vh = jnp.dot(h1, wv_ref[d, h], preferred_element_type=jnp.float32)
            s = jax.lax.dot_general(qh, kh, (((1,), (1,)), ((), ())),
                                    preferred_element_type=jnp.float32)          # (N, N)
            s = s - jnp.max(s, axis=-1, keepdims=True)
            e = jnp.exp(s)
            patt = e * pl.reciprocal(jnp.sum(e, axis=-1, keepdims=True), approx=True)
            oh = jnp.dot(patt, vh, preferred_element_type=jnp.float32)           # (N, DH)
            contrib = jnp.dot(oh, wo_ref[d, h], preferred_element_type=jnp.float32)
            attn_out = contrib if attn_out is None else attn_out + contrib
        poc = poc + attn_out + projb_ref[d:d + 1, :]

        h2 = _layernorm(poc, ln2w_ref[d:d + 1, :], ln2b_ref[d:d + 1, :])
        m = jnp.dot(h2, fc1w_ref[d],
                    preferred_element_type=jnp.float32) + fc1b_ref[d:d + 1, :]
        m = _gelu(m)
        m = jnp.dot(m, fc2w_ref[d],
                    preferred_element_type=jnp.float32) + fc2b_ref[d:d + 1, :]
        poc = poc + m

    p = poc[0:N_X, :]       # patch tokens
    oc = poc[0:N_OBJ, :]    # module literally uses poc[:, :obj_len] for BOTH o and c

    # ---- MLP decoder blocks ----
    for d in range(DEPTH_MLP):
        hh = jnp.dot(p, mfc1w_ref[d],
                     preferred_element_type=jnp.float32) + mfc1b_ref[d:d + 1, :]
        hh = _gelu(hh)
        p = jnp.dot(hh, mfc2w_ref[d],
                    preferred_element_type=jnp.float32) + mfc2b_ref[d:d + 1, :]

    # ---- norm + (head -> rearrange -> zero-pad -> 3x3 conv) folded into 9 tap mats ----
    # out_tok[t] = bias[t] + sum_off (S_off @ norm_p)[t] @ (head_w @ T_off)
    np_p = _layernorm(p, normw_ref[...], normb_ref[...])
    out_tok = tapbias_ref[...]
    for oi in range(9):
        src = np_p if oi == 4 else jnp.dot(shiftS_ref[oi], np_p,
                                           preferred_element_type=jnp.float32)
        out_tok = out_tok + jnp.dot(src, tapM_ref[oi],
                                    preferred_element_type=jnp.float32)
    ptok_ref[...] = out_tok                                            # (N_X, 32) lane-dense slab

    # ---- Biaffine(D, D, 1, bias=(True, False)) with o == c ----
    affine = jnp.dot(oc, biaffw_ref[...],
                     preferred_element_type=jnp.float32) + biaffb_ref[...]
    occm_ref[...] = jax.lax.dot_general(
        oc, affine, (((1,), (1,)), ((), ())),
        preferred_element_type=jnp.float32)                            # (N_OBJ, N_OBJ)


# ---------------- pallas_call wrapper ----------------
def _const_spec(shape):
    nd = len(shape)
    return pl.BlockSpec(shape, lambda b, _nd=nd: (0,) * _nd)


def forward(x, obj, col, params):
    bsz = x.shape[0]
    poc_in = jnp.concatenate([x, obj, col], axis=1)                    # (B, N_TOT, D)
    weights = [params[k] for k in WEIGHT_ORDER]
    in_specs = ([pl.BlockSpec((None, N_TOT, D), lambda b: (b, 0, 0))]
                + [_const_spec(w.shape) for w in weights])
    ptok, occm = pl.pallas_call(
        fused_kernel,
        out_shape=(jax.ShapeDtypeStruct((bsz, N_X, NUM_CLASSES), jnp.float32),
                   jax.ShapeDtypeStruct((bsz, N_OBJ, N_OBJ), jnp.float32)),
        grid=(bsz,),
        in_specs=in_specs,
        out_specs=(pl.BlockSpec((None, N_X, NUM_CLASSES), lambda b: (b, 0, 0)),
                   pl.BlockSpec((None, N_OBJ, N_OBJ), lambda b: (b, 0, 0))),
        compiler_params=pltpu.CompilerParams(dimension_semantics=("parallel",)),
    )(poc_in, *weights)
    # un-rearrange the lane-dense (B, 16, 32) slab -> (B, 2, 16, 16) image (free plumbing)
    o = ptok.reshape(bsz, GRID_SIDE, GRID_SIDE, 2, PATCH, PATCH)       # (b, hg, wg, c, p1, p2)
    p_img = jnp.transpose(o, (0, 3, 1, 4, 2, 5)).reshape(bsz, 2, IMG, IMG)
    return p_img, occm[..., None]                                      # (B,2,16,16), (B,8,8,1)


# ---------------- host-side folding of head + rearrange + pad + 3x3 conv ----------------
def build_fold_constants(head_w, head_b, conv_w):
    """head_w:(D,32) in (p1 p2 c) column order, head_b:(32,), conv_w:(2,2,3,3)."""
    offs = [(dh, dw) for dh in (-1, 0, 1) for dw in (-1, 0, 1)]        # offs[4] == (0,0)
    T = np.zeros((9, NUM_CLASSES, NUM_CLASSES), np.float32)
    S = np.zeros((9, N_X, N_X), np.float32)
    valid = np.zeros((9, N_X), np.float32)
    for oi, (dh, dw) in enumerate(offs):
        for co in range(2):
            for ci in range(2):
                for kh in range(3):
                    for kw in range(3):
                        for p1 in range(PATCH):
                            for p2 in range(PATCH):
                                yy, xx = p1 + kh - 1, p2 + kw - 1
                                sdh = -1 if yy < 0 else (1 if yy >= PATCH else 0)
                                sdw = -1 if xx < 0 else (1 if xx >= PATCH else 0)
                                if (sdh, sdw) != (dh, dw):
                                    continue
                                p1s, p2s = yy - sdh * PATCH, xx - sdw * PATCH
                                jin = p1s * (PATCH * 2) + p2s * 2 + ci       # (p1 p2 c)
                                jout = co * (PATCH * PATCH) + p1 * PATCH + p2  # (c p1 p2)
                                T[oi, jin, jout] += conv_w[co, ci, kh, kw]
        for hg in range(GRID_SIDE):
            for wg in range(GRID_SIDE):
                t = hg * GRID_SIDE + wg
                hs, ws = hg + dh, wg + dw
                if 0 <= hs < GRID_SIDE and 0 <= ws < GRID_SIDE:
                    S[oi, t, hs * GRID_SIDE + ws] = 1.0
                    valid[oi, t] = 1.0
    M = np.einsum('dj,ojk->odk', head_w, T).astype(np.float32)          # (9, D, 32)
    bT = np.einsum('j,ojk->ok', head_b, T)                              # (9, 32)
    bias_tok = np.einsum('ot,ok->tk', valid, bT).astype(np.float32)     # (16, 32)
    return S, M, bias_tok


# ---------------- parameter init (deterministic, synthetic) ----------------
def init_params(key):
    keys = jax.random.split(key, 32)
    kit = iter(keys)

    def xavier(shape):
        fan_in, fan_out = shape[-2], shape[-1]
        a = math.sqrt(6.0 / (fan_in + fan_out))
        return jax.random.uniform(next(kit), shape, jnp.float32, -a, a)

    p = {}
    tte = jax.random.normal(next(kit), (3, D), jnp.float32)
    p['tte_full'] = jnp.concatenate([
        jnp.broadcast_to(tte[0:1], (N_X, D)),
        jnp.broadcast_to(tte[1:2], (N_OBJ, D)),
        jnp.broadcast_to(tte[2:3], (N_COL, D))], axis=0)                # (N_TOT, D)

    # transformer blocks, stacked along depth
    p['b_ln1_w'] = jnp.ones((DEPTH, D), jnp.float32)
    p['b_ln1_b'] = jnp.zeros((DEPTH, D), jnp.float32)
    qkv_w = jnp.stack([xavier((D, 3 * D)) for _ in range(DEPTH)])       # qkv_bias=False
    scale = 1.0 / math.sqrt(DH)
    p['wq'] = (qkv_w[:, :, 0:D].reshape(DEPTH, D, H, DH)
               .transpose(0, 2, 1, 3) * scale)                          # (DEPTH, H, D, DH)
    p['wk'] = qkv_w[:, :, D:2 * D].reshape(DEPTH, D, H, DH).transpose(0, 2, 1, 3)
    p['wv'] = qkv_w[:, :, 2 * D:3 * D].reshape(DEPTH, D, H, DH).transpose(0, 2, 1, 3)
    proj_w = jnp.stack([xavier((D, D)) for _ in range(DEPTH)])
    p['wo'] = proj_w.reshape(DEPTH, H, DH, D)                           # per-head row slices
    p['b_proj_b'] = jnp.zeros((DEPTH, D), jnp.float32)
    p['b_ln2_w'] = jnp.ones((DEPTH, D), jnp.float32)
    p['b_ln2_b'] = jnp.zeros((DEPTH, D), jnp.float32)
    p['b_fc1_w'] = jnp.stack([xavier((D, MLP_HIDDEN)) for _ in range(DEPTH)])
    p['b_fc1_b'] = jnp.zeros((DEPTH, MLP_HIDDEN), jnp.float32)
    p['b_fc2_w'] = jnp.stack([xavier((MLP_HIDDEN, D)) for _ in range(DEPTH)])
    p['b_fc2_b'] = jnp.zeros((DEPTH, D), jnp.float32)

    # mlp decoder blocks (Mlp(embed_dim): hidden = out = embed_dim)
    p['m_fc1_w'] = jnp.stack([xavier((D, D)) for _ in range(DEPTH_MLP)])
    p['m_fc1_b'] = jnp.zeros((DEPTH_MLP, D), jnp.float32)
    p['m_fc2_w'] = jnp.stack([xavier((D, D)) for _ in range(DEPTH_MLP)])
    p['m_fc2_b'] = jnp.zeros((DEPTH_MLP, D), jnp.float32)

    p['norm_w'] = jnp.ones((1, D), jnp.float32)
    p['norm_b'] = jnp.zeros((1, D), jnp.float32)

    # head + Conv2d(2,2,3,padding=1,bias=False) folded host-side into tap matrices
    head_w = xavier((D, NUM_CLASSES))
    head_b = jnp.zeros((NUM_CLASSES,), jnp.float32)
    m = np.asarray(jax.random.normal(next(kit), (18, 18), jnp.float32))
    qm, _ = np.linalg.qr(m)                                             # orthogonal init
    conv_w = qm[:2, :].reshape(2, 2, 3, 3).astype(np.float32)
    S, M, bias_tok = build_fold_constants(np.asarray(head_w), np.asarray(head_b), conv_w)
    p['shift_S'] = jnp.asarray(S)          # (9, 16, 16)
    p['tap_M'] = jnp.asarray(M)            # (9, D, 32)
    p['tap_bias'] = jnp.asarray(bias_tok)  # (16, 32)

    # Biaffine(D, D, 1, bias=(True, False)): [o;1] @ W_full, W_full: (D+1, D)
    wf = xavier((D + 1, D))
    p['biaff_w'] = wf[:D, :]
    p['biaff_b'] = wf[D:D + 1, :]
    return p


if __name__ == "__main__":
    key = jax.random.PRNGKey(0)
    k1, k2, k3, kp = jax.random.split(key, 4)
    x = jax.random.normal(k1, (B, N_X, D), jnp.float32)
    obj = jax.random.normal(k2, (B, N_OBJ, D), jnp.float32)
    col = jax.random.normal(k3, (B, N_COL, D), jnp.float32)
    params = init_params(kp)

    p_out, occm_out = jax.jit(forward)(x, obj, col, params)
    jax.block_until_ready((p_out, occm_out))

    assert p_out.shape == (B, 2, IMG, IMG), p_out.shape
    assert occm_out.shape == (B, N_OBJ, N_OBJ, 1), occm_out.shape
    assert bool(jnp.all(jnp.isfinite(p_out))) and bool(jnp.all(jnp.isfinite(occm_out)))
    print("KERNEL_OK")
</pallas_src>

<mosaic_0001>
module attributes {stable_mosaic.version = 11 : i64} {
  func.func @fused_kernel(%arg0: i32, %arg1: memref<1x32x32xf32, #tpu.memory_space<vmem>>, %arg2: memref<32x32xf32, #tpu.memory_space<vmem>>, %arg3: memref<2x32xf32, #tpu.memory_space<vmem>>, %arg4: memref<2x32xf32, #tpu.memory_space<vmem>>, %arg5: memref<2x4x32x8xf32, #tpu.memory_space<vmem>>, %arg6: memref<2x4x32x8xf32, #tpu.memory_space<vmem>>, %arg7: memref<2x4x32x8xf32, #tpu.memory_space<vmem>>, %arg8: memref<2x4x8x32xf32, #tpu.memory_space<vmem>>, %arg9: memref<2x32xf32, #tpu.memory_space<vmem>>, %arg10: memref<2x32xf32, #tpu.memory_space<vmem>>, %arg11: memref<2x32xf32, #tpu.memory_space<vmem>>, %arg12: memref<2x32x128xf32, #tpu.memory_space<vmem>>, %arg13: memref<2x128xf32, #tpu.memory_space<vmem>>, %arg14: memref<2x128x32xf32, #tpu.memory_space<vmem>>, %arg15: memref<2x32xf32, #tpu.memory_space<vmem>>, %arg16: memref<2x32x32xf32, #tpu.memory_space<vmem>>, %arg17: memref<2x32xf32, #tpu.memory_space<vmem>>, %arg18: memref<2x32x32xf32, #tpu.memory_space<vmem>>, %arg19: memref<2x32xf32, #tpu.memory_space<vmem>>, %arg20: memref<1x32xf32, #tpu.memory_space<vmem>>, %arg21: memref<1x32xf32, #tpu.memory_space<vmem>>, %arg22: memref<9x16x16xf32, #tpu.memory_space<vmem>>, %arg23: memref<9x32x32xf32, #tpu.memory_space<vmem>>, %arg24: memref<16x32xf32, #tpu.memory_space<vmem>>, %arg25: memref<32x32xf32, #tpu.memory_space<vmem>>, %arg26: memref<1x32xf32, #tpu.memory_space<vmem>>, %arg27: memref<1x16x32xf32, #tpu.memory_space<vmem>>, %arg28: memref<1x8x8xf32, #tpu.memory_space<vmem>>) attributes {dimension_semantics = [#tpu.dimension_semantics<parallel>], iteration_bounds = array<i64: 2>, scalar_prefetch = 0 : i64, scratch_operands = 0 : i64, tpu.core_type = #tpu.core_type<tc>, window_params = [{transform_indices = @transform_0, window_bounds = array<i64: 1, 32, 32>}, {pipeline_mode = #tpu.pipeline_mode<synchronous>, transform_indices = @transform_1, window_bounds = array<i64: 32, 32>}, {pipeline_mode = #tpu.pipeline_mode<synchronous>, transform_indices = @transform_2, window_bounds = array<i64: 2, 32>}, {pipeline_mode = #tpu.pipeline_mode<synchronous>, transform_indices = @transform_3, window_bounds = array<i64: 2, 32>}, {pipeline_mode = #tpu.pipeline_mode<synchronous>, transform_indices = @transform_4, window_bounds = array<i64: 2, 4, 32, 8>}, {pipeline_mode = #tpu.pipeline_mode<synchronous>, transform_indices = @transform_5, window_bounds = array<i64: 2, 4, 32, 8>}, {pipeline_mode = #tpu.pipeline_mode<synchronous>, transform_indices = @transform_6, window_bounds = array<i64: 2, 4, 32, 8>}, {pipeline_mode = #tpu.pipeline_mode<synchronous>, transform_indices = @transform_7, window_bounds = array<i64: 2, 4, 8, 32>}, {pipeline_mode = #tpu.pipeline_mode<synchronous>, transform_indices = @transform_8, window_bounds = array<i64: 2, 32>}, {pipeline_mode = #tpu.pipeline_mode<synchronous>, transform_indices = @transform_9, window_bounds = array<i64: 2, 32>}, {pipeline_mode = #tpu.pipeline_mode<synchronous>, transform_indices = @transform_10, window_bounds = array<i64: 2, 32>}, {pipeline_mode = #tpu.pipeline_mode<synchronous>, transform_indices = @transform_11, window_bounds = array<i64: 2, 32, 128>}, {pipeline_mode = #tpu.pipeline_mode<synchronous>, transform_indices = @transform_12, window_bounds = array<i64: 2, 128>}, {pipeline_mode = #tpu.pipeline_mode<synchronous>, transform_indices = @transform_13, window_bounds = array<i64: 2, 128, 32>}, {pipeline_mode = #tpu.pipeline_mode<synchronous>, transform_indices = @transform_14, window_bounds = array<i64: 2, 32>}, {pipeline_mode = #tpu.pipeline_mode<synchronous>, transform_indices = @transform_15, window_bounds = array<i64: 2, 32, 32>}, {pipeline_mode = #tpu.pipeline_mode<synchronous>, transform_indices = @transform_16, window_bounds = array<i64: 2, 32>}, {pipeline_mode = #tpu.pipeline_mode<synchronous>, transform_indices = @transform_17, window_bounds = array<i64: 2, 32, 32>}, {pipeline_mode = #tpu.pipeline_mode<synchronous>, transform_indices = @transform_18, window_bounds = array<i64: 2, 32>}, {pipeline_mode = #tpu.pipeline_mode<synchronous>, transform_indices = @transform_19, window_bounds = array<i64: 1, 32>}, {pipeline_mode = #tpu.pipeline_mode<synchronous>, transform_indices = @transform_20, window_bounds = array<i64: 1, 32>}, {pipeline_mode = #tpu.pipeline_mode<synchronous>, transform_indices = @transform_21, window_bounds = array<i64: 9, 16, 16>}, {pipeline_mode = #tpu.pipeline_mode<synchronous>, transform_indices = @transform_22, window_bounds = array<i64: 9, 32, 32>}, {pipeline_mode = #tpu.pipeline_mode<synchronous>, transform_indices = @transform_23, window_bounds = array<i64: 16, 32>}, {pipeline_mode = #tpu.pipeline_mode<synchronous>, transform_indices = @transform_24, window_bounds = array<i64: 32, 32>}, {pipeline_mode = #tpu.pipeline_mode<synchronous>, transform_indices = @transform_25, window_bounds = array<i64: 1, 32>}, {transform_indices = @transform_26, window_bounds = array<i64: 1, 16, 32>}, {transform_indices = @transform_27, window_bounds = array<i64: 1, 8, 8>}]} {
    %c0 = arith.constant 0 : index
    %c0_0 = arith.constant 0 : index
    %c0_1 = arith.constant 0 : index
    %0 = vector.load %arg1[%c0, %c0_0, %c0_1] : memref<1x32x32xf32, #tpu.memory_space<vmem>>, vector<1x32x32xf32>
    %1 = vector.shape_cast %0 : vector<1x32x32xf32> to vector<32x32xf32>
    %c0_2 = arith.constant 0 : index
    %c0_3 = arith.constant 0 : index
    %2 = vector.load %arg2[%c0_2, %c0_3] : memref<32x32xf32, #tpu.memory_space<vmem>>, vector<32x32xf32>
    %3 = arith.addf %1, %2 : vector<32x32xf32>
    %c0_4 = arith.constant 0 : index
    %c0_5 = arith.constant 0 : index
    %4 = vector.load %arg3[%c0_4, %c0_5] : memref<2x32xf32, #tpu.memory_space<vmem>>, vector<1x32xf32>
    %c0_6 = arith.constant 0 : index
    %c0_7 = arith.constant 0 : index
    %5 = vector.load %arg4[%c0_6, %c0_7] : memref<2x32xf32, #tpu.memory_space<vmem>>, vector<1x32xf32>
    %cst = arith.constant dense<0.000000e+00> : vector<32xf32>
    %6 = vector.multi_reduction <add>, %3, %cst [1] : vector<32x32xf32> to vector<32xf32>
    %7 = vector.shape_cast %6 : vector<32xf32> to vector<32x1xf32>
    %cst_8 = arith.constant 3.200000e+01 : f32
    %8 = vector.broadcast %cst_8 : f32 to vector<32x1xf32>
    %9 = arith.divf %7, %8 : vector<32x1xf32>
    %10 = vector.broadcast %9 : vector<32x1xf32> to vector<32x32xf32>
    %11 = arith.subf %3, %10 : vector<32x32xf32>
    %12 = arith.mulf %11, %11 : vector<32x32xf32>
    %cst_9 = arith.constant dense<0.000000e+00> : vector<32xf32>
    %13 = vector.multi_reduction <add>, %12, %cst_9 [1] : vector<32x32xf32> to vector<32xf32>
    %14 = vector.shape_cast %13 : vector<32xf32> to vector<32x1xf32>
    %cst_10 = arith.constant 3.200000e+01 : f32
    %15 = vector.broadcast %cst_10 : f32 to vector<32x1xf32>
    %16 = arith.divf %14, %15 : vector<32x1xf32>
    %17 = vector.broadcast %9 : vector<32x1xf32> to vector<32x32xf32>
    %18 = arith.subf %3, %17 : vector<32x32xf32>
    %cst_11 = arith.constant 9.99999974E-6 : f32
    %19 = vector.broadcast %cst_11 : f32 to vector<32x1xf32>
    %20 = arith.addf %16, %19 : vector<32x1xf32>
    %21 = math.rsqrt %20 : vector<32x1xf32>
    %22 = vector.broadcast %21 : vector<32x1xf32> to vector<32x32xf32>
    %23 = arith.mulf %18, %22 : vector<32x32xf32>
    %24 = vector.broadcast %4 : vector<1x32xf32> to vector<32x32xf32>
    %25 = arith.mulf %23, %24 : vector<32x32xf32>
    %26 = vector.broadcast %5 : vector<1x32xf32> to vector<32x32xf32>
    %27 = arith.addf %25, %26 : vector<32x32xf32>
    %c0_12 = arith.constant 0 : index
    %c0_13 = arith.constant 0 : index
    %c0_14 = arith.constant 0 : index
    %c0_15 = arith.constant 0 : index
    %28 = vector.load %arg5[%c0_12, %c0_13, %c0_14, %c0_15] : memref<2x4x32x8xf32, #tpu.memory_space<vmem>>, vector<1x1x32x8xf32>
    %29 = vector.shape_cast %28 : vector<1x1x32x8xf32> to vector<32x8xf32>
    %cst_16 = arith.constant dense<0.000000e+00> : vector<32x8xf32>
    %30 = tpu.matmul %27, %29, %cst_16 {dimension_numbers = #tpu.dot_dimension_numbers<[1], [0], [0], [1], [0, 0, 1, 1], [], []>} : vector<32x32xf32>, vector<32x8xf32>, vector<32x8xf32> -> vector<32x8xf32>
    %c0_17 = arith.constant 0 : index
    %c0_18 = arith.constant 0 : index
    %c0_19 = arith.constant 0 : index
    %c0_20 = arith.constant 0 : index
    %31 = vector.load %arg6[%c0_17, %c0_18, %c0_19, %c0_20] : memref<2x4x32x8xf32, #tpu.memory_space<vmem>>, vector<1x1x32x8xf32>
    %32 = vector.shape_cast %31 : vector<1x1x32x8xf32> to vector<32x8xf32>
    %cst_21 = arith.constant dense<0.000000e+00> : vector<32x8xf32>
    %33 = tpu.matmul %27, %32, %cst_21 {dimension_numbers = #tpu.dot_dimension_numbers<[1], [0], [0], [1], [0, 0, 1, 1], [], []>} : vector<32x32xf32>, vector<32x8xf32>, vector<32x8xf32> -> vector<32x8xf32>
    %c0_22 = arith.constant 0 : index
    %c0_23 = arith.constant 0 : index
    %c0_24 = arith.constant 0 : index
    %c0_25 = arith.constant 0 : index
    %34 = vector.load %arg7[%c0_22, %c0_23, %c0_24, %c0_25] : memref<2x4x32x8xf32, #tpu.memory_space<vmem>>, vector<1x1x32x8xf32>
    %35 = vector.shape_cast %34 : vector<1x1x32x8xf32> to vector<32x8xf32>
    %cst_26 = arith.constant dense<0.000000e+00> : vector<32x8xf32>
    %36 = tpu.matmul %27, %35, %cst_26 {dimension_numbers = #tpu.dot_dimension_numbers<[1], [0], [0], [1], [0, 0, 1, 1], [], []>} : vector<32x32xf32>, vector<32x8xf32>, vector<32x8xf32> -> vector<32x8xf32>
    %cst_27 = arith.constant dense<0.000000e+00> : vector<32x32xf32>
    %37 = tpu.matmul %30, %33, %cst_27 {dimension_numbers = #tpu.dot_dimension_numbers<[1], [1], [0], [0], [0, 0, 1, 0], [], []>} : vector<32x8xf32>, vector<32x8xf32>, vector<32x32xf32> -> vector<32x32xf32>
    %cst_28 = arith.constant dense<0xFF800000> : vector<32xf32>
    %38 = vector.multi_reduction <maximumf>, %37, %cst_28 [1] : vector<32x32xf32> to vector<32xf32>
    %39 = vector.shape_cast %38 : vector<32xf32> to vector<32x1xf32>
    %40 = vector.broadcast %39 : vector<32x1xf32> to vector<32x32xf32>
    %41 = arith.subf %37, %40 : vector<32x32xf32>
    %42 = math.exp %41 : vector<32x32xf32>
    %cst_29 = arith.constant dense<0.000000e+00> : vector<32xf32>
    %43 = vector.multi_reduction <add>, %42, %cst_29 [1] : vector<32x32xf32> to vector<32xf32>
    %44 = vector.shape_cast %43 : vector<32xf32> to vector<32x1xf32>
    %45 = tpu.reciprocal %44 {approx = true} : vector<32x1xf32> -> vector<32x1xf32>
    %46 = vector.broadcast %45 : vector<32x1xf32> to vector<32x32xf32>
    %47 = arith.mulf %42, %46 : vector<32x32xf32>
    %cst_30 = arith.constant dense<0.000000e+00> : vector<32x8xf32>
    %48 = tpu.matmul %47, %36, %cst_30 {dimension_numbers = #tpu.dot_dimension_numbers<[1], [0], [0], [1], [0, 0, 1, 1], [], []>} : vector<32x32xf32>, vector<32x8xf32>, vector<32x8xf32> -> vector<32x8xf32>
    %c0_31 = arith.constant 0 : index
    %c0_32 = arith.constant 0 : index
    %c0_33 = arith.constant 0 : index
    %c0_34 = arith.constant 0 : index
    %49 = vector.load %arg8[%c0_31, %c0_32, %c0_33, %c0_34] : memref<2x4x8x32xf32, #tpu.memory_space<vmem>>, vector<1x1x8x32xf32>
    %50 = vector.shape_cast %49 : vector<1x1x8x32xf32> to vector<8x32xf32>
    %cst_35 = arith.constant dense<0.000000e+00> : vector<32x32xf32>
    %51 = tpu.matmul %48, %50, %cst_35 {dimension_numbers = #tpu.dot_dimension_numbers<[1], [0], [0], [1], [0, 0, 1, 1], [], []>} : vector<32x8xf32>, vector<8x32xf32>, vector<32x32xf32> -> vector<32x32xf32>
    %c0_36 = arith.constant 0 : index
    %c1 = arith.constant 1 : index
    %c0_37 = arith.constant 0 : index
    %c0_38 = arith.constant 0 : index
    %52 = vector.load %arg5[%c0_36, %c1, %c0_37, %c0_38] : memref<2x4x32x8xf32, #tpu.memory_space<vmem>>, vector<1x1x32x8xf32>
    %53 = vector.shape_cast %52 : vector<1x1x32x8xf32> to vector<32x8xf32>
    %cst_39 = arith.constant dense<0.000000e+00> : vector<32x8xf32>
    %54 = tpu.matmul %27, %53, %cst_39 {dimension_numbers = #tpu.dot_dimension_numbers<[1], [0], [0], [1], [0, 0, 1, 1], [], []>} : vector<32x32xf32>, vector<32x8xf32>, vector<32x8xf32> -> vector<32x8xf32>
    %c0_40 = arith.constant 0 : index
    %c1_41 = arith.constant 1 : index
    %c0_42 = arith.constant 0 : index
    %c0_43 = arith.constant 0 : index
    %55 = vector.load %arg6[%c0_40, %c1_41, %c0_42, %c0_43] : memref<2x4x32x8xf32, #tpu.memory_space<vmem>>, vector<1x1x32x8xf32>
    %56 = vector.shape_cast %55 : vector<1x1x32x8xf32> to vector<32x8xf32>
    %cst_44 = arith.constant dense<0.000000e+00> : vector<32x8xf32>
    %57 = tpu.matmul %27, %56, %cst_44 {dimension_numbers = #tpu.dot_dimension_numbers<[1], [0], [0], [1], [0, 0, 1, 1], [], []>} : vector<32x32xf32>, vector<32x8xf32>, vector<32x8xf32> -> vector<32x8xf32>
    %c0_45 = arith.constant 0 : index
    %c1_46 = arith.constant 1 : index
    %c0_47 = arith.constant 0 : index
    %c0_48 = arith.constant 0 : index
    %58 = vector.load %arg7[%c0_45, %c1_46, %c0_47, %c0_48] : memref<2x4x32x8xf32, #tpu.memory_space<vmem>>, vector<1x1x32x8xf32>
    %59 = vector.shape_cast %58 : vector<1x1x32x8xf32> to vector<32x8xf32>
    %cst_49 = arith.constant dense<0.000000e+00> : vector<32x8xf32>
    %60 = tpu.matmul %27, %59, %cst_49 {dimension_numbers = #tpu.dot_dimension_numbers<[1], [0], [0], [1], [0, 0, 1, 1], [], []>} : vector<32x32xf32>, vector<32x8xf32>, vector<32x8xf32> -> vector<32x8xf32>
    %cst_50 = arith.constant dense<0.000000e+00> : vector<32x32xf32>
    %61 = tpu.matmul %54, %57, %cst_50 {dimension_numbers = #tpu.dot_dimension_numbers<[1], [1], [0], [0], [0, 0, 1, 0], [], []>} : vector<32x8xf32>, vector<32x8xf32>, vector<32x32xf32> -> vector<32x32xf32>
    %cst_51 = arith.constant dense<0xFF800000> : vector<32xf32>
    %62 = vector.multi_reduction <maximumf>, %61, %cst_51 [1] : vector<32x32xf32> to vector<32xf32>
    %63 = vector.shape_cast %62 : vector<32xf32> to vector<32x1xf32>
    %64 = vector.broadcast %63 : vector<32x1xf32> to vector<32x32xf32>
    %65 = arith.subf %61, %64 : vector<32x32xf32>
    %66 = math.exp %65 : vector<32x32xf32>
    %cst_52 = arith.constant dense<0.000000e+00> : vector<32xf32>
    %67 = vector.multi_reduction <add>, %66, %cst_52 [1] : vector<32x32xf32> to vector<32xf32>
    %68 = vector.shape_cast %67 : vector<32xf32> to vector<32x1xf32>
    %69 = tpu.reciprocal %68 {approx = true} : vector<32x1xf32> -> vector<32x1xf32>
    %70 = vector.broadcast %69 : vector<32x1xf32> to vector<32x32xf32>
    %71 = arith.mulf %66, %70 : vector<32x32xf32>
    %cst_53 = arith.constant dense<0.000000e+00> : vector<32x8xf32>
    %72 = tpu.matmul %71, %60, %cst_53 {dimension_numbers = #tpu.dot_dimension_numbers<[1], [0], [0], [1], [0, 0, 1, 1], [], []>} : vector<32x32xf32>, vector<32x8xf32>, vector<32x8xf32> -> vector<32x8xf32>
    %c0_54 = arith.constant 0 : index
    %c1_55 = arith.constant 1 : index
    %c0_56 = arith.constant 0 : index
    %c0_57 = arith.constant 0 : index
    %73 = vector.load %arg8[%c0_54, %c1_55, %c0_56, %c0_57] : memref<2x4x8x32xf32, #tpu.memory_space<vmem>>, vector<1x1x8x32xf32>
    %74 = vector.shape_cast %73 : vector<1x1x8x32xf32> to vector<8x32xf32>
    %cst_58 = arith.constant dense<0.000000e+00> : vector<32x32xf32>
    %75 = tpu.matmul %72, %74, %cst_58 {dimension_numbers = #tpu.dot_dimension_numbers<[1], [0], [0], [1], [0, 0, 1, 1], [], []>} : vector<32x8xf32>, vector<8x32xf32>, vector<32x32xf32> -> vector<32x32xf32>
    %76 = arith.addf %51, %75 : vector<32x32xf32>
    %c0_59 = arith.constant 0 : index
    %c2 = arith.constant 2 : index
    %c0_60 = arith.constant 0 : index
    %c0_61 = arith.constant 0 : index
    %77 = vector.load %arg5[%c0_59, %c2, %c0_60, %c0_61] : memref<2x4x32x8xf32, #tpu.memory_space<vmem>>, vector<1x1x32x8xf32>
    %78 = vector.shape_cast %77 : vector<1x1x32x8xf32> to vector<32x8xf32>
    %cst_62 = arith.constant dense<0.000000e+00> : vector<32x8xf32>
    %79 = tpu.matmul %27, %78, %cst_62 {dimension_numbers = #tpu.dot_dimension_numbers<[1], [0], [0], [1], [0, 0, 1, 1], [], []>} : vector<32x32xf32>, vector<32x8xf32>, vector<32x8xf32> -> vector<32x8xf32>
    %c0_63 = arith.constant 0 : index
    %c2_64 = arith.constant 2 : index
    %c0_65 = arith.constant 0 : index
    %c0_66 = arith.constant 0 : index
    %80 = vector.load %arg6[%c0_63, %c2_64, %c0_65, %c0_66] : memref<2x4x32x8xf32, #tpu.memory_space<vmem>>, vector<1x1x32x8xf32>
    %81 = vector.shape_cast %80 : vector<1x1x32x8xf32> to vector<32x8xf32>
    %cst_67 = arith.constant dense<0.000000e+00> : vector<32x8xf32>
    %82 = tpu.matmul %27, %81, %cst_67 {dimension_numbers = #tpu.dot_dimension_numbers<[1], [0], [0], [1], [0, 0, 1, 1], [], []>} : vector<32x32xf32>, vector<32x8xf32>, vector<32x8xf32> -> vector<32x8xf32>
    %c0_68 = arith.constant 0 : index
    %c2_69 = arith.constant 2 : index
    %c0_70 = arith.constant 0 : index
    %c0_71 = arith.constant 0 : index
    %83 = vector.load %arg7[%c0_68, %c2_69, %c0_70, %c0_71] : memref<2x4x32x8xf32, #tpu.memory_space<vmem>>, vector<1x1x32x8xf32>
    %84 = vector.shape_cast %83 : vector<1x1x32x8xf32> to vector<32x8xf32>
    %cst_72 = arith.constant dense<0.000000e+00> : vector<32x8xf32>
    %85 = tpu.matmul %27, %84, %cst_72 {dimension_numbers = #tpu.dot_dimension_numbers<[1], [0], [0], [1], [0, 0, 1, 1], [], []>} : vector<32x32xf32>, vector<32x8xf32>, vector<32x8xf32> -> vector<32x8xf32>
    %cst_73 = arith.constant dense<0.000000e+00> : vector<32x32xf32>
    %86 = tpu.matmul %79, %82, %cst_73 {dimension_numbers = #tpu.dot_dimension_numbers<[1], [1], [0], [0], [0, 0, 1, 0], [], []>} : vector<32x8xf32>, vector<32x8xf32>, vector<32x32xf32> -> vector<32x32xf32>
    %cst_74 = arith.constant dense<0xFF800000> : vector<32xf32>
    %87 = vector.multi_reduction <maximumf>, %86, %cst_74 [1] : vector<32x32xf32> to vector<32xf32>
    %88 = vector.shape_cast %87 : vector<32xf32> to vector<32x1xf32>
    %89 = vector.broadcast %88 : vector<32x1xf32> to vector<32x32xf32>
    %90 = arith.subf %86, %89 : vector<32x32xf32>
    %91 = math.exp %90 : vector<32x32xf32>
    %cst_75 = arith.constant dense<0.000000e+00> : vector<32xf32>
    %92 = vector.multi_reduction <add>, %91, %cst_75 [1] : vector<32x32xf32> to vector<32xf32>
    %93 = vector.shape_cast %92 : vector<32xf32> to vector<32x1xf32>
    %94 = tpu.reciprocal %93 {approx = true} : vector<32x1xf32> -> vector<32x1xf32>
    %95 = vector.broadcast %94 : vector<32x1xf32> to vector<32x32xf32>
    %96 = arith.mulf %91, %95 : vector<32x32xf32>
    %cst_76 = arith.constant dense<0.000000e+00> : vector<32x8xf32>
    %97 = tpu.matmul %96, %85, %cst_76 {dimension_numbers = #tpu.dot_dimension_numbers<[1], [0], [0], [1], [0, 0, 1, 1], [], []>} : vector<32x32xf32>, vector<32x8xf32>, vector<32x8xf32> -> vector<32x8xf32>
    %c0_77 = arith.constant 0 : index
    %c2_78 = arith.constant 2 : index
    %c0_79 = arith.constant 0 : index
    %c0_80 = arith.constant 0 : index
    %98 = vector.load %arg8[%c0_77, %c2_78, %c0_79, %c0_80] : memref<2x4x8x32xf32, #tpu.memory_space<vmem>>, vector<1x1x8x32xf32>
    %99 = vector.shape_cast %98 : vector<1x1x8x32xf32> to vector<8x32xf32>
    %cst_81 = arith.constant dense<0.000000e+00> : vector<32x32xf32>
    %100 = tpu.matmul %97, %99, %cst_81 {dimension_numbers = #tpu.dot_dimension_numbers<[1], [0], [0], [1], [0, 0, 1, 1], [], []>} : vector<32x8xf32>, vector<8x32xf32>, vector<32x32xf32> -> vector<32x32xf32>
    %101 = arith.addf %76, %100 : vector<32x32xf32>
    %c0_82 = arith.constant 0 : index
    %c3 = arith.constant 3 : index
    %c0_83 = arith.constant 0 : index
    %c0_84 = arith.constant 0 : index
    %102 = vector.load %arg5[%c0_82, %c3, %c0_83, %c0_84] : memref<2x4x32x8xf32, #tpu.memory_space<vmem>>, vector<1x1x32x8xf32>
    %103 = vector.shape_cast %102 : vector<1x1x32x8xf32> to vector<32x8xf32>
    %cst_85 = arith.constant dense<0.000000e+00> : vector<32x8xf32>
    %104 = tpu.matmul %27, %103, %cst_85 {dimension_numbers = #tpu.dot_dimension_numbers<[1], [0], [0], [1], [0, 0, 1, 1], [], []>} : vector<32x32xf32>, vector<32x8xf32>, vector<32x8xf32> -> vector<32x8xf32>
    %c0_86 = arith.constant 0 : index
    %c3_87 = arith.constant 3 : index
    %c0_88 = arith.constant 0 : index
    %c0_89 = arith.constant 0 : index
    %105 = vector.load %arg6[%c0_86, %c3_87, %c0_88, %c0_89] : memref<2x4x32x8xf32, #tpu.memory_space<vmem>>, vector<1x1x32x8xf32>
    %106 = vector.shape_cast %105 : vector<1x1x32x8xf32> to vector<32x8xf32>
    %cst_90 = arith.constant dense<0.000000e+00> : vector<32x8xf32>
    %107 = tpu.matmul %27, %106, %cst_90 {dimension_numbers = #tpu.dot_dimension_numbers<[1], [0], [0], [1], [0, 0, 1, 1], [], []>} : vector<32x32xf32>, vector<32x8xf32>, vector<32x8xf32> -> vector<32x8xf32>
    %c0_91 = arith.constant 0 : index
    %c3_92 = arith.constant 3 : index
    %c0_93 = arith.constant 0 : index
    %c0_94 = arith.constant 0 : index
    %108 = vector.load %arg7[%c0_91, %c3_92, %c0_93, %c0_94] : memref<2x4x32x8xf32, #tpu.memory_space<vmem>>, vector<1x1x32x8xf32>
    %109 = vector.shape_cast %108 : vector<1x1x32x8xf32> to vector<32x8xf32>
    %cst_95 = arith.constant dense<0.000000e+00> : vector<32x8xf32>
    %110 = tpu.matmul %27, %109, %cst_95 {dimension_numbers = #tpu.dot_dimension_numbers<[1], [0], [0], [1], [0, 0, 1, 1], [], []>} : vector<32x32xf32>, vector<32x8xf32>, vector<32x8xf32> -> vector<32x8xf32>
    %cst_96 = arith.constant dense<0.000000e+00> : vector<32x32xf32>
    %111 = tpu.matmul %104, %107, %cst_96 {dimension_numbers = #tpu.dot_dimension_numbers<[1], [1], [0], [0], [0, 0, 1, 0], [], []>} : vector<32x8xf32>, vector<32x8xf32>, vector<32x32xf32> -> vector<32x32xf32>
    %cst_97 = arith.constant dense<0xFF800000> : vector<32xf32>
    %112 = vector.multi_reduction <maximumf>, %111, %cst_97 [1] : vector<32x32xf32> to vector<32xf32>
    %113 = vector.shape_cast %112 : vector<32xf32> to vector<32x1xf32>
    %114 = vector.broadcast %113 : vector<32x1xf32> to vector<32x32xf32>
    %115 = arith.subf %111, %114 : vector<32x32xf32>
    %116 = math.exp %115 : vector<32x32xf32>
    %cst_98 = arith.constant dense<0.000000e+00> : vector<32xf32>
    %117 = vector.multi_reduction <add>, %116, %cst_98 [1] : vector<32x32xf32> to vector<32xf32>
    %118 = vector.shape_cast %117 : vector<32xf32> to vector<32x1xf32>
    %119 = tpu.reciprocal %118 {approx = true} : vector<32x1xf32> -> vector<32x1xf32>
    %120 = vector.broadcast %119 : vector<32x1xf32> to vector<32x32xf32>
    %121 = arith.mulf %116, %120 : vector<32x32xf32>
    %cst_99 = arith.constant dense<0.000000e+00> : vector<32x8xf32>
    %122 = tpu.matmul %121, %110, %cst_99 {dimension_numbers = #tpu.dot_dimension_numbers<[1], [0], [0], [1], [0, 0, 1, 1], [], []>} : vector<32x32xf32>, vector<32x8xf32>, vector<32x8xf32> -> vector<32x8xf32>
    %c0_100 = arith.constant 0 : index
    %c3_101 = arith.constant 3 : index
    %c0_102 = arith.constant 0 : index
    %c0_103 = arith.constant 0 : index
    %123 = vector.load %arg8[%c0_100, %c3_101, %c0_102, %c0_103] : memref<2x4x8x32xf32, #tpu.memory_space<vmem>>, vector<1x1x8x32xf32>
    %124 = vector.shape_cast %123 : vector<1x1x8x32xf32> to vector<8x32xf32>
    %cst_104 = arith.constant dense<0.000000e+00> : vector<32x32xf32>
    %125 = tpu.matmul %122, %124, %cst_104 {dimension_numbers = #tpu.dot_dimension_numbers<[1], [0], [0], [1], [0, 0, 1, 1], [], []>} : vector<32x8xf32>, vector<8x32xf32>, vector<32x32xf32> -> vector<32x32xf32>
    %126 = arith.addf %101, %125 : vector<32x32xf32>
    %127 = arith.addf %3, %126 : vector<32x32xf32>
    %c0_105 = arith.constant 0 : index
    %c0_106 = arith.constant 0 : index
    %128 = vector.load %arg9[%c0_105, %c0_106] : memref<2x32xf32, #tpu.memory_space<vmem>>, vector<1x32xf32>
    %129 = vector.broadcast %128 : vector<1x32xf32> to vector<32x32xf32>
    %130 = arith.addf %127, %129 : vector<32x32xf32>
    %c0_107 = arith.constant 0 : index
    %c0_108 = arith.constant 0 : index
    %131 = vector.load %arg10[%c0_107, %c0_108] : memref<2x32xf32, #tpu.memory_space<vmem>>, vector<1x32xf32>
    %c0_109 = arith.constant 0 : index
    %c0_110 = arith.constant 0 : index
    %132 = vector.load %arg11[%c0_109, %c0_110] : memref<2x32xf32, #tpu.memory_space<vmem>>, vector<1x32xf32>
    %cst_111 = arith.constant dense<0.000000e+00> : vector<32xf32>
    %133 = vector.multi_reduction <add>, %130, %cst_111 [1] : vector<32x32xf32> to vector<32xf32>
    %134 = vector.shape_cast %133 : vector<32xf32> to vector<32x1xf32>
    %cst_112 = arith.constant 3.200000e+01 : f32
    %135 = vector.broadcast %cst_112 : f32 to vector<32x1xf32>
    %136 = arith.divf %134, %135 : vector<32x1xf32>
    %137 = vector.broadcast %136 : vector<32x1xf32> to vector<32x32xf32>
    %138 = arith.subf %130, %137 : vector<32x32xf32>
    %139 = arith.mulf %138, %138 : vector<32x32xf32>
    %cst_113 = arith.constant dense<0.000000e+00> : vector<32xf32>
    %140 = vector.multi_reduction <add>, %139, %cst_113 [1] : vector<32x32xf32> to vector<32xf32>
    %141 = vector.shape_cast %140 : vector<32xf32> to vector<32x1xf32>
    %cst_114 = arith.constant 3.200000e+01 : f32
    %142 = vector.broadcast %cst_114 : f32 to vector<32x1xf32>
    %143 = arith.divf %141, %142 : vector<32x1xf32>
    %144 = vector.broadcast %136 : vector<32x1xf32> to vector<32x32xf32>
    %145 = arith.subf %130, %144 : vector<32x32xf32>
    %cst_115 = arith.constant 9.99999974E-6 : f32
    %146 = vector.broadcast %cst_115 : f32 to vector<32x1xf32>
    %147 = arith.addf %143, %146 : vector<32x1xf32>
    %148 = math.rsqrt %147 : vector<32x1xf32>
    %149 = vector.broadcast %148 : vector<32x1xf32> to vector<32x32xf32>
    %150 = arith.mulf %145, %149 : vector<32x32xf32>
    %151 = vector.broadcast %131 : vector<1x32xf32> to vector<32x32xf32>
    %152 = arith.mulf %150, %151 : vector<32x32xf32>
    %153 = vector.broadcast %132 : vector<1x32xf32> to vector<32x32xf32>
    %154 = arith.addf %152, %153 : vector<32x32xf32>
    %c0_116 = arith.constant 0 : index
    %c0_117 = arith.constant 0 : index
    %c0_118 = arith.constant 0 : index
    %155 = vector.load %arg12[%c0_116, %c0_117, %c0_118] : memref<2x32x128xf32, #tpu.memory_space<vmem>>, vector<1x32x128xf32>
    %156 = vector.shape_cast %155 : vector<1x32x128xf32> to vector<32x128xf32>
    %cst_119 = arith.constant dense<0.000000e+00> : vector<32x128xf32>
    %157 = tpu.matmul %154, %156, %cst_119 {dimension_numbers = #tpu.dot_dimension_numbers<[1], [0], [0], [1], [0, 0, 1, 1], [], []>} : vector<32x32xf32>, vector<32x128xf32>, vector<32x128xf32> -> vector<32x128xf32>
    %c0_120 = arith.constant 0 : index
    %c0_121 = arith.constant 0 : index
    %158 = vector.load %arg13[%c0_120, %c0_121] : memref<2x128xf32, #tpu.memory_space<vmem>>, vector<1x128xf32>
    %159 = vector.broadcast %158 : vector<1x128xf32> to vector<32x128xf32>
    %160 = arith.addf %157, %159 : vector<32x128xf32>
    %cst_122 = arith.constant 5.000000e-01 : f32
    %161 = vector.broadcast %cst_122 : f32 to vector<32x128xf32>
    %162 = arith.mulf %161, %160 : vector<32x128xf32>
    %cst_123 = arith.constant 4.471500e-02 : f32
    %163 = vector.broadcast %cst_123 : f32 to vector<32x128xf32>
    %164 = arith.mulf %163, %160 : vector<32x128xf32>
    %165 = arith.mulf %164, %160 : vector<32x128xf32>
    %166 = arith.mulf %165, %160 : vector<32x128xf32>
    %167 = arith.addf %160, %166 : vector<32x128xf32>
    %cst_124 = arith.constant 0.797884583 : f32
    %168 = vector.broadcast %cst_124 : f32 to vector<32x128xf32>
    %169 = arith.mulf %168, %167 : vector<32x128xf32>
    %170 = math.tanh %169 : vector<32x128xf32>
    %cst_125 = arith.constant 1.000000e+00 : f32
    %171 = vector.broadcast %cst_125 : f32 to vector<32x128xf32>
    %172 = arith.addf %171, %170 : vector<32x128xf32>
    %173 = arith.mulf %162, %172 : vector<32x128xf32>
    %c0_126 = arith.constant 0 : index
    %c0_127 = arith.constant 0 : index
    %c0_128 = arith.constant 0 : index
    %174 = vector.load %arg14[%c0_126, %c0_127, %c0_128] : memref<2x128x32xf32, #tpu.memory_space<vmem>>, vector<1x128x32xf32>
    %175 = vector.shape_cast %174 : vector<1x128x32xf32> to vector<128x32xf32>
    %cst_129 = arith.constant dense<0.000000e+00> : vector<32x32xf32>
    %176 = tpu.matmul %173, %175, %cst_129 {dimension_numbers = #tpu.dot_dimension_numbers<[1], [0], [0], [1], [0, 0, 1, 1], [], []>} : vector<32x128xf32>, vector<128x32xf32>, vector<32x32xf32> -> vector<32x32xf32>
    %c0_130 = arith.constant 0 : index
    %c0_131 = arith.constant 0 : index
    %177 = vector.load %arg15[%c0_130, %c0_131] : memref<2x32xf32, #tpu.memory_space<vmem>>, vector<1x32xf32>
    %178 = vector.broadcast %177 : vector<1x32xf32> to vector<32x32xf32>
    %179 = arith.addf %176, %178 : vector<32x32xf32>
    %180 = arith.addf %130, %179 : vector<32x32xf32>
    %c1_132 = arith.constant 1 : index
    %c0_133 = arith.constant 0 : index
    %181 = vector.load %arg3[%c1_132, %c0_133] : memref<2x32xf32, #tpu.memory_space<vmem>>, vector<1x32xf32>
    %c1_134 = arith.constant 1 : index
    %c0_135 = arith.constant 0 : index
    %182 = vector.load %arg4[%c1_134, %c0_135] : memref<2x32xf32, #tpu.memory_space<vmem>>, vector<1x32xf32>
    %cst_136 = arith.constant dense<0.000000e+00> : vector<32xf32>
    %183 = vector.multi_reduction <add>, %180, %cst_136 [1] : vector<32x32xf32> to vector<32xf32>
    %184 = vector.shape_cast %183 : vector<32xf32> to vector<32x1xf32>
    %cst_137 = arith.constant 3.200000e+01 : f32
    %185 = vector.broadcast %cst_137 : f32 to vector<32x1xf32>
    %186 = arith.divf %184, %185 : vector<32x1xf32>
    %187 = vector.broadcast %186 : vector<32x1xf32> to vector<32x32xf32>
    %188 = arith.subf %180, %187 : vector<32x32xf32>
    %189 = arith.mulf %188, %188 : vector<32x32xf32>
    %cst_138 = arith.constant dense<0.000000e+00> : vector<32xf32>
    %190 = vector.multi_reduction <add>, %189, %cst_138 [1] : vector<32x32xf32> to vector<32xf32>
    %191 = vector.shape_cast %190 : vector<32xf32> to vector<32x1xf32>
    %cst_139 = arith.constant 3.200000e+01 : f32
    %192 = vector.broadcast %cst_139 : f32 to vector<32x1xf32>
    %193 = arith.divf %191, %192 : vector<32x1xf32>
    %194 = vector.broadcast %186 : vector<32x1xf32> to vector<32x32xf32>
    %195 = arith.subf %180, %194 : vector<32x32xf32>
    %cst_140 = arith.constant 9.99999974E-6 : f32
    %196 = vector.broadcast %cst_140 : f32 to vector<32x1xf32>
    %197 = arith.addf %193, %196 : vector<32x1xf32>
    %198 = math.rsqrt %197 : vector<32x1xf32>
    %199 = vector.broadcast %198 : vector<32x1xf32> to vector<32x32xf32>
    %200 = arith.mulf %195, %199 : vector<32x32xf32>
    %201 = vector.broadcast %181 : vector<1x32xf32> to vector<32x32xf32>
    %202 = arith.mulf %200, %201 : vector<32x32xf32>
    %203 = vector.broadcast %182 : vector<1x32xf32> to vector<32x32xf32>
    %204 = arith.addf %202, %203 : vector<32x32xf32>
    %c1_141 = arith.constant 1 : index
    %c0_142 = arith.constant 0 : index
    %c0_143 = arith.constant 0 : index
    %c0_144 = arith.constant 0 : index
    %205 = vector.load %arg5[%c1_141, %c0_142, %c0_143, %c0_144] : memref<2x4x32x8xf32, #tpu.memory_space<vmem>>, vector<1x1x32x8xf32>
    %206 = vector.shape_cast %205 : vector<1x1x32x8xf32> to vector<32x8xf32>
    %cst_145 = arith.constant dense<0.000000e+00> : vector<32x8xf32>
    %207 = tpu.matmul %204, %206, %cst_145 {dimension_numbers = #tpu.dot_dimension_numbers<[1], [0], [0], [1], [0, 0, 1, 1], [], []>} : vector<32x32xf32>, vector<32x8xf32>, vector<32x8xf32> -> vector<32x8xf32>
    %c1_146 = arith.constant 1 : index
    %c0_147 = arith.constant 0 : index
    %c0_148 = arith.constant 0 : index
    %c0_149 = arith.constant 0 : index
    %208 = vector.load %arg6[%c1_146, %c0_147, %c0_148, %c0_149] : memref<2x4x32x8xf32, #tpu.memory_space<vmem>>, vector<1x1x32x8xf32>
    %209 = vector.shape_cast %208 : vector<1x1x32x8xf32> to vector<32x8xf32>
    %cst_150 = arith.constant dense<0.000000e+00> : vector<32x8xf32>
    %210 = tpu.matmul %204, %209, %cst_150 {dimension_numbers = #tpu.dot_dimension_numbers<[1], [0], [0], [1], [0, 0, 1, 1], [], []>} : vector<32x32xf32>, vector<32x8xf32>, vector<32x8xf32> -> vector<32x8xf32>
    %c1_151 = arith.constant 1 : index
    %c0_152 = arith.constant 0 : index
    %c0_153 = arith.constant 0 : index
    %c0_154 = arith.constant 0 : index
    %211 = vector.load %arg7[%c1_151, %c0_152, %c0_153, %c0_154] : memref<2x4x32x8xf32, #tpu.memory_space<vmem>>, vector<1x1x32x8xf32>
    %212 = vector.shape_cast %211 : vector<1x1x32x8xf32> to vector<32x8xf32>
    %cst_155 = arith.constant dense<0.000000e+00> : vector<32x8xf32>
    %213 = tpu.matmul %204, %212, %cst_155 {dimension_numbers = #tpu.dot_dimension_numbers<[1], [0], [0], [1], [0, 0, 1, 1], [], []>} : vector<32x32xf32>, vector<32x8xf32>, vector<32x8xf32> -> vector<32x8xf32>
    %cst_156 = arith.constant dense<0.000000e+00> : vector<32x32xf32>
    %214 = tpu.matmul %207, %210, %cst_156 {dimension_numbers = #tpu.dot_dimension_numbers<[1], [1], [0], [0], [0, 0, 1, 0], [], []>} : vector<32x8xf32>, vector<32x8xf32>, vector<32x32xf32> -> vector<32x32xf32>
    %cst_157 = arith.constant dense<0xFF800000> : vector<32xf32>
    %215 = vector.multi_reduction <maximumf>, %214, %cst_157 [1] : vector<32x32xf32> to vector<32xf32>
    %216 = vector.shape_cast %215 : vector<32xf32> to vector<32x1xf32>
    %217 = vector.broadcast %216 : vector<32x1xf32> to vector<32x32xf32>
    %218 = arith.subf %214, %217 : vector<32x32xf32>
    %219 = math.exp %218 : vector<32x32xf32>
    %cst_158 = arith.constant dense<0.000000e+00> : vector<32xf32>
    %220 = vector.multi_reduction <add>, %219, %cst_158 [1] : vector<32x32xf32> to vector<32xf32>
    %221 = vector.shape_cast %220 : vector<32xf32> to vector<32x1xf32>
    %222 = tpu.reciprocal %221 {approx = true} : vector<32x1xf32> -> vector<32x1xf32>
    %223 = vector.broadcast %222 : vector<32x1xf32> to vector<32x32xf32>
    %224 = arith.mulf %219, %223 : vector<32x32xf32>
    %cst_159 = arith.constant dense<0.000000e+00> : vector<32x8xf32>
    %225 = tpu.matmul %224, %213, %cst_159 {dimension_numbers = #tpu.dot_dimension_numbers<[1], [0], [0], [1], [0, 0, 1, 1], [], []>} : vector<32x32xf32>, vector<32x8xf32>, vector<32x8xf32> -> vector<32x8xf32>
    %c1_160 = arith.constant 1 : index
    %c0_161 = arith.constant 0 : index
    %c0_162 = arith.constant 0 : index
    %c0_163 = arith.constant 0 : index
    %226 = vector.load %arg8[%c1_160, %c0_161, %c0_162, %c0_163] : memref<2x4x8x32xf32, #tpu.memory_space<vmem>>, vector<1x1x8x32xf32>
    %227 = vector.shape_cast %226 : vector<1x1x8x32xf32> to vector<8x32xf32>
    %cst_164 = arith.constant dense<0.000000e+00> : vector<32x32xf32>
    %228 = tpu.matmul %225, %227, %cst_164 {dimension_numbers = #tpu.dot_dimension_numbers<[1], [0], [0], [1], [0, 0, 1, 1], [], []>} : vector<32x8xf32>, vector<8x32xf32>, vector<32x32xf32> -> vector<32x32xf32>
    %c1_165 = arith.constant 1 : index
    %c1_166 = arith.constant 1 : index
    %c0_167 = arith.constant 0 : index
    %c0_168 = arith.constant 0 : index
    %229 = vector.load %arg5[%c1_165, %c1_166, %c0_167, %c0_168] : memref<2x4x32x8xf32, #tpu.memory_space<vmem>>, vector<1x1x32x8xf32>
    %230 = vector.shape_cast %229 : vector<1x1x32x8xf32> to vector<32x8xf32>
    %cst_169 = arith.constant dense<0.000000e+00> : vector<32x8xf32>
    %231 = tpu.matmul %204, %230, %cst_169 {dimension_numbers = #tpu.dot_dimension_numbers<[1], [0], [0], [1], [0, 0, 1, 1], [], []>} : vector<32x32xf32>, vector<32x8xf32>, vector<32x8xf32> -> vector<32x8xf32>
    %c1_170 = arith.constant 1 : index
    %c1_171 = arith.constant 1 : index
    %c0_172 = arith.constant 0 : index
    %c0_173 = arith.constant 0 : index
    %232 = vector.load %arg6[%c1_170, %c1_171, %c0_172, %c0_173] : memref<2x4x32x8xf32, #tpu.memory_space<vmem>>, vector<1x1x32x8xf32>
    %233 = vector.shape_cast %232 : vector<1x1x32x8xf32> to vector<32x8xf32>
    %cst_174 = arith.constant dense<0.000000e+00> : vector<32x8xf32>
    %234 = tpu.matmul %204, %233, %cst_174 {dimension_numbers = #tpu.dot_dimension_numbers<[1], [0], [0], [1], [0, 0, 1, 1], [], []>} : vector<32x32xf32>, vector<32x8xf32>, vector<32x8xf32> -> vector<32x8xf32>
    %c1_175 = arith.constant 1 : index
    %c1_176 = arith.constant 1 : index
    %c0_177 = arith.constant 0 : index
    %c0_178 = arith.constant 0 : index
    %235 = vector.load %arg7[%c1_175, %c1_176, %c0_177, %c0_178] : memref<2x4x32x8xf32, #tpu.memory_space<vmem>>, vector<1x1x32x8xf32>
    %236 = vector.shape_cast %235 : vector<1x1x32x8xf32> to vector<32x8xf32>
    %cst_179 = arith.constant dense<0.000000e+00> : vector<32x8xf32>
    %237 = tpu.matmul %204, %236, %cst_179 {dimension_numbers = #tpu.dot_dimension_numbers<[1], [0], [0], [1], [0, 0, 1, 1], [], []>} : vector<32x32xf32>, vector<32x8xf32>, vector<32x8xf32> -> vector<32x8xf32>
    %cst_180 = arith.constant dense<0.000000e+00> : vector<32x32xf32>
    %238 = tpu.matmul %231, %234, %cst_180 {dimension_numbers = #tpu.dot_dimension_numbers<[1], [1], [0], [0], [0, 0, 1, 0], [], []>} : vector<32x8xf32>, vector<32x8xf32>, vector<32x32xf32> -> vector<32x32xf32>
    %cst_181 = arith.constant dense<0xFF800000> : vector<32xf32>
    %239 = vector.multi_reduction <maximumf>, %238, %cst_181 [1] : vector<32x32xf32> to vector<32xf32>
    %240 = vector.shape_cast %239 : vector<32xf32> to vector<32x1xf32>
    %241 = vector.broadcast %240 : vector<32x1xf32> to vector<32x32xf32>
    %242 = arith.subf %238, %241 : vector<32x32xf32>
    %243 = math.exp %242 : vector<32x32xf32>
    %cst_182 = arith.constant dense<0.000000e+00> : vector<32xf32>
    %244 = vector.multi_reduction <add>, %243, %cst_182 [1] : vector<32x32xf32> to vector<32xf32>
    %245 = vector.shape_cast %244 : vector<32xf32> to vector<32x1xf32>
    %246 = tpu.reciprocal %245 {approx = true} : vector<32x1xf32> -> vector<32x1xf32>
    %247 = vector.broadcast %246 : vector<32x1xf32> to vector<32x32xf32>
    %248 = arith.mulf %243, %247 : vector<32x32xf32>
    %cst_183 = arith.constant dense<0.000000e+00> : vector<32x8xf32>
    %249 = tpu.matmul %248, %237, %cst_183 {dimension_numbers = #tpu.dot_dimension_numbers<[1], [0], [0], [1], [0, 0, 1, 1], [], []>} : vector<32x32xf32>, vector<32x8xf32>, vector<32x8xf32> -> vector<32x8xf32>
    %c1_184 = arith.constant 1 : index
    %c1_185 = arith.constant 1 : index
    %c0_186 = arith.constant 0 : index
    %c0_187 = arith.constant 0 : index
    %250 = vector.load %arg8[%c1_184, %c1_185, %c0_186, %c0_187] : memref<2x4x8x32xf32, #tpu.memory_space<vmem>>, vector<1x1x8x32xf32>
    %251 = vector.shape_cast %250 : vector<1x1x8x32xf32> to vector<8x32xf32>
    %cst_188 = arith.constant dense<0.000000e+00> : vector<32x32xf32>
    %252 = tpu.matmul %249, %251, %cst_188 {dimension_numbers = #tpu.dot_dimension_numbers<[1], [0], [0], [1], [0, 0, 1, 1], [], []>} : vector<32x8xf32>, vector<8x32xf32>, vector<32x32xf32> -> vector<32x32xf32>
    %253 = arith.addf %228, %252 : vector<32x32xf32>
    %c1_189 = arith.constant 1 : index
    %c2_190 = arith.constant 2 : index
    %c0_191 = arith.constant 0 : index
    %c0_192 = arith.constant 0 : index
    %254 = vector.load %arg5[%c1_189, %c2_190, %c0_191, %c0_192] : memref<2x4x32x8xf32, #tpu.memory_space<vmem>>, vector<1x1x32x8xf32>
    %255 = vector.shape_cast %254 : vector<1x1x32x8xf32> to vector<32x8xf32>
    %cst_193 = arith.constant dense<0.000000e+00> : vector<32x8xf32>
    %256 = tpu.matmul %204, %255, %cst_193 {dimension_numbers = #tpu.dot_dimension_numbers<[1], [0], [0], [1], [0, 0, 1, 1], [], []>} : vector<32x32xf32>, vector<32x8xf32>, vector<32x8xf32> -> vector<32x8xf32>
    %c1_194 = arith.constant 1 : index
    %c2_195 = arith.constant 2 : index
    %c0_196 = arith.constant 0 : index
    %c0_197 = arith.constant 0 : index
    %257 = vector.load %arg6[%c1_194, %c2_195, %c0_196, %c0_197] : memref<2x4x32x8xf32, #tpu.memory_space<vmem>>, vector<1x1x32x8xf32>
    %258 = vector.shape_cast %257 : vector<1x1x32x8xf32> to vector<32x8xf32>
    %cst_198 = arith.constant dense<0.000000e+00> : vector<32x8xf32>
    %259 = tpu.matmul %204, %258, %cst_198 {dimension_numbers = #tpu.dot_dimension_numbers<[1], [0], [0], [1], [0, 0, 1, 1], [], []>} : vector<32x32xf32>, vector<32x8xf32>, vector<32x8xf32> -> vector<32x8xf32>
    %c1_199 = arith.constant 1 : index
    %c2_200 = arith.constant 2 : index
    %c0_201 = arith.constant 0 : index
    %c0_202 = arith.constant 0 : index
    %260 = vector.load %arg7[%c1_199, %c2_200, %c0_201, %c0_202] : memref<2x4x32x8xf32, #tpu.memory_space<vmem>>, vector<1x1x32x8xf32>
    %261 = vector.shape_cast %260 : vector<1x1x32x8xf32> to vector<32x8xf32>
    %cst_203 = arith.constant dense<0.000000e+00> : vector<32x8xf32>
    %262 = tpu.matmul %204, %261, %cst_203 {dimension_numbers = #tpu.dot_dimension_numbers<[1], [0], [0], [1], [0, 0, 1, 1], [], []>} : vector<32x32xf32>, vector<32x8xf32>, vector<32x8xf32> -> vector<32x8xf32>
    %cst_204 = arith.constant dense<0.000000e+00> : vector<32x32xf32>
    %263 = tpu.matmul %256, %259, %cst_204 {dimension_numbers = #tpu.dot_dimension_numbers<[1], [1], [0], [0], [0, 0, 1, 0], [], []>} : vector<32x8xf32>, vector<32x8xf32>, vector<32x32xf32> -> vector<32x32xf32>
    %cst_205 = arith.constant dense<0xFF800000> : vector<32xf32>
    %264 = vector.multi_reduction <maximumf>, %263, %cst_205 [1] : vector<32x32xf32> to vector<32xf32>
    %265 = vector.shape_cast %264 : vector<32xf32> to vector<32x1xf32>
    %266 = vector.broadcast %265 : vector<32x1xf32> to vector<32x32xf32>
    %267 = arith.subf %263, %266 : vector<32x32xf32>
    %268 = math.exp %267 : vector<32x32xf32>
    %cst_206 = arith.constant dense<0.000000e+00> : vector<32xf32>
    %269 = vector.multi_reduction <add>, %268, %cst_206 [1] : vector<32x32xf32> to vector<32xf32>
    %270 = vector.shape_cast %269 : vector<32xf32> to vector<32x1xf32>
    %271 = tpu.reciprocal %270 {approx = true} : vector<32x1xf32> -> vector<32x1xf32>
    %272 = vector.broadcast %271 : vector<32x1xf32> to vector<32x32xf32>
    %273 = arith.mulf %268, %272 : vector<32x32xf32>
    %cst_207 = arith.constant dense<0.000000e+00> : vector<32x8xf32>
    %274 = tpu.matmul %273, %262, %cst_207 {dimension_numbers = #tpu.dot_dimension_numbers<[1], [0], [0], [1], [0, 0, 1, 1], [], []>} : vector<32x32xf32>, vector<32x8xf32>, vector<32x8xf32> -> vector<32x8xf32>
    %c1_208 = arith.constant 1 : index
    %c2_209 = arith.constant 2 : index
    %c0_210 = arith.constant 0 : index
    %c0_211 = arith.constant 0 : index
    %275 = vector.load %arg8[%c1_208, %c2_209, %c0_210, %c0_211] : memref<2x4x8x32xf32, #tpu.memory_space<vmem>>, vector<1x1x8x32xf32>
    %276 = vector.shape_cast %275 : vector<1x1x8x32xf32> to vector<8x32xf32>
    %cst_212 = arith.constant dense<0.000000e+00> : vector<32x32xf32>
    %277 = tpu.matmul %274, %276, %cst_212 {dimension_numbers = #tpu.dot_dimension_numbers<[1], [0], [0], [1], [0, 0, 1, 1], [], []>} : vector<32x8xf32>, vector<8x32xf32>, vector<32x32xf32> -> vector<32x32xf32>
    %278 = arith.addf %253, %277 : vector<32x32xf32>
    %c1_213 = arith.constant 1 : index
    %c3_214 = arith.constant 3 : index
    %c0_215 = arith.constant 0 : index
    %c0_216 = arith.constant 0 : index
    %279 = vector.load %arg5[%c1_213, %c3_214, %c0_215, %c0_216] : memref<2x4x32x8xf32, #tpu.memory_space<vmem>>, vector<1x1x32x8xf32>
    %280 = vector.shape_cast %279 : vector<1x1x32x8xf32> to vector<32x8xf32>
    %cst_217 = arith.constant dense<0.000000e+00> : vector<32x8xf32>
    %281 = tpu.matmul %204, %280, %cst_217 {dimension_numbers = #tpu.dot_dimension_numbers<[1], [0], [0], [1], [0, 0, 1, 1], [], []>} : vector<32x32xf32>, vector<32x8xf32>, vector<32x8xf32> -> vector<32x8xf32>
    %c1_218 = arith.constant 1 : index
    %c3_219 = arith.constant 3 : index
    %c0_220 = arith.constant 0 : index
    %c0_221 = arith.constant 0 : index
    %282 = vector.load %arg6[%c1_218, %c3_219, %c0_220, %c0_221] : memref<2x4x32x8xf32, #tpu.memory_space<vmem>>, vector<1x1x32x8xf32>
    %283 = vector.shape_cast %282 : vector<1x1x32x8xf32> to vector<32x8xf32>
    %cst_222 = arith.constant dense<0.000000e+00> : vector<32x8xf32>
    %284 = tpu.matmul %204, %283, %cst_222 {dimension_numbers = #tpu.dot_dimension_numbers<[1], [0], [0], [1], [0, 0, 1, 1], [], []>} : vector<32x32xf32>, vector<32x8xf32>, vector<32x8xf32> -> vector<32x8xf32>
    %c1_223 = arith.constant 1 : index
    %c3_224 = arith.constant 3 : index
    %c0_225 = arith.constant 0 : index
    %c0_226 = arith.constant 0 : index
    %285 = vector.load %arg7[%c1_223, %c3_224, %c0_225, %c0_226] : memref<2x4x32x8xf32, #tpu.memory_space<vmem>>, vector<1x1x32x8xf32>
    %286 = vector.shape_cast %285 : vector<1x1x32x8xf32> to vector<32x8xf32>
    %cst_227 = arith.constant dense<0.000000e+00> : vector<32x8xf32>
    %287 = tpu.matmul %204, %286, %cst_227 {dimension_numbers = #tpu.dot_dimension_numbers<[1], [0], [0], [1], [0, 0, 1, 1], [], []>} : vector<32x32xf32>, vector<32x8xf32>, vector<32x8xf32> -> vector<32x8xf32>
    %cst_228 = arith.constant dense<0.000000e+00> : vector<32x32xf32>
    %288 = tpu.matmul %281, %284, %cst_228 {dimension_numbers = #tpu.dot_dimension_numbers<[1], [1], [0], [0], [0, 0, 1, 0], [], []>} : vector<32x8xf32>, vector<32x8xf32>, vector<32x32xf32> -> vector<32x32xf32>
    %cst_229 = arith.constant dense<0xFF800000> : vector<32xf32>
    %289 = vector.multi_reduction <maximumf>, %288, %cst_229 [1] : vector<32x32xf32> to vector<32xf32>
    %290 = vector.shape_cast %289 : vector<32xf32> to vector<32x1xf32>
    %291 = vector.broadcast %290 : vector<32x1xf32> to vector<32x32xf32>
    %292 = arith.subf %288, %291 : vector<32x32xf32>
    %293 = math.exp %292 : vector<32x32xf32>
    %cst_230 = arith.constant dense<0.000000e+00> : vector<32xf32>
    %294 = vector.multi_reduction <add>, %293, %cst_230 [1] : vector<32x32xf32> to vector<32xf32>
    %295 = vector.shape_cast %294 : vector<32xf32> to vector<32x1xf32>
    %296 = tpu.reciprocal %295 {approx = true} : vector<32x1xf32> -> vector<32x1xf32>
    %297 = vector.broadcast %296 : vector<32x1xf32> to vector<32x32xf32>
    %298 = arith.mulf %293, %297 : vector<32x32xf32>
    %cst_231 = arith.constant dense<0.000000e+00> : vector<32x8xf32>
    %299 = tpu.matmul %298, %287, %cst_231 {dimension_numbers = #tpu.dot_dimension_numbers<[1], [0], [0], [1], [0, 0, 1, 1], [], []>} : vector<32x32xf32>, vector<32x8xf32>, vector<32x8xf32> -> vector<32x8xf32>
    %c1_232 = arith.constant 1 : index
    %c3_233 = arith.constant 3 : index
    %c0_234 = arith.constant 0 : index
    %c0_235 = arith.constant 0 : index
    %300 = vector.load %arg8[%c1_232, %c3_233, %c0_234, %c0_235] : memref<2x4x8x32xf32, #tpu.memory_space<vmem>>, vector<1x1x8x32xf32>
    %301 = vector.shape_cast %300 : vector<1x1x8x32xf32> to vector<8x32xf32>
    %cst_236 = arith.constant dense<0.000000e+00> : vector<32x32xf32>
    %302 = tpu.matmul %299, %301, %cst_236 {dimension_numbers = #tpu.dot_dimension_numbers<[1], [0], [0], [1], [0, 0, 1, 1], [], []>} : vector<32x8xf32>, vector<8x32xf32>, vector<32x32xf32> -> vector<32x32xf32>
    %303 = arith.addf %278, %302 : vector<32x32xf32>
    %304 = arith.addf %180, %303 : vector<32x32xf32>
    %c1_237 = arith.constant 1 : index
    %c0_238 = arith.constant 0 : index
    %305 = vector.load %arg9[%c1_237, %c0_238] : memref<2x32xf32, #tpu.memory_space<vmem>>, vector<1x32xf32>
    %306 = vector.broadcast %305 : vector<1x32xf32> to vector<32x32xf32>
    %307 = arith.addf %304, %306 : vector<32x32xf32>
    %c1_239 = arith.constant 1 : index
    %c0_240 = arith.constant 0 : index
    %308 = vector.load %arg10[%c1_239, %c0_240] : memref<2x32xf32, #tpu.memory_space<vmem>>, vector<1x32xf32>
    %c1_241 = arith.constant 1 : index
    %c0_242 = arith.constant 0 : index
    %309 = vector.load %arg11[%c1_241, %c0_242] : memref<2x32xf32, #tpu.memory_space<vmem>>, vector<1x32xf32>
    %cst_243 = arith.constant dense<0.000000e+00> : vector<32xf32>
    %310 = vector.multi_reduction <add>, %307, %cst_243 [1] : vector<32x32xf32> to vector<32xf32>
    %311 = vector.shape_cast %310 : vector<32xf32> to vector<32x1xf32>
    %cst_244 = arith.constant 3.200000e+01 : f32
    %312 = vector.broadcast %cst_244 : f32 to vector<32x1xf32>
    %313 = arith.divf %311, %312 : vector<32x1xf32>
    %314 = vector.broadcast %313 : vector<32x1xf32> to vector<32x32xf32>
    %315 = arith.subf %307, %314 : vector<32x32xf32>
    %316 = arith.mulf %315, %315 : vector<32x32xf32>
    %cst_245 = arith.constant dense<0.000000e+00> : vector<32xf32>
    %317 = vector.multi_reduction <add>, %316, %cst_245 [1] : vector<32x32xf32> to vector<32xf32>
    %318 = vector.shape_cast %317 : vector<32xf32> to vector<32x1xf32>
    %cst_246 = arith.constant 3.200000e+01 : f32
    %319 = vector.broadcast %cst_246 : f32 to vector<32x1xf32>
    %320 = arith.divf %318, %319 : vector<32x1xf32>
    %321 = vector.broadcast %313 : vector<32x1xf32> to vector<32x32xf32>
    %322 = arith.subf %307, %321 : vector<32x32xf32>
    %cst_247 = arith.constant 9.99999974E-6 : f32
    %323 = vector.broadcast %cst_247 : f32 to vector<32x1xf32>
    %324 = arith.addf %320, %323 : vector<32x1xf32>
    %325 = math.rsqrt %324 : vector<32x1xf32>
    %326 = vector.broadcast %325 : vector<32x1xf32> to vector<32x32xf32>
    %327 = arith.mulf %322, %326 : vector<32x32xf32>
    %328 = vector.broadcast %308 : vector<1x32xf32> to vector<32x32xf32>
    %329 = arith.mulf %327, %328 : vector<32x32xf32>
    %330 = vector.broadcast %309 : vector<1x32xf32> to vector<32x32xf32>
    %331 = arith.addf %329, %330 : vector<32x32xf32>
    %c1_248 = arith.constant 1 : index
    %c0_249 = arith.constant 0 : index
    %c0_250 = arith.constant 0 : index
    %332 = vector.load %arg12[%c1_248, %c0_249, %c0_250] : memref<2x32x128xf32, #tpu.memory_space<vmem>>, vector<1x32x128xf32>
    %333 = vector.shape_cast %332 : vector<1x32x128xf32> to vector<32x128xf32>
    %cst_251 = arith.constant dense<0.000000e+00> : vector<32x128xf32>
    %334 = tpu.matmul %331, %333, %cst_251 {dimension_numbers = #tpu.dot_dimension_numbers<[1], [0], [0], [1], [0, 0, 1, 1], [], []>} : vector<32x32xf32>, vector<32x128xf32>, vector<32x128xf32> -> vector<32x128xf32>
    %c1_252 = arith.constant 1 : index
    %c0_253 = arith.constant 0 : index
    %335 = vector.load %arg13[%c1_252, %c0_253] : memref<2x128xf32, #tpu.memory_space<vmem>>, vector<1x128xf32>
    %336 = vector.broadcast %335 : vector<1x128xf32> to vector<32x128xf32>
    %337 = arith.addf %334, %336 : vector<32x128xf32>
    %cst_254 = arith.constant 5.000000e-01 : f32
    %338 = vector.broadcast %cst_254 : f32 to vector<32x128xf32>
    %339 = arith.mulf %338, %337 : vector<32x128xf32>
    %cst_255 = arith.constant 4.471500e-02 : f32
    %340 = vector.broadcast %cst_255 : f32 to vector<32x128xf32>
    %341 = arith.mulf %340, %337 : vector<32x128xf32>
    %342 = arith.mulf %341, %337 : vector<32x128xf32>
    %343 = arith.mulf %342, %337 : vector<32x128xf32>
    %344 = arith.addf %337, %343 : vector<32x128xf32>
    %cst_256 = arith.constant 0.797884583 : f32
    %345 = vector.broadcast %cst_256 : f32 to vector<32x128xf32>
    %346 = arith.mulf %345, %344 : vector<32x128xf32>
    %347 = math.tanh %346 : vector<32x128xf32>
    %cst_257 = arith.constant 1.000000e+00 : f32
    %348 = vector.broadcast %cst_257 : f32 to vector<32x128xf32>
    %349 = arith.addf %348, %347 : vector<32x128xf32>
    %350 = arith.mulf %339, %349 : vector<32x128xf32>
    %c1_258 = arith.constant 1 : index
    %c0_259 = arith.constant 0 : index
    %c0_260 = arith.constant 0 : index
    %351 = vector.load %arg14[%c1_258, %c0_259, %c0_260] : memref<2x128x32xf32, #tpu.memory_space<vmem>>, vector<1x128x32xf32>
    %352 = vector.shape_cast %351 : vector<1x128x32xf32> to vector<128x32xf32>
    %cst_261 = arith.constant dense<0.000000e+00> : vector<32x32xf32>
    %353 = tpu.matmul %350, %352, %cst_261 {dimension_numbers = #tpu.dot_dimension_numbers<[1], [0], [0], [1], [0, 0, 1, 1], [], []>} : vector<32x128xf32>, vector<128x32xf32>, vector<32x32xf32> -> vector<32x32xf32>
    %c1_262 = arith.constant 1 : index
    %c0_263 = arith.constant 0 : index
    %354 = vector.load %arg15[%c1_262, %c0_263] : memref<2x32xf32, #tpu.memory_space<vmem>>, vector<1x32xf32>
    %355 = vector.broadcast %354 : vector<1x32xf32> to vector<32x32xf32>
    %356 = arith.addf %353, %355 : vector<32x32xf32>
    %357 = arith.addf %307, %356 : vector<32x32xf32>
    %358 = vector.extract_strided_slice %357 {offsets = [0, 0], sizes = [16, 32], strides = [1, 1]} : vector<32x32xf32> to vector<16x32xf32>
    %359 = vector.extract_strided_slice %357 {offsets = [0, 0], sizes = [8, 32], strides = [1, 1]} : vector<32x32xf32> to vector<8x32xf32>
    %c0_264 = arith.constant 0 : index
    %c0_265 = arith.constant 0 : index
    %c0_266 = arith.constant 0 : index
    %360 = vector.load %arg16[%c0_264, %c0_265, %c0_266] : memref<2x32x32xf32, #tpu.memory_space<vmem>>, vector<1x32x32xf32>
    %361 = vector.shape_cast %360 : vector<1x32x32xf32> to vector<32x32xf32>
    %cst_267 = arith.constant dense<0.000000e+00> : vector<16x32xf32>
    %362 = tpu.matmul %358, %361, %cst_267 {dimension_numbers = #tpu.dot_dimension_numbers<[1], [0], [0], [1], [0, 0, 1, 1], [], []>} : vector<16x32xf32>, vector<32x32xf32>, vector<16x32xf32> -> vector<16x32xf32>
    %c0_268 = arith.constant 0 : index
    %c0_269 = arith.constant 0 : index
    %363 = vector.load %arg17[%c0_268, %c0_269] : memref<2x32xf32, #tpu.memory_space<vmem>>, vector<1x32xf32>
    %364 = vector.broadcast %363 : vector<1x32xf32> to vector<16x32xf32>
    %365 = arith.addf %362, %364 : vector<16x32xf32>
    %cst_270 = arith.constant 5.000000e-01 : f32
    %366 = vector.broadcast %cst_270 : f32 to vector<16x32xf32>
    %367 = arith.mulf %366, %365 : vector<16x32xf32>
    %cst_271 = arith.constant 4.471500e-02 : f32
    %368 = vector.broadcast %cst_271 : f32 to vector<16x32xf32>
    %369 = arith.mulf %368, %365 : vector<16x32xf32>
    %370 = arith.mulf %369, %365 : vector<16x32xf32>
    %371 = arith.mulf %370, %365 : vector<16x32xf32>
    %372 = arith.addf %365, %371 : vector<16x32xf32>
    %cst_272 = arith.constant 0.797884583 : f32
    %373 = vector.broadcast %cst_272 : f32 to vector<16x32xf32>
    %374 = arith.mulf %373, %372 : vector<16x32xf32>
    %375 = math.tanh %374 : vector<16x32xf32>
    %cst_273 = arith.constant 1.000000e+00 : f32
    %376 = vector.broadcast %cst_273 : f32 to vector<16x32xf32>
    %377 = arith.addf %376, %375 : vector<16x32xf32>
    %378 = arith.mulf %367, %377 : vector<16x32xf32>
    %c0_274 = arith.constant 0 : index
    %c0_275 = arith.constant 0 : index
    %c0_276 = arith.constant 0 : index
    %379 = vector.load %arg18[%c0_274, %c0_275, %c0_276] : memref<2x32x32xf32, #tpu.memory_space<vmem>>, vector<1x32x32xf32>
    %380 = vector.shape_cast %379 : vector<1x32x32xf32> to vector<32x32xf32>
    %cst_277 = arith.constant dense<0.000000e+00> : vector<16x32xf32>
    %381 = tpu.matmul %378, %380, %cst_277 {dimension_numbers = #tpu.dot_dimension_numbers<[1], [0], [0], [1], [0, 0, 1, 1], [], []>} : vector<16x32xf32>, vector<32x32xf32>, vector<16x32xf32> -> vector<16x32xf32>
    %c0_278 = arith.constant 0 : index
    %c0_279 = arith.constant 0 : index
    %382 = vector.load %arg19[%c0_278, %c0_279] : memref<2x32xf32, #tpu.memory_space<vmem>>, vector<1x32xf32>
    %383 = vector.broadcast %382 : vector<1x32xf32> to vector<16x32xf32>
    %384 = arith.addf %381, %383 : vector<16x32xf32>
    %c1_280 = arith.constant 1 : index
    %c0_281 = arith.constant 0 : index
    %c0_282 = arith.constant 0 : index
    %385 = vector.load %arg16[%c1_280, %c0_281, %c0_282] : memref<2x32x32xf32, #tpu.memory_space<vmem>>, vector<1x32x32xf32>
    %386 = vector.shape_cast %385 : vector<1x32x32xf32> to vector<32x32xf32>
    %cst_283 = arith.constant dense<0.000000e+00> : vector<16x32xf32>
    %387 = tpu.matmul %384, %386, %cst_283 {dimension_numbers = #tpu.dot_dimension_numbers<[1], [0], [0], [1], [0, 0, 1, 1], [], []>} : vector<16x32xf32>, vector<32x32xf32>, vector<16x32xf32> -> vector<16x32xf32>
    %c1_284 = arith.constant 1 : index
    %c0_285 = arith.constant 0 : index
    %388 = vector.load %arg17[%c1_284, %c0_285] : memref<2x32xf32, #tpu.memory_space<vmem>>, vector<1x32xf32>
    %389 = vector.broadcast %388 : vector<1x32xf32> to vector<16x32xf32>
    %390 = arith.addf %387, %389 : vector<16x32xf32>
    %cst_286 = arith.constant 5.000000e-01 : f32
    %391 = vector.broadcast %cst_286 : f32 to vector<16x32xf32>
    %392 = arith.mulf %391, %390 : vector<16x32xf32>
    %cst_287 = arith.constant 4.471500e-02 : f32
    %393 = vector.broadcast %cst_287 : f32 to vector<16x32xf32>
    %394 = arith.mulf %393, %390 : vector<16x32xf32>
    %395 = arith.mulf %394, %390 : vector<16x32xf32>
    %396 = arith.mulf %395, %390 : vector<16x32xf32>
    %397 = arith.addf %390, %396 : vector<16x32xf32>
    %cst_288 = arith.constant 0.797884583 : f32
    %398 = vector.broadcast %cst_288 : f32 to vector<16x32xf32>
    %399 = arith.mulf %398, %397 : vector<16x32xf32>
    %400 = math.tanh %399 : vector<16x32xf32>
    %cst_289 = arith.constant 1.000000e+00 : f32
    %401 = vector.broadcast %cst_289 : f32 to vector<16x32xf32>
    %402 = arith.addf %401, %400 : vector<16x32xf32>
    %403 = arith.mulf %392, %402 : vector<16x32xf32>
    %c1_290 = arith.constant 1 : index
    %c0_291 = arith.constant 0 : index
    %c0_292 = arith.constant 0 : index
    %404 = vector.load %arg18[%c1_290, %c0_291, %c0_292] : memref<2x32x32xf32, #tpu.memory_space<vmem>>, vector<1x32x32xf32>
    %405 = vector.shape_cast %404 : vector<1x32x32xf32> to vector<32x32xf32>
    %cst_293 = arith.constant dense<0.000000e+00> : vector<16x32xf32>
    %406 = tpu.matmul %403, %405, %cst_293 {dimension_numbers = #tpu.dot_dimension_numbers<[1], [0], [0], [1], [0, 0, 1, 1], [], []>} : vector<16x32xf32>, vector<32x32xf32>, vector<16x32xf32> -> vector<16x32xf32>
    %c1_294 = arith.constant 1 : index
    %c0_295 = arith.constant 0 : index
    %407 = vector.load %arg19[%c1_294, %c0_295] : memref<2x32xf32, #tpu.memory_space<vmem>>, vector<1x32xf32>
    %408 = vector.broadcast %407 : vector<1x32xf32> to vector<16x32xf32>
    %409 = arith.addf %406, %408 : vector<16x32xf32>
    %c0_296 = arith.constant 0 : index
    %c0_297 = arith.constant 0 : index
    %410 = vector.load %arg20[%c0_296, %c0_297] : memref<1x32xf32, #tpu.memory_space<vmem>>, vector<1x32xf32>
    %c0_298 = arith.constant 0 : index
    %c0_299 = arith.constant 0 : index
    %411 = vector.load %arg21[%c0_298, %c0_299] : memref<1x32xf32, #tpu.memory_space<vmem>>, vector<1x32xf32>
    %cst_300 = arith.constant dense<0.000000e+00> : vector<16xf32>
    %412 = vector.multi_reduction <add>, %409, %cst_300 [1] : vector<16x32xf32> to vector<16xf32>
    %413 = vector.shape_cast %412 : vector<16xf32> to vector<16x1xf32>
    %cst_301 = arith.constant 3.200000e+01 : f32
    %414 = vector.broadcast %cst_301 : f32 to vector<16x1xf32>
    %415 = arith.divf %413, %414 : vector<16x1xf32>
    %416 = vector.broadcast %415 : vector<16x1xf32> to vector<16x32xf32>
    %417 = arith.subf %409, %416 : vector<16x32xf32>
    %418 = arith.mulf %417, %417 : vector<16x32xf32>
    %cst_302 = arith.constant dense<0.000000e+00> : vector<16xf32>
    %419 = vector.multi_reduction <add>, %418, %cst_302 [1] : vector<16x32xf32> to vector<16xf32>
    %420 = vector.shape_cast %419 : vector<16xf32> to vector<16x1xf32>
    %cst_303 = arith.constant 3.200000e+01 : f32
    %421 = vector.broadcast %cst_303 : f32 to vector<16x1xf32>
    %422 = arith.divf %420, %421 : vector<16x1xf32>
    %423 = vector.broadcast %415 : vector<16x1xf32> to vector<16x32xf32>
    %424 = arith.subf %409, %423 : vector<16x32xf32>
    %cst_304 = arith.constant 9.99999974E-6 : f32
    %425 = vector.broadcast %cst_304 : f32 to vector<16x1xf32>
    %426 = arith.addf %422, %425 : vector<16x1xf32>
    %427 = math.rsqrt %426 : vector<16x1xf32>
    %428 = vector.broadcast %427 : vector<16x1xf32> to vector<16x32xf32>
    %429 = arith.mulf %424, %428 : vector<16x32xf32>
    %430 = vector.broadcast %410 : vector<1x32xf32> to vector<16x32xf32>
    %431 = arith.mulf %429, %430 : vector<16x32xf32>
    %432 = vector.broadcast %411 : vector<1x32xf32> to vector<16x32xf32>
    %433 = arith.addf %431, %432 : vector<16x32xf32>
    %c0_305 = arith.constant 0 : index
    %c0_306 = arith.constant 0 : index
    %434 = vector.load %arg24[%c0_305, %c0_306] : memref<16x32xf32, #tpu.memory_space<vmem>>, vector<16x32xf32>
    %c0_307 = arith.constant 0 : index
    %c0_308 = arith.constant 0 : index
    %c0_309 = arith.constant 0 : index
    %435 = vector.load %arg22[%c0_307, %c0_308, %c0_309] : memref<9x16x16xf32, #tpu.memory_space<vmem>>, vector<1x16x16xf32>
    %436 = vector.shape_cast %435 : vector<1x16x16xf32> to vector<16x16xf32>
    %cst_310 = arith.constant dense<0.000000e+00> : vector<16x32xf32>
    %437 = tpu.matmul %436, %433, %cst_310 {dimension_numbers = #tpu.dot_dimension_numbers<[1], [0], [0], [1], [0, 0, 1, 1], [], []>} : vector<16x16xf32>, vector<16x32xf32>, vector<16x32xf32> -> vector<16x32xf32>
    %c0_311 = arith.constant 0 : index
    %c0_312 = arith.constant 0 : index
    %c0_313 = arith.constant 0 : index
    %438 = vector.load %arg23[%c0_311, %c0_312, %c0_313] : memref<9x32x32xf32, #tpu.memory_space<vmem>>, vector<1x32x32xf32>
    %439 = vector.shape_cast %438 : vector<1x32x32xf32> to vector<32x32xf32>
    %cst_314 = arith.constant dense<0.000000e+00> : vector<16x32xf32>
    %440 = tpu.matmul %437, %439, %cst_314 {dimension_numbers = #tpu.dot_dimension_numbers<[1], [0], [0], [1], [0, 0, 1, 1], [], []>} : vector<16x32xf32>, vector<32x32xf32>, vector<16x32xf32> -> vector<16x32xf32>
    %441 = arith.addf %434, %440 : vector<16x32xf32>
    %c1_315 = arith.constant 1 : index
    %c0_316 = arith.constant 0 : index
    %c0_317 = arith.constant 0 : index
    %442 = vector.load %arg22[%c1_315, %c0_316, %c0_317] : memref<9x16x16xf32, #tpu.memory_space<vmem>>, vector<1x16x16xf32>
    %443 = vector.shape_cast %442 : vector<1x16x16xf32> to vector<16x16xf32>
    %cst_318 = arith.constant dense<0.000000e+00> : vector<16x32xf32>
    %444 = tpu.matmul %443, %433, %cst_318 {dimension_numbers = #tpu.dot_dimension_numbers<[1], [0], [0], [1], [0, 0, 1, 1], [], []>} : vector<16x16xf32>, vector<16x32xf32>, vector<16x32xf32> -> vector<16x32xf32>
    %c1_319 = arith.constant 1 : index
    %c0_320 = arith.constant 0 : index
    %c0_321 = arith.constant 0 : index
    %445 = vector.load %arg23[%c1_319, %c0_320, %c0_321] : memref<9x32x32xf32, #tpu.memory_space<vmem>>, vector<1x32x32xf32>
    %446 = vector.shape_cast %445 : vector<1x32x32xf32> to vector<32x32xf32>
    %cst_322 = arith.constant dense<0.000000e+00> : vector<16x32xf32>
    %447 = tpu.matmul %444, %446, %cst_322 {dimension_numbers = #tpu.dot_dimension_numbers<[1], [0], [0], [1], [0, 0, 1, 1], [], []>} : vector<16x32xf32>, vector<32x32xf32>, vector<16x32xf32> -> vector<16x32xf32>
    %448 = arith.addf %441, %447 : vector<16x32xf32>
    %c2_323 = arith.constant 2 : index
    %c0_324 = arith.constant 0 : index
    %c0_325 = arith.constant 0 : index
    %449 = vector.load %arg22[%c2_323, %c0_324, %c0_325] : memref<9x16x16xf32, #tpu.memory_space<vmem>>, vector<1x16x16xf32>
    %450 = vector.shape_cast %449 : vector<1x16x16xf32> to vector<16x16xf32>
    %cst_326 = arith.constant dense<0.000000e+00> : vector<16x32xf32>
    %451 = tpu.matmul %450, %433, %cst_326 {dimension_numbers = #tpu.dot_dimension_numbers<[1], [0], [0], [1], [0, 0, 1, 1], [], []>} : vector<16x16xf32>, vector<16x32xf32>, vector<16x32xf32> -> vector<16x32xf32>
    %c2_327 = arith.constant 2 : index
    %c0_328 = arith.constant 0 : index
    %c0_329 = arith.constant 0 : index
    %452 = vector.load %arg23[%c2_327, %c0_328, %c0_329] : memref<9x32x32xf32, #tpu.memory_space<vmem>>, vector<1x32x32xf32>
    %453 = vector.shape_cast %452 : vector<1x32x32xf32> to vector<32x32xf32>
    %cst_330 = arith.constant dense<0.000000e+00> : vector<16x32xf32>
    %454 = tpu.matmul %451, %453, %cst_330 {dimension_numbers = #tpu.dot_dimension_numbers<[1], [0], [0], [1], [0, 0, 1, 1], [], []>} : vector<16x32xf32>, vector<32x32xf32>, vector<16x32xf32> -> vector<16x32xf32>
    %455 = arith.addf %448, %454 : vector<16x32xf32>
    %c3_331 = arith.constant 3 : index
    %c0_332 = arith.constant 0 : index
    %c0_333 = arith.constant 0 : index
    %456 = vector.load %arg22[%c3_331, %c0_332, %c0_333] : memref<9x16x16xf32, #tpu.memory_space<vmem>>, vector<1x16x16xf32>
    %457 = vector.shape_cast %456 : vector<1x16x16xf32> to vector<16x16xf32>
    %cst_334 = arith.constant dense<0.000000e+00> : vector<16x32xf32>
    %458 = tpu.matmul %457, %433, %cst_334 {dimension_numbers = #tpu.dot_dimension_numbers<[1], [0], [0], [1], [0, 0, 1, 1], [], []>} : vector<16x16xf32>, vector<16x32xf32>, vector<16x32xf32> -> vector<16x32xf32>
    %c3_335 = arith.constant 3 : index
    %c0_336 = arith.constant 0 : index
    %c0_337 = arith.constant 0 : index
    %459 = vector.load %arg23[%c3_335, %c0_336, %c0_337] : memref<9x32x32xf32, #tpu.memory_space<vmem>>, vector<1x32x32xf32>
    %460 = vector.shape_cast %459 : vector<1x32x32xf32> to vector<32x32xf32>
    %cst_338 = arith.constant dense<0.000000e+00> : vector<16x32xf32>
    %461 = tpu.matmul %458, %460, %cst_338 {dimension_numbers = #tpu.dot_dimension_numbers<[1], [0], [0], [1], [0, 0, 1, 1], [], []>} : vector<16x32xf32>, vector<32x32xf32>, vector<16x32xf32> -> vector<16x32xf32>
    %462 = arith.addf %455, %461 : vector<16x32xf32>
    %c4 = arith.constant 4 : index
    %c0_339 = arith.constant 0 : index
    %c0_340 = arith.constant 0 : index
    %463 = vector.load %arg23[%c4, %c0_339, %c0_340] : memref<9x32x32xf32, #tpu.memory_space<vmem>>, vector<1x32x32xf32>
    %464 = vector.shape_cast %463 : vector<1x32x32xf32> to vector<32x32xf32>
    %cst_341 = arith.constant dense<0.000000e+00> : vector<16x32xf32>
    %465 = tpu.matmul %433, %464, %cst_341 {dimension_numbers = #tpu.dot_dimension_numbers<[1], [0], [0], [1], [0, 0, 1, 1], [], []>} : vector<16x32xf32>, vector<32x32xf32>, vector<16x32xf32> -> vector<16x32xf32>
    %466 = arith.addf %462, %465 : vector<16x32xf32>
    %c5 = arith.constant 5 : index
    %c0_342 = arith.constant 0 : index
    %c0_343 = arith.constant 0 : index
    %467 = vector.load %arg22[%c5, %c0_342, %c0_343] : memref<9x16x16xf32, #tpu.memory_space<vmem>>, vector<1x16x16xf32>
    %468 = vector.shape_cast %467 : vector<1x16x16xf32> to vector<16x16xf32>
    %cst_344 = arith.constant dense<0.000000e+00> : vector<16x32xf32>
    %469 = tpu.matmul %468, %433, %cst_344 {dimension_numbers = #tpu.dot_dimension_numbers<[1], [0], [0], [1], [0, 0, 1, 1], [], []>} : vector<16x16xf32>, vector<16x32xf32>, vector<16x32xf32> -> vector<16x32xf32>
    %c5_345 = arith.constant 5 : index
    %c0_346 = arith.constant 0 : index
    %c0_347 = arith.constant 0 : index
    %470 = vector.load %arg23[%c5_345, %c0_346, %c0_347] : memref<9x32x32xf32, #tpu.memory_space<vmem>>, vector<1x32x32xf32>
    %471 = vector.shape_cast %470 : vector<1x32x32xf32> to vector<32x32xf32>
    %cst_348 = arith.constant dense<0.000000e+00> : vector<16x32xf32>
    %472 = tpu.matmul %469, %471, %cst_348 {dimension_numbers = #tpu.dot_dimension_numbers<[1], [0], [0], [1], [0, 0, 1, 1], [], []>} : vector<16x32xf32>, vector<32x32xf32>, vector<16x32xf32> -> vector<16x32xf32>
    %473 = arith.addf %466, %472 : vector<16x32xf32>
    %c6 = arith.constant 6 : index
    %c0_349 = arith.constant 0 : index
    %c0_350 = arith.constant 0 : index
    %474 = vector.load %arg22[%c6, %c0_349, %c0_350] : memref<9x16x16xf32, #tpu.memory_space<vmem>>, vector<1x16x16xf32>
    %475 = vector.shape_cast %474 : vector<1x16x16xf32> to vector<16x16xf32>
    %cst_351 = arith.constant dense<0.000000e+00> : vector<16x32xf32>
    %476 = tpu.matmul %475, %433, %cst_351 {dimension_numbers = #tpu.dot_dimension_numbers<[1], [0], [0], [1], [0, 0, 1, 1], [], []>} : vector<16x16xf32>, vector<16x32xf32>, vector<16x32xf32> -> vector<16x32xf32>
    %c6_352 = arith.constant 6 : index
    %c0_353 = arith.constant 0 : index
    %c0_354 = arith.constant 0 : index
    %477 = vector.load %arg23[%c6_352, %c0_353, %c0_354] : memref<9x32x32xf32, #tpu.memory_space<vmem>>, vector<1x32x32xf32>
    %478 = vector.shape_cast %477 : vector<1x32x32xf32> to vector<32x32xf32>
    %cst_355 = arith.constant dense<0.000000e+00> : vector<16x32xf32>
    %479 = tpu.matmul %476, %478, %cst_355 {dimension_numbers = #tpu.dot_dimension_numbers<[1], [0], [0], [1], [0, 0, 1, 1], [], []>} : vector<16x32xf32>, vector<32x32xf32>, vector<16x32xf32> -> vector<16x32xf32>
    %480 = arith.addf %473, %479 : vector<16x32xf32>
    %c7 = arith.constant 7 : index
    %c0_356 = arith.constant 0 : index
    %c0_357 = arith.constant 0 : index
    %481 = vector.load %arg22[%c7, %c0_356, %c0_357] : memref<9x16x16xf32, #tpu.memory_space<vmem>>, vector<1x16x16xf32>
    %482 = vector.shape_cast %481 : vector<1x16x16xf32> to vector<16x16xf32>
    %cst_358 = arith.constant dense<0.000000e+00> : vector<16x32xf32>
    %483 = tpu.matmul %482, %433, %cst_358 {dimension_numbers = #tpu.dot_dimension_numbers<[1], [0], [0], [1], [0, 0, 1, 1], [], []>} : vector<16x16xf32>, vector<16x32xf32>, vector<16x32xf32> -> vector<16x32xf32>
    %c7_359 = arith.constant 7 : index
    %c0_360 = arith.constant 0 : index
    %c0_361 = arith.constant 0 : index
    %484 = vector.load %arg23[%c7_359, %c0_360, %c0_361] : memref<9x32x32xf32, #tpu.memory_space<vmem>>, vector<1x32x32xf32>
    %485 = vector.shape_cast %484 : vector<1x32x32xf32> to vector<32x32xf32>
    %cst_362 = arith.constant dense<0.000000e+00> : vector<16x32xf32>
    %486 = tpu.matmul %483, %485, %cst_362 {dimension_numbers = #tpu.dot_dimension_numbers<[1], [0], [0], [1], [0, 0, 1, 1], [], []>} : vector<16x32xf32>, vector<32x32xf32>, vector<16x32xf32> -> vector<16x32xf32>
    %487 = arith.addf %480, %486 : vector<16x32xf32>
    %c8 = arith.constant 8 : index
    %c0_363 = arith.constant 0 : index
    %c0_364 = arith.constant 0 : index
    %488 = vector.load %arg22[%c8, %c0_363, %c0_364] : memref<9x16x16xf32, #tpu.memory_space<vmem>>, vector<1x16x16xf32>
    %489 = vector.shape_cast %488 : vector<1x16x16xf32> to vector<16x16xf32>
    %cst_365 = arith.constant dense<0.000000e+00> : vector<16x32xf32>
    %490 = tpu.matmul %489, %433, %cst_365 {dimension_numbers = #tpu.dot_dimension_numbers<[1], [0], [0], [1], [0, 0, 1, 1], [], []>} : vector<16x16xf32>, vector<16x32xf32>, vector<16x32xf32> -> vector<16x32xf32>
    %c8_366 = arith.constant 8 : index
    %c0_367 = arith.constant 0 : index
    %c0_368 = arith.constant 0 : index
    %491 = vector.load %arg23[%c8_366, %c0_367, %c0_368] : memref<9x32x32xf32, #tpu.memory_space<vmem>>, vector<1x32x32xf32>
    %492 = vector.shape_cast %491 : vector<1x32x32xf32> to vector<32x32xf32>
    %cst_369 = arith.constant dense<0.000000e+00> : vector<16x32xf32>
    %493 = tpu.matmul %490, %492, %cst_369 {dimension_numbers = #tpu.dot_dimension_numbers<[1], [0], [0], [1], [0, 0, 1, 1], [], []>} : vector<16x32xf32>, vector<32x32xf32>, vector<16x32xf32> -> vector<16x32xf32>
    %494 = arith.addf %487, %493 : vector<16x32xf32>
    %c0_370 = arith.constant 0 : index
    %c0_371 = arith.constant 0 : index
    %c0_372 = arith.constant 0 : index
    %495 = vector.load %arg27[%c0_370, %c0_371, %c0_372] : memref<1x16x32xf32, #tpu.memory_space<vmem>>, vector<1x16x32xf32>
    %496 = vector.shape_cast %495 : vector<1x16x32xf32> to vector<16x32xf32>
    %497 = vector.shape_cast %494 : vector<16x32xf32> to vector<1x16x32xf32>
    tpu.vector_store %arg27[%c0_370, %c0_371, %c0_372], %497 {strides = array<i32>} : memref<1x16x32xf32, #tpu.memory_space<vmem>>, vector<1x16x32xf32>,
    %c0_373 = arith.constant 0 : index
    %c0_374 = arith.constant 0 : index
    %498 = vector.load %arg25[%c0_373, %c0_374] : memref<32x32xf32, #tpu.memory_space<vmem>>, vector<32x32xf32>
    %cst_375 = arith.constant dense<0.000000e+00> : vector<8x32xf32>
    %499 = tpu.matmul %359, %498, %cst_375 {dimension_numbers = #tpu.dot_dimension_numbers<[1], [0], [0], [1], [0, 0, 1, 1], [], []>} : vector<8x32xf32>, vector<32x32xf32>, vector<8x32xf32> -> vector<8x32xf32>
    %c0_376 = arith.constant 0 : index
    %c0_377 = arith.constant 0 : index
    %500 = vector.load %arg26[%c0_376, %c0_377] : memref<1x32xf32, #tpu.memory_space<vmem>>, vector<1x32xf32>
    %501 = vector.broadcast %500 : vector<1x32xf32> to vector<8x32xf32>
    %502 = arith.addf %499, %501 : vector<8x32xf32>
    %cst_378 = arith.constant dense<0.000000e+00> : vector<8x8xf32>
    %503 = tpu.matmul %359, %502, %cst_378 {dimension_numbers = #tpu.dot_dimension_numbers<[1], [1], [0], [0], [0, 0, 1, 0], [], []>} : vector<8x32xf32>, vector<8x32xf32>, vector<8x8xf32> -> vector<8x8xf32>
    %c0_379 = arith.constant 0 : index
    %c0_380 = arith.constant 0 : index
    %c0_381 = arith.constant 0 : index
    %504 = vector.load %arg28[%c0_379, %c0_380, %c0_381] : memref<1x8x8xf32, #tpu.memory_space<vmem>>, vector<1x8x8xf32>
    %505 = vector.shape_cast %504 : vector<1x8x8xf32> to vector<8x8xf32>
    %506 = vector.shape_cast %503 : vector<8x8xf32> to vector<1x8x8xf32>
    tpu.vector_store %arg28[%c0_379, %c0_380, %c0_381], %506 {strides = array<i32>} : memref<1x8x8xf32, #tpu.memory_space<vmem>>, vector<1x8x8xf32>,
    return
  }
  func.func @transform_0(%arg0: i32) -> (i32, i32, i32) {
    %c0_i32 = arith.constant 0 : i32
    %c0_i32_0 = arith.constant 0 : i32
    %c0_i32_1 = arith.constant 0 : i32
    return %arg0, %c0_i32, %c0_i32_0 : i32, i32, i32
  }
  func.func @transform_1(%arg0: i32) -> (i32, i32) {
    %c0_i32 = arith.constant 0 : i32
    %c0_i32_0 = arith.constant 0 : i32
    %c0_i32_1 = arith.constant 0 : i32
    return %c0_i32, %c0_i32_0 : i32, i32
  }
  func.func @transform_2(%arg0: i32) -> (i32, i32) {
    %c0_i32 = arith.constant 0 : i32
    %c0_i32_0 = arith.constant 0 : i32
    %c0_i32_1 = arith.constant 0 : i32
    return %c0_i32, %c0_i32_0 : i32, i32
  }
  func.func @transform_3(%arg0: i32) -> (i32, i32) {
    %c0_i32 = arith.constant 0 : i32
    %c0_i32_0 = arith.constant 0 : i32
    %c0_i32_1 = arith.constant 0 : i32
    return %c0_i32, %c0_i32_0 : i32, i32
  }
  func.func @transform_4(%arg0: i32) -> (i32, i32, i32, i32) {
    %c0_i32 = arith.constant 0 : i32
    %c0_i32_0 = arith.constant 0 : i32
    %c0_i32_1 = arith.constant 0 : i32
    %c0_i32_2 = arith.constant 0 : i32
    %c0_i32_3 = arith.constant 0 : i32
    return %c0_i32, %c0_i32_0, %c0_i32_1, %c0_i32_2 : i32, i32, i32, i32
  }
  func.func @transform_5(%arg0: i32) -> (i32, i32, i32, i32) {
    %c0_i32 = arith.constant 0 : i32
    %c0_i32_0 = arith.constant 0 : i32
    %c0_i32_1 = arith.constant 0 : i32
    %c0_i32_2 = arith.constant 0 : i32
    %c0_i32_3 = arith.constant 0 : i32
    return %c0_i32, %c0_i32_0, %c0_i32_1, %c0_i32_2 : i32, i32, i32, i32
  }
  func.func @transform_6(%arg0: i32) -> (i32, i32, i32, i32) {
    %c0_i32 = arith.constant 0 : i32
    %c0_i32_0 = arith.constant 0 : i32
    %c0_i32_1 = arith.constant 0 : i32
    %c0_i32_2 = arith.constant 0 : i32
    %c0_i32_3 = arith.constant 0 : i32
    return %c0_i32, %c0_i32_0, %c0_i32_1, %c0_i32_2 : i32, i32, i32, i32
  }
  func.func @transform_7(%arg0: i32) -> (i32, i32, i32, i32) {
    %c0_i32 = arith.constant 0 : i32
    %c0_i32_0 = arith.constant 0 : i32
    %c0_i32_1 = arith.constant 0 : i32
    %c0_i32_2 = arith.constant 0 : i32
    %c0_i32_3 = arith.constant 0 : i32
    return %c0_i32, %c0_i32_0, %c0_i32_1, %c0_i32_2 : i32, i32, i32, i32
  }
  func.func @transform_8(%arg0: i32) -> (i32, i32) {
    %c0_i32 = arith.constant 0 : i32
    %c0_i32_0 = arith.constant 0 : i32
    %c0_i32_1 = arith.constant 0 : i32
    return %c0_i32, %c0_i32_0 : i32, i32
  }
  func.func @transform_9(%arg0: i32) -> (i32, i32) {
    %c0_i32 = arith.constant 0 : i32
    %c0_i32_0 = arith.constant 0 : i32
    %c0_i32_1 = arith.constant 0 : i32
    return %c0_i32, %c0_i32_0 : i32, i32
  }
  func.func @transform_10(%arg0: i32) -> (i32, i32) {
    %c0_i32 = arith.constant 0 : i32
    %c0_i32_0 = arith.constant 0 : i32
    %c0_i32_1 = arith.constant 0 : i32
    return %c0_i32, %c0_i32_0 : i32, i32
  }
  func.func @transform_11(%arg0: i32) -> (i32, i32, i32) {
    %c0_i32 = arith.constant 0 : i32
    %c0_i32_0 = arith.constant 0 : i32
    %c0_i32_1 = arith.constant 0 : i32
    %c0_i32_2 = arith.constant 0 : i32
    return %c0_i32, %c0_i32_0, %c0_i32_1 : i32, i32, i32
  }
  func.func @transform_12(%arg0: i32) -> (i32, i32) {
    %c0_i32 = arith.constant 0 : i32
    %c0_i32_0 = arith.constant 0 : i32
    %c0_i32_1 = arith.constant 0 : i32
    return %c0_i32, %c0_i32_0 : i32, i32
  }
  func.func @transform_13(%arg0: i32) -> (i32, i32, i32) {
    %c0_i32 = arith.constant 0 : i32
    %c0_i32_0 = arith.constant 0 : i32
    %c0_i32_1 = arith.constant 0 : i32
    %c0_i32_2 = arith.constant 0 : i32
    return %c0_i32, %c0_i32_0, %c0_i32_1 : i32, i32, i32
  }
  func.func @transform_14(%arg0: i32) -> (i32, i32) {
    %c0_i32 = arith.constant 0 : i32
    %c0_i32_0 = arith.constant 0 : i32
    %c0_i32_1 = arith.constant 0 : i32
    return %c0_i32, %c0_i32_0 : i32, i32
  }
  func.func @transform_15(%arg0: i32) -> (i32, i32, i32) {
    %c0_i32 = arith.constant 0 : i32
    %c0_i32_0 = arith.constant 0 : i32
    %c0_i32_1 = arith.constant 0 : i32
    %c0_i32_2 = arith.constant 0 : i32
    return %c0_i32, %c0_i32_0, %c0_i32_1 : i32, i32, i32
  }
  func.func @transform_16(%arg0: i32) -> (i32, i32) {
    %c0_i32 = arith.constant 0 : i32
    %c0_i32_0 = arith.constant 0 : i32
    %c0_i32_1 = arith.constant 0 : i32
    return %c0_i32, %c0_i32_0 : i32, i32
  }
  func.func @transform_17(%arg0: i32) -> (i32, i32, i32) {
    %c0_i32 = arith.constant 0 : i32
    %c0_i32_0 = arith.constant 0 : i32
    %c0_i32_1 = arith.constant 0 : i32
    %c0_i32_2 = arith.constant 0 : i32
    return %c0_i32, %c0_i32_0, %c0_i32_1 : i32, i32, i32
  }
  func.func @transform_18(%arg0: i32) -> (i32, i32) {
    %c0_i32 = arith.constant 0 : i32
    %c0_i32_0 = arith.constant 0 : i32
    %c0_i32_1 = arith.constant 0 : i32
    return %c0_i32, %c0_i32_0 : i32, i32
  }
  func.func @transform_19(%arg0: i32) -> (i32, i32) {
    %c0_i32 = arith.constant 0 : i32
    %c0_i32_0 = arith.constant 0 : i32
    %c0_i32_1 = arith.constant 0 : i32
    return %c0_i32, %c0_i32_0 : i32, i32
  }
  func.func @transform_20(%arg0: i32) -> (i32, i32) {
    %c0_i32 = arith.constant 0 : i32
    %c0_i32_0 = arith.constant 0 : i32
    %c0_i32_1 = arith.constant 0 : i32
    return %c0_i32, %c0_i32_0 : i32, i32
  }
  func.func @transform_21(%arg0: i32) -> (i32, i32, i32) {
    %c0_i32 = arith.constant 0 : i32
    %c0_i32_0 = arith.constant 0 : i32
    %c0_i32_1 = arith.constant 0 : i32
    %c0_i32_2 = arith.constant 0 : i32
    return %c0_i32, %c0_i32_0, %c0_i32_1 : i32, i32, i32
  }
  func.func @transform_22(%arg0: i32) -> (i32, i32, i32) {
    %c0_i32 = arith.constant 0 : i32
    %c0_i32_0 = arith.constant 0 : i32
    %c0_i32_1 = arith.constant 0 : i32
    %c0_i32_2 = arith.constant 0 : i32
    return %c0_i32, %c0_i32_0, %c0_i32_1 : i32, i32, i32
  }
  func.func @transform_23(%arg0: i32) -> (i32, i32) {
    %c0_i32 = arith.constant 0 : i32
    %c0_i32_0 = arith.constant 0 : i32
    %c0_i32_1 = arith.constant 0 : i32
    return %c0_i32, %c0_i32_0 : i32, i32
  }
  func.func @transform_24(%arg0: i32) -> (i32, i32) {
    %c0_i32 = arith.constant 0 : i32
    %c0_i32_0 = arith.constant 0 : i32
    %c0_i32_1 = arith.constant 0 : i32
    return %c0_i32, %c0_i32_0 : i32, i32
  }
  func.func @transform_25(%arg0: i32) -> (i32, i32) {
    %c0_i32 = arith.constant 0 : i32
    %c0_i32_0 = arith.constant 0 : i32
    %c0_i32_1 = arith.constant 0 : i32
    return %c0_i32, %c0_i32_0 : i32, i32
  }
  func.func @transform_26(%arg0: i32) -> (i32, i32, i32) {
    %c0_i32 = arith.constant 0 : i32
    %c0_i32_0 = arith.constant 0 : i32
    %c0_i32_1 = arith.constant 0 : i32
    return %arg0, %c0_i32, %c0_i32_0 : i32, i32, i32
  }
  func.func @transform_27(%arg0: i32) -> (i32, i32, i32) {
    %c0_i32 = arith.constant 0 : i32
    %c0_i32_0 = arith.constant 0 : i32
    %c0_i32_1 = arith.constant 0 : i32
    return %arg0, %c0_i32, %c0_i32_0 : i32, i32, i32
  }
}

</mosaic_0001>

<bundles_post_ra>
// kernel: forward.1
= control target key start
LH: loop header
LB: loop body
LE: loop exit
PB: predicated region body
PF: predicated region fallthrough
CT: control target
= control target key end

     0   :  { %s13385_s0 = inlined_call_operand.vmem [shape: f32[2,32,32], index: 0, kind: input, shape index: {}]   ;;  %s13386_s1 = inlined_call_operand.vmem [shape: f32[32,32], index: 1, kind: input, shape index: {}]   ;;  %s13387_s2 = inlined_call_operand.vmem [shape: f32[2,32], index: 2, kind: input, shape index: {}]   ;;  %s13388_s3 = inlined_call_operand.vmem [shape: f32[2,32], index: 3, kind: input, shape index: {}]   ;;  %s13389_s4 = inlined_call_operand.vmem [shape: f32[2,4,32,8], index: 4, kind: input, shape index: {}]   ;;  %s13390_s5 = inlined_call_operand.vmem [shape: f32[2,4,32,8], index: 5, kind: input, shape index: {}]   ;;  %s13391_s6 = inlined_call_operand.vmem [shape: f32[2,4,32,8], index: 6, kind: input, shape index: {}]   ;;  %s13392_s7 = inlined_call_operand.vmem [shape: f32[2,4,8,32], index: 7, kind: input, shape index: {}]   ;;  %s13393_s8 = inlined_call_operand.vmem [shape: f32[2,32], index: 8, kind: input, shape index: {}]   ;;  %s13394_s9 = inlined_call_operand.vmem [shape: f32[2,32], index: 9, kind: input, shape index: {}]   ;;  %s13395_s10 = inlined_call_operand.vmem [shape: f32[2,32], index: 10, kind: input, shape index: {}]   ;;  %s13396_s11 = inlined_call_operand.vmem [shape: f32[2,32,128], index: 11, kind: input, shape index: {}]   ;;  %s13397_s12 = inlined_call_operand.vmem [shape: f32[2,128], index: 12, kind: input, shape index: {}]   ;;  %s13398_s13 = inlined_call_operand.vmem [shape: f32[2,128,32], index: 13, kind: input, shape index: {}]   ;;  %s13399_s14 = inlined_call_operand.vmem [shape: f32[2,32], index: 14, kind: input, shape index: {}]   ;;  %s13400_s15 = inlined_call_operand.vmem [shape: f32[2,32,32], index: 15, kind: input, shape index: {}]   ;;  %s13401_s16 = inlined_call_operand.vmem [shape: f32[2,32], index: 16, kind: input, shape index: {}]   ;;  %s13402_s17 = inlined_call_operand.vmem [shape: f32[2,32,32], index: 17, kind: input, shape index: {}]   ;;  %s13403_s18 = inlined_call_operand.vmem [shape: f32[2,32], index: 18, kind: input, shape index: {}]   ;;  %s13404_s19 = inlined_call_operand.vmem [shape: f32[1,32], index: 19, kind: input, shape index: {}]   ;;  %s13405_s20 = inlined_call_operand.vmem [shape: f32[1,32], index: 20, kind: input, shape index: {}]   ;;  %s13406_s21 = inlined_call_operand.vmem [shape: f32[9,16,16], index: 21, kind: input, shape index: {}]   ;;  %s13407_s22 = inlined_call_operand.vmem [shape: f32[9,32,32], index: 22, kind: input, shape index: {}]   ;;  %s13408_s23 = inlined_call_operand.vmem [shape: f32[16,32], index: 23, kind: input, shape index: {}]   ;;  %s13409_s24 = inlined_call_operand.vmem [shape: f32[32,32], index: 24, kind: input, shape index: {}]   ;;  %s13410_s25 = inlined_call_operand.vmem [shape: f32[1,32], index: 25, kind: input, shape index: {}]   ;;  %s13411_s26 = inlined_call_operand.vmem [shape: f32[2,16,32], index: 26, kind: output, shape index: {0}]   ;;  %s13412_s27 = inlined_call_operand.hbm [shape: f32[2,8,8], index: 27, kind: output, shape index: {1}]  }
   0x1   :  { %13445 = sst [smem:[#allocation15_spill]] %s13385_s0 }
   0x2   :  { %13446 = sst [smem:[#allocation16_spill]] %s13386_s1 }
   0x3   :  { %13447 = sst [smem:[#allocation17_spill]] %s13387_s2 }
   0x4   :  { %13448 = sst [smem:[#allocation18_spill]] %s13388_s3 }
   0x5   :  { %13449 = sst [smem:[#allocation19_spill]] %s13389_s4 }
   0x6   :  { %13450 = sst [smem:[#allocation20_spill]] %s13390_s5 }
   0x7   :  { %13451 = sst [smem:[#allocation21_spill]] %s13391_s6 }
   0x8   :  { %13452 = sst [smem:[#allocation22_spill]] %s13392_s7 }
   0x9   :  { %13453 = sst [smem:[#allocation23_spill]] %s13393_s8 }
   0xa   :  { %13454 = sst [smem:[#allocation24_spill]] %s13394_s9 }
   0xb   :  { %13455 = sst [smem:[#allocation25_spill]] %s13395_s10 }
   0xc   :  { %13456 = sst [smem:[#allocation26_spill]] %s13396_s11 }
   0xd   :  { %13457 = sst [smem:[#allocation27_spill]] %s13397_s12 }
   0xe   :  { %13458 = sst [smem:[#allocation28_spill]] %s13398_s13 }
   0xf   :  { %13459 = sst [smem:[#allocation29_spill]] %s13408_s23 }
  0x10   :  { %13460 = sst [smem:[#allocation30_spill]] %s13409_s24 }
  0x11   :  { %13461 = sst [smem:[#allocation31_spill]] %s13410_s25 }
  0x12   :  { %13462 = sst [smem:[#allocation32_spill]] %s13411_s26 }
  0x13   :  { %13463 = sst [smem:[#allocation33_spill]] %s13412_s27 }
  0x14   :  { %33 = vsyncpa [#allocation3], 0 }
  0x15   :  { %35 = vsyncpa [#allocation3 + $0x1], 0  ;;  %s11819_s7 = smov 0   ;;  %s11821_s4 = smov 0  }
  0x16   :  { %s11823_s8 = smov 0   ;;  %s11825_s30 = smov 0  }
  0x17 LB: > { %13464 = sst [smem:[#allocation5_spill]] %s11661_s7  ;;  %s11840_s9 = sadd.s32 4294967295, %s11673_s30   ;;  %s11673_s30 = sphi %s11825_s30, %s13509_s30   ;;  %s11669_s8 = sphi %s11823_s8, %s13512_s8   ;;  %s11665_s4 = sphi %s11821_s4, %s13511_s4   ;;  %s11661_s7 = sphi %s11819_s7, %s13510_s7  }
  0x18   : > { %13465 = sst [smem:[#allocation6_spill]] %s11665_s4  ;;  %s8811_s5 = sadd.s32 4294967294, %s11673_s30  }
  0x19   : > { %13466 = sst [smem:[#allocation7_spill]] %s11669_s8  ;;  %s11844_s28 = sadd.s32 1, %s11673_s30  }
  0x1a   : > { %13467 = sst [smem:[#allocation8_spill]] %s11673_s30  ;;  %s625_s0 = sadd.s32 1, %s11669_s8 }
  0x1b   : > { %13468 = sst [smem:[#allocation9_spill]] %s11840_s9  ;;  %s622_s10 = ssub.s32 %s11673_s30, %s11844_s28 }
  0x1c   : > { %13469 = sst [smem:[#allocation10_spill]] %s11844_s28  ;;  %p635_p0 = scmp.ne.s32.totalorder %s11669_s8, %s11665_s4 }
  0x1d   : > { %p623_p1 = scmp.eq.s32.totalorder %s622_s10, 0  ;;  %p636_p2 = scmp.eq.s32.totalorder %s11840_s9, 1 }
  0x1e   : > { %p641_p3 = scmp.ne.s32.totalorder %s11665_s4, %s11661_s7  ;;  %p642_p4 = scmp.eq.s32.totalorder %s8811_s5, 1 }
  0x1f   : > { %s11855_s29 = scalar_select %p623_p1, %s11669_s8, %s625_s0  }
  0x20   : > { %p11857_p5 = por %p636_p2, %p635_p0  ;;  %p11861_p6 = por %p642_p4, %p641_p3 }
  0x21   : > { %13470 = sst [smem:[#allocation11_spill]] %s11855_s29  ;;  %p8814_p7 = scmp.ge.s32.totalorder %s11673_s30, 1 }
  0x22   : > { %s13471_s1 = scalar_select %p11857_p5, 1, 0 }
  0x23   : > { %s13473_s6 = scalar_select %p11861_p6, 1, 0 }
  0x24   : > { %13472 = sst [smem:[#allocation12_spill]] %s13471_s1  ;;  %p743_p8 = scmp.lt.s32.totalorder %s11673_s30, 3 }
  0x25   : > { %13474 = sst [smem:[#allocation13_spill]] %s13473_s6 }
  0x26   : > { %p744_p9 = pnand %p8814_p7, %p743_p8 }
  0x28   : > { %747 = sbr.rel (%p744_p9) target bundleno = 10716 (0x29dc), region = 124 }
  0x2f   : > { %p820_p10 = scmp.lt.s32.totalorder %s11840_s9, 1  ;;  %s13476_s0 = sld [smem:[#allocation16_spill]]  ;;  %vm844_vm0 = vcmask 261120   ;;  %vm1193_vm1 = vcmask 64512   ;;  %vm7087_vm3 = vcmask 130048   ;;  %vm11676_vm4 = vmmov 0  }
  0x30   : > { %s13477_s30 = sld [smem:[#allocation15_spill]]  ;;  %s13478_s27 = sld [smem:[#allocation19_spill]]  ;;  %vm11997_vm2 = vmpackc.low %vm1193_vm1, %vm1193_vm1 }
  0x31   : > { %s11869_s11 = scalar_select %p820_p10, %s11840_s9, 1 }
  0x32   : > { %s13479_s29 = sld [smem:[#allocation20_spill]]  ;;  %s13486_s8 = sld [smem:[#allocation22_spill]] }
  0x33   : > { %13475 = sst [smem:[#allocation14_spill]] %s11869_s11  ;;  %s9287_s2 = sshll.u32 %s11869_s11, 5 }
  0x34   : > { %s13488_s3 = sld [smem:[#allocation23_spill]]  ;;  %s13489_s23 = sld [smem:[#allocation26_spill]] }
  0x35   : > { %v834_v0 = vld [vmem:[%s13476_s0] sm:$0xff]  ;;  %v836_v1 = vld [vmem:[%s13476_s0 + $0x10] sm:$0xff]  ;;  %v835_v2 = vld [vmem:[%s13476_s0 + $0x8] sm:$0xff]  ;;  %s13490_s13 = sld [smem:[#allocation28_spill]]  ;;  %s13494_s12 = sld [smem:[#allocation27_spill]] }
  0x36   : > { %s824_s26 = scalar_lea.vmem %s13477_s30, %s9287_s2  ;;  %v837_v3 = vld [vmem:[%s13476_s0 + $0x18] sm:$0xff]  ;;  %v914_v36 = vld [vmem:[%s13478_s27] sm:$0xff]  ;;  %v915_v37 = vld [vmem:[%s13478_s27 + $0x8] sm:$0xff]  ;;  %s13480_s2 = sld [smem:[#allocation21_spill]] }
  0x37   : > { %v830_v4 = vld [vmem:[%s824_s26] sm:$0xff]  ;;  %v832_v5 = vld [vmem:[%s824_s26 + $0x10] sm:$0xff]  ;;  %v831_v6 = vld [vmem:[%s824_s26 + $0x8] sm:$0xff]  ;;  %v10765_v39 = vpack.c.bf16 %v915_v37, %v914_v36  ;;  %s13482_s30 = sld [smem:[#allocation18_spill]]  ;;  %s13493_s0 = sld [smem:[#allocation25_spill]] }
  0x38   : > { %v11887_v7 = vadd.f32 %v834_v0, %v830_v4  ;;  %v11889_v8 = vadd.f32 %v836_v1, %v832_v5  ;;  %v11891_v9 = vadd.f32 %v835_v2, %v831_v6  ;;  %v833_v10 = vld [vmem:[%s824_s26 + $0x18] sm:$0xff]  ;;  %v1015_v38 = vld [vmem:[%s13479_s29] sm:$0xff]  ;;  %v1016_v40 = vld [vmem:[%s13479_s29 + $0x8] sm:$0xff]  ;;  %s13481_s26 = sld [smem:[#allocation17_spill]]  ;;  %s13487_s6 = smov %s13486_s8 }
  0x39   : > { %v11893_v11 = vadd.f32 %v837_v3, %v833_v10  ;;  %v10773_v41 = vpack.c.bf16 %v1016_v40, %v1015_v38  ;;  %10766 = vmatprep.subr.bf16.mxu0 %v10765_v39  ;;  %v916_v42 = vld [vmem:[%s13478_s27 + $0x10] sm:$0xff]  ;;  %v917_v43 = vld [vmem:[%s13478_s27 + $0x18] sm:$0xff]  ;;  %v8855_v36 = vld [vmem:[%s13479_s29 + $0x28] sm:$0xff]  ;;  %s13495_s4 = sld [smem:[#allocation30_spill]]  ;;  %s13499_s1 = sld [smem:[#allocation9_spill]] }
  0x3a   : > { %v845_v12 = vsel %vm844_vm0, %v11887_v7, 0.0  ;;  %v851_v13 = vsel %vm844_vm0, %v11889_v8, 0.0  ;;  %v848_v14 = vsel %vm844_vm0, %v11891_v9, 0.0  ;;  %10768 = vmatpush3.bf16.msra.mxu0 %v10765_v39  ;;  %v1017_v44 = vld [vmem:[%s13479_s29 + $0x10] sm:$0xff]  ;;  %v10769_v45 = vpack.c.bf16 %v917_v43, %v916_v42  ;;  %v1018_v46 = vld [vmem:[%s13479_s29 + $0x18] sm:$0xff]  ;;  %s13501_s10 = sld [smem:[#allocation33_spill]] }
  0x3b   : > { %846 = vadd.xlane.f32.xlu0 %v845_v12  ;;  %852 = vadd.xlane.f32.xlu1 %v851_v13  ;;  %v854_v15 = vsel %vm844_vm0, %v11893_v11, 0.0  ;;  %v10777_v47 = vpack.c.bf16 %v1018_v46, %v1017_v44  ;;  %v8856_v44 = vld [vmem:[%s13479_s29 + $0x30] sm:$0xff] }
  0x3c   : > { %10774 = vmatprep.subr.bf16.mxu1 %v10773_v41  ;;  %10770 = vmatprep.subr.bf16.mxu0 %v10769_v45  ;;  %v1104_v48 = vld [vmem:[%s13480_s2] sm:$0xff]  ;;  %v1105_v49 = vld [vmem:[%s13480_s2 + $0x8] sm:$0xff] }
  0x3d   : > { %10776 = vmatpush3.bf16.msra.mxu1 %v10773_v41  ;;  %v10781_v50 = vpack.c.bf16 %v1105_v49, %v1104_v48  ;;  %s13483_s28 = smov %s13482_s30  ;;  %v8821_v2 = vld [vmem:[%s13482_s30] ss:$0 sm:$0xff] }
  0x3e   : > { %10778 = vmatprep.subr.bf16.mxu1 %v10777_v47  ;;  %10772 = vmatpush3.bf16.msra.mxu0 %v10769_v45  ;;  %v8820_v0 = vld [vmem:[%s13481_s26] ss:$0 sm:$0xff]  ;;  %v8857_v45 = vld [vmem:[%s13479_s29 + $0x38] sm:$0xff] }
  0x3f   : > { %849 = vadd.xlane.f32.xlu0 %v848_v14  ;;  %855 = vadd.xlane.f32.xlu1 %v854_v15  ;;  %v1106_v14 = vld [vmem:[%s13480_s2 + $0x10] sm:$0xff]  ;;  %v1107_v15 = vld [vmem:[%s13480_s2 + $0x18] sm:$0xff]  ;;  %v10821_v46 = vpack.c.bf16 %v8857_v45, %v8856_v44  ;;  %s13496_s24 = smov %s13495_s4  ;;  %s9284_s7 = sshll.u32 %s13499_s1, 7 }
  0x40   : > { %10782 = vmatprep.subr.bf16.mxu0 %v10781_v50  ;;  %s11678_s1 = smov [#allocation2]  }
  0x41   : > { %10780 = vmatpush3.bf16.msra.mxu1 %v10777_v47 }
  0xc8   : > { %v847_v16 = vpop.xlane.xlu0 %846  ;;  %v853_v17 = vpop.xlane.xlu1 %852 }
  0xc9   : > { %v858_v18 = vmul.f32 0.03125, %v847_v16  ;;  %v860_v19 = vmul.f32 0.03125, %v853_v17 }
  0xcb   : > { %v862_v20 = vsub.f32 %v11887_v7, %v858_v18  ;;  %v11905_v21 = vsub.f32 %v11889_v8, %v860_v19 }
  0xcc   : > { %v850_v22 = vpop.xlane.xlu0 %849  ;;  %v856_v23 = vpop.xlane.xlu1 %855 }
  0xcd   : > { %v859_v24 = vmul.f32 0.03125, %v850_v22  ;;  %v861_v25 = vmul.f32 0.03125, %v856_v23  ;;  %v866_v26 = vmul.f32 %v862_v20, %v862_v20  ;;  %v868_v27 = vmul.f32 %v11905_v21, %v11905_v21 }
  0xcf   : > { %v863_v28 = vsub.f32 %v11891_v9, %v859_v24  ;;  %v11911_v29 = vsub.f32 %v11893_v11, %v861_v25  ;;  %v870_v30 = vsel %vm844_vm0, %v866_v26, 0.0  ;;  %v876_v31 = vsel %vm844_vm0, %v868_v27, 0.0 }
  0xd0   : > { %871 = vadd.xlane.f32.xlu0 %v870_v30 }
  0xd1   : > { %v867_v32 = vmul.f32 %v863_v28, %v863_v28  ;;  %v869_v33 = vmul.f32 %v11911_v29, %v11911_v29 }
  0xd3   : > { %v873_v34 = vsel %vm844_vm0, %v867_v32, 0.0  ;;  %v879_v35 = vsel %vm844_vm0, %v869_v33, 0.0 }
  0xd4   : > { %877 = vadd.xlane.f32.xlu0 %v876_v31  ;;  %874 = vadd.xlane.f32.xlu1 %v873_v34 }
  0xd8   : > { %880 = vadd.xlane.f32.xlu1 %v879_v35  ;;  %v8854_v35 = vld [vmem:[%s13479_s29 + $0x20] sm:$0xff] }
  0xd9   : > { %v10817_v39 = vpack.c.bf16 %v8855_v36, %v8854_v35  ;;  %v8849_v35 = vld [vmem:[%s13478_s27 + $0x38] sm:$0xff] }
 0x15d   : > { %v872_v51 = vpop.xlane.xlu0 %871 }
 0x15e   : > { %v882_v52 = vmul.f32 0.03125, %v872_v51 }
 0x160   : > { %v886_v53 = vadd.f32 1e-05, %v882_v52 }
 0x161   : > { %v875_v54 = vpop.xlane.xlu1 %874  ;;  %v878_v55 = vpop.xlane.xlu0 %877 }
 0x162   : > { %11423 = vrsqrt.f32 %v886_v53  ;;  %v883_v56 = vmul.f32 0.03125, %v875_v54  ;;  %v884_v57 = vmul.f32 0.03125, %v878_v55 }
 0x164   : > { %v887_v58 = vadd.f32 1e-05, %v883_v56  ;;  %v888_v59 = vadd.f32 1e-05, %v884_v57 }
 0x165   : > { %v881_v60 = vpop.xlane.xlu1 %880 }
 0x166   : > { %11425 = vrsqrt.f32 %v887_v58  ;;  %v885_v61 = vmul.f32 0.03125, %v881_v60 }
 0x167   : > { %11427 = vrsqrt.f32 %v888_v59 }
 0x168   : > { %v889_v62 = vadd.f32 1e-05, %v885_v61 }
 0x16a   : > { %11429 = vrsqrt.f32 %v889_v62 }
 0x16c   : > { %v11424_v63 = vpop.eup %11423 }
 0x16d   : > { %v894_v1 = vmul.f32 %v11424_v63, %v862_v20 }
 0x16f   : > { %v902_v3 = vmul.f32 %v8820_v0, %v894_v1 }
 0x170   : > { %v11426_v4 = vpop.eup %11425 }
 0x171   : > { %v11428_v5 = vpop.eup %11427  ;;  %v11955_v6 = vadd.f32 %v8821_v2, %v902_v3  ;;  %v895_v10 = vmul.f32 %v11426_v4, %v863_v28 }
 0x172   : > { %v896_v12 = vmul.f32 %v11428_v5, %v11905_v21  ;;  %v10785_v21 = vpack.c.bf16 %v1107_v15, %v1106_v14 }
 0x173   : > { %v903_v13 = vmul.f32 %v8820_v0, %v895_v10  ;;  %9830 = vmatprep.mubr.msk.f32.mxu0 %vm844_vm0, %v11955_v6  ;;  %9844 = vmatprep.mubr.msk.f32.mxu1 %vm844_vm0, %v11955_v6 }
 0x174   : > { %v11430_v16 = vpop.eup %11429  ;;  %v904_v17 = vmul.f32 %v8820_v0, %v896_v12 }
 0x175   : > { %v11968_v18 = vadd.f32 %v8821_v2, %v903_v13  ;;  %v897_v19 = vmul.f32 %v11430_v16, %v11911_v29 }
 0x176   : > { %v11971_v20 = vadd.f32 %v8821_v2, %v904_v17 }
 0x177   : > { %v905_v22 = vmul.f32 %v8820_v0, %v897_v19  ;;  %9831 = vmatmul.mubr.msk.f32.vlgmr.msra.gmra.mrb[0].mxu0 %vm844_vm0, %v11968_v18  ;;  %9845 = vmatmul.mubr.msk.f32.vlgmr.msra.gmra.mrb[0].mxu1 %vm844_vm0, %v11968_v18 }
 0x178   : > { %9833 = vmatprep.mubr.msk.f32.mxu0 %vm844_vm0, %v11971_v20  ;;  %9847 = vmatprep.mubr.msk.f32.mxu1 %vm844_vm0, %v11971_v20 }
 0x179   : > { %v11981_v23 = vadd.f32 %v8821_v2, %v905_v22  ;;  %10784 = vmatpush3.bf16.msra.mxu0 %v10781_v50 }
 0x17a   : > { %10786 = vmatprep.subr.bf16.mxu0 %v10785_v21 }
 0x17b   : > { %9834 = vmatmul.mubr.msk.f32.gmra.mrb[2].mxu0 %vm844_vm0, %v11981_v23  ;;  %9848 = vmatmul.mubr.msk.f32.gmra.mrb[2].mxu1 %vm844_vm0, %v11981_v23 }
 0x17c   : > { %9858 = vmatprep.mubr.msk.f32.mxu0 %vm844_vm0, %v11955_v6 }
 0x17d   : > { %10788 = vmatpush3.bf16.msra.mxu0 %v10785_v21 }
 0x180   : > { %9859 = vmatmul.mubr.msk.f32.vlgmr.msra.gmra.mrb[4].mxu0 %vm844_vm0, %v11968_v18 }
 0x181   : > { %9861 = vmatprep.mubr.msk.f32.mxu0 %vm844_vm0, %v11971_v20 }
 0x184   : > { %9862 = vmatmul.mubr.msk.f32.gmra.mrb[6].mxu0 %vm844_vm0, %v11981_v23 }
 0x24a   : > { %v9832_v24 = vpop.f32.mrb[0].mxu0  ;;  %v9846_v25 = vpop.f32.mrb[0].mxu1 }
 0x24b   : > { %v996_v26 = vpop.f32.mrb[1].mxu0  ;;  %v1085_v27 = vpop.f32.mrb[1].mxu1 }
 0x24c   : > { %v10789_v29 = vpack.c.bf16 %v9846_v25, %v1085_v27  ;;  %9872 = vmatprep.mubr.msk.f32.mxu1 %vm1193_vm1, %v996_v26  ;;  %v8846_v25 = vld [vmem:[%s13478_s27 + $0x20] sm:$0xff]  ;;  %v8847_v26 = vld [vmem:[%s13478_s27 + $0x28] sm:$0xff] }
 0x24d   : > { %v10809_v27 = vpack.c.bf16 %v8847_v26, %v8846_v25 }
 0x24e   : > { %v9835_v30 = vpop.f32.mrb[2].mxu0  ;;  %v9849_v31 = vpop.f32.mrb[2].mxu1  ;;  %10791 = vmatprep.subr.msk.bf16.mxu1 %vm11997_vm2, %v10789_v29 }
 0x24f   : > { %v1006_v32 = vpop.f32.mrb[3].mxu0  ;;  %v1095_v33 = vpop.f32.mrb[3].mxu1  ;;  %10794 = vmatpush3.bf16.xpose.msk.msra.mxu1 %vm11997_vm2, %v10789_v29 }
 0x250   : > { %v10795_v34 = vpack.c.bf16 %v9849_v31, %v1095_v33 }
 0x252   : > { %10797 = vmatprep.subr.msk.bf16.mxu1 %vm11997_vm2, %v10795_v34 }
 0x253   : > { %v9860_v37 = vpop.f32.mrb[4].mxu0 }
 0x254   : > { %v1174_v38 = vpop.f32.mrb[5].mxu0 }
 0x255   : > { %v10801_v40 = vpack.c.bf16 %v9860_v37, %v1174_v38 }
 0x257   : > { %v9863_v41 = vpop.f32.mrb[6].mxu0  ;;  %10802 = vmatprep.subr.bf16.mxu0 %v10801_v40  ;;  %10800 = vmatpush3.bf16.xpose.msk.msra.mxu1 %vm11997_vm2, %v10795_v34  ;;  %v8848_v34 = vld [vmem:[%s13478_s27 + $0x30] sm:$0xff] }
 0x258   : > { %v1184_v42 = vpop.f32.mrb[7].mxu0  ;;  %10804 = vmatpush3.bf16.msra.mxu0 %v10801_v40  ;;  %10818 = vmatprep.subr.bf16.mxu1 %v10817_v39 }
 0x259   : > { %v10805_v43 = vpack.c.bf16 %v9863_v41, %v1184_v42  ;;  %v8862_v41 = vld [vmem:[%s13480_s2 + $0x20] sm:$0xff]  ;;  %v8863_v42 = vld [vmem:[%s13480_s2 + $0x28] sm:$0xff] }
 0x25b   : > { %10806 = vmatprep.subr.bf16.mxu0 %v10805_v43 }
 0x25c   : > { %10808 = vmatpush3.bf16.msra.mxu0 %v10805_v43 }
 0x25d   : > { %10810 = vmatprep.subr.bf16.mxu0 %v10809_v27 }
 0x25e   : > { %9873 = vmatmul.mubr.msk.f32.vlgmr.msra.gmra.mrb[4].mxu1 %vm1193_vm1, %v9832_v24 }
 0x25f   : > { %9875 = vmatprep.mubr.msk.f32.mxu1 %vm1193_vm1, %v1006_v32  ;;  %10820 = vmatpush3.bf16.msra.mxu1 %v10817_v39  ;;  %v10813_v39 = vpack.c.bf16 %v8849_v35, %v8848_v34 }
 0x260   : > { %10822 = vmatprep.subr.bf16.mxu1 %v10821_v46 }
 0x262   : > { %9876 = vmatmul.mubr.msk.f32.gmra.mrb[6].mxu1 %vm1193_vm1, %v9835_v30 }
 0x263   : > { %10824 = vmatpush3.bf16.msra.mxu1 %v10821_v46  ;;  %9914 = vmatprep.mubr.msk.f32.mxu1 %vm844_vm0, %v11955_v6  ;;  %v10825_v46 = vpack.c.bf16 %v8863_v42, %v8862_v41  ;;  %v8934_v42 = vld [vmem:[%s13478_s27 + $0x70] sm:$0xff] }
 0x266   : > { %9915 = vmatmul.mubr.msk.f32.vlgmr.msra.gmra.mrb[8].mxu1 %vm844_vm0, %v11968_v18 }
 0x267   : > { %9917 = vmatprep.mubr.msk.f32.mxu1 %vm844_vm0, %v11971_v20 }
 0x26a   : > { %9918 = vmatmul.mubr.msk.f32.gmra.mrb[10].mxu1 %vm844_vm0, %v11981_v23 }
 0x331   : > { %v9874_v47 = vpop.f32.mrb[4].mxu1 }
 0x332   : > { %v1284_v48 = vpop.f32.mrb[5].mxu1  ;;  %v1306_v49 = vsel %vm844_vm0, %v9874_v47, -inf }
 0x333   : > { %1307 = vmax.xlane.f32.xlu1 %v1306_v49  ;;  %v1303_v50 = vsel %vm844_vm0, %v1284_v48, -inf }
 0x334   : > { %1304 = vmax.xlane.f32.xlu0 %v1303_v50  ;;  %v8891_v50 = vld [vmem:[%s13478_s27 + $0x40] sm:$0xff] }
 0x335   : > { %v9877_v51 = vpop.f32.mrb[6].mxu1 }
 0x336   : > { %v1294_v52 = vpop.f32.mrb[7].mxu1  ;;  %v1312_v53 = vsel %vm844_vm0, %v9877_v51, -inf }
 0x337   : > { %1313 = vmax.xlane.f32.xlu1 %v1312_v53  ;;  %v1309_v54 = vsel %vm844_vm0, %v1294_v52, -inf }
 0x338   : > { %1310 = vmax.xlane.f32.xlu0 %v1309_v54 }
 0x339   : > { %v9916_v55 = vpop.f32.mrb[8].mxu1 }
 0x33a   : > { %v1606_v56 = vpop.f32.mrb[9].mxu1 }
 0x33b   : > { %v10833_v57 = vpack.c.bf16 %v9916_v55, %v1606_v56 }
 0x33d   : > { %v9919_v58 = vpop.f32.mrb[10].mxu1  ;;  %10835 = vmatprep.subr.msk.bf16.mxu1 %vm11997_vm2, %v10833_v57 }
 0x33e   : > { %v1616_v59 = vpop.f32.mrb[11].mxu1  ;;  %10838 = vmatpush3.bf16.xpose.msk.msra.mxu1 %vm11997_vm2, %v10833_v57  ;;  %v8893_v57 = vld [vmem:[%s13478_s27 + $0x50] sm:$0xff] }
 0x33f   : > { %v10839_v60 = vpack.c.bf16 %v9919_v58, %v1616_v59  ;;  %v8894_v58 = vld [vmem:[%s13478_s27 + $0x58] sm:$0xff] }
 0x341   : > { %10841 = vmatprep.subr.msk.bf16.mxu1 %vm11997_vm2, %v10839_v60 }
 0x346   : > { %10844 = vmatpush3.bf16.xpose.msk.msra.mxu1 %vm11997_vm2, %v10839_v60 }
 0x3c0   : > { %v1308_v61 = vpop.xlane.xlu1 %1307 }
 0x3c1   : > { %v1316_v62 = vsub.f32 %v9874_v47, %v1308_v61  ;;  %v1305_v63 = vpop.xlane.xlu0 %1304  ;;  %v8864_v47 = vld [vmem:[%s13480_s2 + $0x30] sm:$0xff]  ;;  %v10857_v61 = vpack.c.bf16 %v8894_v58, %v8893_v57 }
 0x3c2   : > { %v1315_v0 = vsub.f32 %v1284_v48, %v1305_v63  ;;  %v8865_v48 = vld [vmem:[%s13480_s2 + $0x38] sm:$0xff]  ;;  %v8900_v63 = vld [vmem:[%s13479_s29 + $0x48] sm:$0xff] }
 0x3c3   : > { %v1321_v1 = vmul.f32 1.442695, %v1316_v62  ;;  %v10829_v49 = vpack.c.bf16 %v8865_v48, %v8864_v47  ;;  %v8899_v62 = vld [vmem:[%s13479_s29 + $0x40] sm:$0xff]  ;;  %v8950_v48 = vld [vmem:[%s13480_s2 + $0x70] sm:$0xff] }
 0x3c4   : > { %v1319_v2 = vmul.f32 1.442695, %v1315_v0  ;;  %v1314_v3 = vpop.xlane.xlu1 %1313 }
 0x3c5   : > { %11431 = vpow2.f32 %v1321_v1  ;;  %v1318_v4 = vsub.f32 %v9877_v51, %v1314_v3  ;;  %v1311_v5 = vpop.xlane.xlu0 %1310  ;;  %v8892_v51 = vld [vmem:[%s13478_s27 + $0x48] sm:$0xff]  ;;  %v8901_v3 = vld [vmem:[%s13479_s29 + $0x50] sm:$0xff] }
 0x3c6   : > { %11433 = vpow2.f32 %v1319_v2  ;;  %v1317_v10 = vsub.f32 %v1294_v52, %v1311_v5  ;;  %v10853_v52 = vpack.c.bf16 %v8892_v51, %v8891_v50  ;;  %v10861_v2 = vpack.c.bf16 %v8900_v63, %v8899_v62 }
 0x3c7   : > { %v1325_v12 = vmul.f32 1.442695, %v1318_v4  ;;  %v8902_v4 = vld [vmem:[%s13479_s29 + $0x58] sm:$0xff] }
 0x3c8   : > { %v1323_v13 = vmul.f32 1.442695, %v1317_v10  ;;  %10854 = vmatprep.subr.bf16.mxu1 %v10853_v52 }
 0x3c9   : > { %11435 = vpow2.f32 %v1325_v12 }
 0x3ca   : > { %11437 = vpow2.f32 %v1323_v13  ;;  %v10865_v13 = vpack.c.bf16 %v8902_v4, %v8901_v3 }
 0x3cf   : > { %v11432_v14 = vpop.eup %11431 }
 0x3d0   : > { %v11434_v15 = vpop.eup %11433  ;;  %v1330_v16 = vsel %vm844_vm0, %v11432_v14, 0.0 }
 0x3d1   : > { %1331 = vadd.xlane.f32.xlu1 %v1330_v16  ;;  %v1327_v17 = vsel %vm844_vm0, %v11434_v15, 0.0 }
 0x3d2   : > { %1328 = vadd.xlane.f32.xlu0 %v1327_v17 }
 0x3d3   : > { %v11436_v19 = vpop.eup %11435 }
 0x3d4   : > { %v11438_v21 = vpop.eup %11437  ;;  %v1336_v22 = vsel %vm844_vm0, %v11436_v19, 0.0 }
 0x3d5   : > { %1337 = vadd.xlane.f32.xlu1 %v1336_v22  ;;  %v1333_v24 = vsel %vm844_vm0, %v11438_v21, 0.0 }
 0x3d6   : > { %1334 = vadd.xlane.f32.xlu0 %v1333_v24 }
 0x45e   : > { %v1332_v29 = vpop.xlane.xlu1 %1331 }
 0x45f   : > { %11439 = vrcp.f32 %v1332_v29  ;;  %v1329_v30 = vpop.xlane.xlu0 %1328 }
 0x460   : > { %11441 = vrcp.f32 %v1329_v30 }
 0x462   : > { %v1338_v31 = vpop.xlane.xlu1 %1337 }
 0x463   : > { %11443 = vrcp.f32 %v1338_v31  ;;  %v1335_v32 = vpop.xlane.xlu0 %1334 }
 0x464   : > { %11445 = vrcp.f32 %v1335_v32 }
 0x469   : > { %v11440_v33 = vpop.eup %11439 }
 0x46a   : > { %v11442_v36 = vpop.eup %11441  ;;  %v1344_v38 = vmul.f32 %v11440_v33, %v11432_v14 }
 0x46b   : > { %v1343_v37 = vmul.f32 %v11442_v36, %v11434_v15 }
 0x46d   : > { %v11444_v40 = vpop.eup %11443  ;;  %9886 = vmatprep.mubr.msk.f32.mxu0 %vm844_vm0, %v1343_v37 }
 0x46e   : > { %v11446_v43 = vpop.eup %11445  ;;  %9887 = vmatmul.mubr.msk.f32.vlgmr.msra.gmra.mrb[8].mxu0 %vm844_vm0, %v1344_v38  ;;  %v1346_v45 = vmul.f32 %v11444_v40, %v11436_v19  ;;  %v8933_v40 = vld [vmem:[%s13478_s27 + $0x68] sm:$0xff] }
 0x46f   : > { %10812 = vmatpush3.bf16.msra.mxu0 %v10809_v27  ;;  %v1345_v44 = vmul.f32 %v11446_v43, %v11438_v21  ;;  %v8935_v43 = vld [vmem:[%s13478_s27 + $0x78] sm:$0xff] }
 0x470   : > { %10814 = vmatprep.subr.bf16.mxu0 %v10813_v39 }
 0x471   : > { %9889 = vmatprep.mubr.msk.f32.mxu0 %vm844_vm0, %v1345_v44  ;;  %v10901_v44 = vpack.c.bf16 %v8935_v43, %v8934_v42 }
 0x472   : > { %9890 = vmatmul.mubr.msk.f32.gmra.mrb[10].mxu0 %vm844_vm0, %v1346_v45  ;;  %v8948_v45 = vld [vmem:[%s13480_s2 + $0x60] sm:$0xff] }
 0x473   : > { %10816 = vmatpush3.bf16.msra.mxu0 %v10813_v39  ;;  %9900 = vmatprep.mubr.msk.f32.mxu0 %vm844_vm0, %v11955_v6  ;;  %v8932_v39 = vld [vmem:[%s13478_s27 + $0x60] sm:$0xff] }
 0x474   : > { %10826 = vmatprep.subr.bf16.mxu0 %v10825_v46  ;;  %v10897_v41 = vpack.c.bf16 %v8933_v40, %v8932_v39 }
 0x476   : > { %9901 = vmatmul.mubr.msk.f32.vlgmr.msra.gmra.mrb[12].mxu0 %vm844_vm0, %v11968_v18 }
 0x477   : > { %9903 = vmatprep.mubr.msk.f32.mxu0 %vm844_vm0, %v11971_v20  ;;  %10828 = vmatpush3.bf16.msra.mxu0 %v10825_v46  ;;  %v8949_v46 = vld [vmem:[%s13480_s2 + $0x68] sm:$0xff] }
 0x478   : > { %10830 = vmatprep.subr.bf16.mxu0 %v10829_v49  ;;  %v10913_v47 = vpack.c.bf16 %v8949_v46, %v8948_v45 }
 0x47a   : > { %9904 = vmatmul.mubr.msk.f32.gmra.mrb[14].mxu0 %vm844_vm0, %v11981_v23 }
 0x47b   : > { %10832 = vmatpush3.bf16.msra.mxu0 %v10829_v49  ;;  %9928 = vmatprep.mubr.msk.f32.mxu0 %vm844_vm0, %v11955_v6  ;;  %v8951_v49 = vld [vmem:[%s13480_s2 + $0x78] sm:$0xff] }
 0x47c   : > { %v10917_v50 = vpack.c.bf16 %v8951_v49, %v8950_v48 }
 0x47e   : > { %9929 = vmatmul.mubr.msk.f32.vlgmr.msra.gmra.mrb[16].mxu0 %vm844_vm0, %v11968_v18 }
 0x47f   : > { %9931 = vmatprep.mubr.msk.f32.mxu0 %vm844_vm0, %v11971_v20 }
 0x482   : > { %9932 = vmatmul.mubr.msk.f32.gmra.mrb[18].mxu0 %vm844_vm0, %v11981_v23 }
 0x541   : > { %v12099_v53 = vpop.f32.mrb[8].mxu0 }
 0x542   : > { %v12101_v54 = vpop.f32.mrb[9].mxu0 }
 0x545   : > { %v12103_v55 = vpop.f32.mrb[10].mxu0 }
 0x546   : > { %v12105_v56 = vpop.f32.mrb[11].mxu0 }
 0x549   : > { %v9902_v59 = vpop.f32.mrb[12].mxu0 }
 0x54a   : > { %v1516_v60 = vpop.f32.mrb[13].mxu0 }
 0x54b   : > { %9942 = vmatprep.mubr.msk.f32.mxu1 %vm1193_vm1, %v1516_v60 }
 0x54c   : > { %9943 = vmatmul.mubr.msk.f32.vlgmr.msra.gmra.mrb[12].mxu1 %vm1193_vm1, %v9902_v59 }
 0x54d   : > { %v9905_v0 = vpop.f32.mrb[14].mxu0  ;;  %10856 = vmatpush3.bf16.msra.mxu1 %v10853_v52 }
 0x54e   : > { %v1526_v1 = vpop.f32.mrb[15].mxu0  ;;  %10858 = vmatprep.subr.bf16.mxu1 %v10857_v61 }
 0x54f   : > { %9945 = vmatprep.mubr.msk.f32.mxu1 %vm1193_vm1, %v1526_v1 }
 0x550   : > { %9946 = vmatmul.mubr.msk.f32.gmra.mrb[14].mxu1 %vm1193_vm1, %v9905_v0 }
 0x551   : > { %v9930_v5 = vpop.f32.mrb[16].mxu0  ;;  %10860 = vmatpush3.bf16.msra.mxu1 %v10857_v61  ;;  %9986 = vmatprep.mubr.msk.f32.mxu1 %vm844_vm0, %v11955_v6 }
 0x552   : > { %v1696_v10 = vpop.f32.mrb[17].mxu0  ;;  %10862 = vmatprep.subr.bf16.mxu1 %v10861_v2 }
 0x553   : > { %v10845_v12 = vpack.c.bf16 %v9930_v5, %v1696_v10 }
 0x554   : > { %9987 = vmatmul.mubr.msk.f32.vlgmr.msra.gmra.mrb[16].mxu1 %vm844_vm0, %v11968_v18 }
 0x555   : > { %v9933_v14 = vpop.f32.mrb[18].mxu0  ;;  %10846 = vmatprep.subr.bf16.mxu0 %v10845_v12  ;;  %9989 = vmatprep.mubr.msk.f32.mxu1 %vm844_vm0, %v11971_v20 }
 0x556   : > { %10864 = vmatpush3.bf16.msra.mxu1 %v10861_v2  ;;  %v1706_v15 = vpop.f32.mrb[19].mxu0  ;;  %10848 = vmatpush3.bf16.msra.mxu0 %v10845_v12 }
 0x557   : > { %v10849_v16 = vpack.c.bf16 %v9933_v14, %v1706_v15  ;;  %10866 = vmatprep.subr.bf16.mxu1 %v10865_v13 }
 0x558   : > { %9990 = vmatmul.mubr.msk.f32.gmra.mrb[18].mxu1 %vm844_vm0, %v11981_v23 }
 0x559   : > { %10850 = vmatprep.subr.bf16.mxu0 %v10849_v16  ;;  %10000 = vmatprep.mubr.msk.f32.mxu1 %vm844_vm0, %v11955_v6 }
 0x55a   : > { %10868 = vmatpush3.bf16.msra.mxu1 %v10865_v13  ;;  %10852 = vmatpush3.bf16.msra.mxu0 %v10849_v16 }
 0x55d   : > { %10001 = vmatmul.mubr.msk.f32.vlgmr.msra.gmra.mrb[20].mxu1 %vm844_vm0, %v11968_v18 }
 0x55e   : > { %10003 = vmatprep.mubr.msk.f32.mxu1 %vm844_vm0, %v11971_v20 }
 0x561   : > { %10004 = vmatmul.mubr.msk.f32.gmra.mrb[22].mxu1 %vm844_vm0, %v11981_v23 }
 0x61f   : > { %v9944_v17 = vpop.f32.mrb[12].mxu1 }
 0x620   : > { %v1805_v19 = vpop.f32.mrb[13].mxu1  ;;  %v1827_v21 = vsel %vm844_vm0, %v9944_v17, -inf }
 0x621   : > { %1828 = vmax.xlane.f32.xlu1 %v1827_v21  ;;  %v1824_v22 = vsel %vm844_vm0, %v1805_v19, -inf }
 0x622   : > { %1825 = vmax.xlane.f32.xlu0 %v1824_v22 }
 0x623   : > { %v12147_v24 = vpop.f32.mrb[14].mxu1 }
 0x624   : > { %v12149_v25 = vpop.f32.mrb[15].mxu1  ;;  %v1833_v26 = vsel %vm844_vm0, %v12147_v24, -inf }
 0x625   : > { %1834 = vmax.xlane.f32.xlu1 %v1833_v26  ;;  %v1830_v27 = vsel %vm844_vm0, %v12149_v25, -inf }
 0x626   : > { %1831 = vmax.xlane.f32.xlu0 %v1830_v27 }
 0x627   : > { %v9988_v29 = vpop.f32.mrb[16].mxu1 }
 0x628   : > { %v2232_v30 = vpop.f32.mrb[17].mxu1 }
 0x629   : > { %10028 = vmatprep.mubr.msk.f32.mxu1 %vm1193_vm1, %v2232_v30 }
 0x62b   : > { %v9991_v31 = vpop.f32.mrb[18].mxu1 }
 0x62c   : > { %v2242_v32 = vpop.f32.mrb[19].mxu1 }
 0x630   : > { %v10002_v33 = vpop.f32.mrb[20].mxu1 }
 0x631   : > { %v2322_v34 = vpop.f32.mrb[21].mxu1 }
 0x632   : > { %v10877_v35 = vpack.c.bf16 %v10002_v33, %v2322_v34 }
 0x634   : > { %v10005_v36 = vpop.f32.mrb[22].mxu1  ;;  %10879 = vmatprep.subr.msk.bf16.mxu1 %vm11997_vm2, %v10877_v35 }
 0x635   : > { %v2332_v37 = vpop.f32.mrb[23].mxu1  ;;  %10882 = vmatpush3.bf16.xpose.msk.msra.mxu1 %vm11997_vm2, %v10877_v35 }
 0x636   : > { %v10883_v38 = vpack.c.bf16 %v10005_v36, %v2332_v37 }
 0x638   : > { %10885 = vmatprep.subr.msk.bf16.mxu1 %vm11997_vm2, %v10883_v38 }
 0x63d   : > { %10888 = vmatpush3.bf16.xpose.msk.msra.mxu1 %vm11997_vm2, %v10883_v38  ;;  %v8882_v38 = vld [vmem:[%s13486_s8 + $0x8] sm:$0xff]  ;;  %s13491_s8 = sld [smem:[#allocation24_spill]] }
 0x63e   : > { %10898 = vmatprep.subr.bf16.mxu1 %v10897_v41  ;;  %9962 = vmatprep.subr.mxu0 %v8882_v38 }
 0x643   : > { %s13492_s5 = smov %s13491_s8 }
 0x644   : > { %10029 = vmatmul.mubr.msk.f32.vlgmr.msra.gmra.mrb[24].mxu1 %vm1193_vm1, %v9988_v29 }
 0x645   : > { %10031 = vmatprep.mubr.msk.f32.mxu1 %vm1193_vm1, %v2242_v32  ;;  %10900 = vmatpush3.bf16.msra.mxu1 %v10897_v41 }
 0x646   : > { %10902 = vmatprep.subr.bf16.mxu1 %v10901_v44 }
 0x648   : > { %10032 = vmatmul.mubr.msk.f32.gmra.mrb[26].mxu1 %vm1193_vm1, %v9991_v31 }
 0x649   : > { %10904 = vmatpush3.bf16.msra.mxu1 %v10901_v44  ;;  %10064 = vmatprep.mubr.msk.f32.mxu1 %vm844_vm0, %v11955_v6 }
 0x64a   : > { %10914 = vmatprep.subr.bf16.mxu1 %v10913_v47 }
 0x64c   : > { %10065 = vmatmul.mubr.msk.f32.vlgmr.msra.gmra.mrb[28].mxu1 %vm844_vm0, %v11968_v18 }
 0x64d   : > { %10067 = vmatprep.mubr.msk.f32.mxu1 %vm844_vm0, %v11971_v20  ;;  %10916 = vmatpush3.bf16.msra.mxu1 %v10913_v47 }
 0x64e   : > { %10918 = vmatprep.subr.bf16.mxu1 %v10917_v50 }
 0x650   : > { %10068 = vmatmul.mubr.msk.f32.gmra.mrb[30].mxu1 %vm844_vm0, %v11981_v23 }
 0x651   : > { %10920 = vmatpush3.bf16.msra.mxu1 %v10917_v50  ;;  %10092 = vmatprep.mubr.msk.f32.mxu1 %vm844_vm0, %v11955_v6 }
 0x654   : > { %10093 = vmatmul.mubr.msk.f32.vlgmr.msra.gmra.mrb[32].mxu1 %vm844_vm0, %v11968_v18 }
 0x655   : > { %10095 = vmatprep.mubr.msk.f32.mxu1 %vm844_vm0, %v11971_v20 }
 0x658   : > { %10096 = vmatmul.mubr.msk.f32.gmra.mrb[34].mxu1 %vm844_vm0, %v11981_v23 }
 0x6ae   : > { %v1829_v51 = vpop.xlane.xlu1 %1828 }
 0x6af   : > { %v1837_v52 = vsub.f32 %v9944_v17, %v1829_v51  ;;  %v1826_v57 = vpop.xlane.xlu0 %1825 }
 0x6b0   : > { %v1836_v58 = vsub.f32 %v1805_v19, %v1826_v57 }
 0x6b1   : > { %v1842_v59 = vmul.f32 1.442695, %v1837_v52 }
 0x6b2   : > { %v1840_v60 = vmul.f32 1.442695, %v1836_v58  ;;  %v1835_v61 = vpop.xlane.xlu1 %1834 }
 0x6b3   : > { %11447 = vpow2.f32 %v1842_v59  ;;  %v1839_v62 = vsub.f32 %v12147_v24, %v1835_v61  ;;  %v1832_v63 = vpop.xlane.xlu0 %1831 }
 0x6b4   : > { %11449 = vpow2.f32 %v1840_v60  ;;  %v1838_v0 = vsub.f32 %v12149_v25, %v1832_v63 }
 0x6b5   : > { %v1846_v1 = vmul.f32 1.442695, %v1839_v62 }
 0x6b6   : > { %v1844_v2 = vmul.f32 1.442695, %v1838_v0 }
 0x6b7   : > { %11451 = vpow2.f32 %v1846_v1 }
 0x6b8   : > { %11453 = vpow2.f32 %v1844_v2 }
 0x6bd   : > { %v11448_v3 = vpop.eup %11447 }
 0x6be   : > { %v11450_v4 = vpop.eup %11449  ;;  %v1851_v5 = vsel %vm844_vm0, %v11448_v3, 0.0 }
 0x6bf   : > { %1852 = vadd.xlane.f32.xlu1 %v1851_v5  ;;  %v1848_v10 = vsel %vm844_vm0, %v11450_v4, 0.0 }
 0x6c0   : > { %1849 = vadd.xlane.f32.xlu0 %v1848_v10 }
 0x6c1   : > { %v11452_v12 = vpop.eup %11451 }
 0x6c2   : > { %v11454_v13 = vpop.eup %11453  ;;  %v1857_v14 = vsel %vm844_vm0, %v11452_v12, 0.0 }
 0x6c3   : > { %1858 = vadd.xlane.f32.xlu1 %v1857_v14  ;;  %v1854_v15 = vsel %vm844_vm0, %v11454_v13, 0.0 }
 0x6c4   : > { %1855 = vadd.xlane.f32.xlu0 %v1854_v15 }
 0x717   : > { %v10030_v16 = vpop.f32.mrb[24].mxu1 }
 0x718   : > { %v2521_v17 = vpop.f32.mrb[25].mxu1  ;;  %v2543_v19 = vsel %vm844_vm0, %v10030_v16, -inf }
 0x719   : > { %2544 = vmax.xlane.f32.xlu1 %v2543_v19  ;;  %v2540_v21 = vsel %vm844_vm0, %v2521_v17, -inf  ;;  %v8908_v19 = vld [vmem:[%s13480_s2 + $0x48] sm:$0xff] }
 0x71a   : > { %2541 = vmax.xlane.f32.xlu0 %v2540_v21 }
 0x71b   : > { %v10033_v22 = vpop.f32.mrb[26].mxu1 }
 0x71c   : > { %v2531_v24 = vpop.f32.mrb[27].mxu1  ;;  %v2549_v25 = vsel %vm844_vm0, %v10033_v22, -inf }
 0x71d   : > { %2550 = vmax.xlane.f32.xlu1 %v2549_v25  ;;  %v2546_v26 = vsel %vm844_vm0, %v2531_v24, -inf }
 0x71e   : > { %2547 = vmax.xlane.f32.xlu0 %v2546_v26 }
 0x71f   : > { %v12217_v27 = vpop.f32.mrb[28].mxu1 }
 0x720   : > { %v2855_v29 = vpop.f32.mrb[29].mxu1 }
 0x721   : > { %10106 = vmatprep.mubr.msk.f32.mxu1 %vm1193_vm1, %v2855_v29  ;;  %v8909_v29 = vld [vmem:[%s13480_s2 + $0x50] sm:$0xff] }
 0x723   : > { %v12220_v30 = vpop.f32.mrb[30].mxu1 }
 0x724   : > { %v12222_v31 = vpop.f32.mrb[31].mxu1 }
 0x727   : > { %v10094_v32 = vpop.f32.mrb[32].mxu1 }
 0x728   : > { %v3035_v33 = vpop.f32.mrb[33].mxu1 }
 0x729   : > { %v12224_v34 = vpack.c.bf16 %v10094_v32, %v3035_v33  ;;  %v8910_v32 = vld [vmem:[%s13480_s2 + $0x58] sm:$0xff] }
 0x72a   : > { %v10873_v33 = vpack.c.bf16 %v8910_v32, %v8909_v29 }
 0x72b   : > { %v10097_v35 = vpop.f32.mrb[34].mxu1 }
 0x72c   : > { %v3045_v36 = vpop.f32.mrb[35].mxu1 }
 0x72d   : > { %v12226_v37 = vpack.c.bf16 %v10097_v35, %v3045_v36 }
 0x74c   : > { %v1853_v39 = vpop.xlane.xlu1 %1852 }
 0x74d   : > { %11455 = vrcp.f32 %v1853_v39  ;;  %v1850_v40 = vpop.xlane.xlu0 %1849 }
 0x74e   : > { %11457 = vrcp.f32 %v1850_v40 }
 0x750   : > { %v1859_v41 = vpop.xlane.xlu1 %1858 }
 0x751   : > { %11459 = vrcp.f32 %v1859_v41  ;;  %v1856_v42 = vpop.xlane.xlu0 %1855 }
 0x752   : > { %11461 = vrcp.f32 %v1856_v42 }
 0x757   : > { %v11456_v43 = vpop.eup %11455 }
 0x758   : > { %v11458_v44 = vpop.eup %11457  ;;  %v1865_v46 = vmul.f32 %v11456_v43, %v11448_v3  ;;  %v1444_v3 = vld [vmem:[%s13487_s6] sm:$0xff] }
 0x759   : > { %v1864_v45 = vmul.f32 %v11458_v44, %v11450_v4 }
 0x75b   : > { %v11460_v47 = vpop.eup %11459  ;;  %9956 = vmatprep.mubr.msk.f32.mxu0 %vm844_vm0, %v1864_v45  ;;  %v8927_v45 = vld [vmem:[%s13487_s6 + $0x10] sm:$0xff] }
 0x75c   : > { %v11462_v48 = vpop.eup %11461  ;;  %9957 = vmatmul.mubr.msk.f32.vlgmr.msra.gmra.mrb[20].mxu0 %vm844_vm0, %v1865_v46  ;;  %v1867_v50 = vmul.f32 %v11460_v47, %v11452_v12 }
 0x75d   : > { %v1866_v49 = vmul.f32 %v11462_v48, %v11454_v13  ;;  %9963 = vmatpush3.msra.mxu0 %v8882_v38 }
 0x75e   : > { %9970 = vmatprep.subr.mxu0 %v1444_v3 }
 0x75f   : > { %9959 = vmatprep.mubr.msk.f32.mxu0 %vm844_vm0, %v1866_v49 }
 0x760   : > { %9960 = vmatmul.mubr.msk.f32.gmra.mrb[22].mxu0 %vm844_vm0, %v1867_v50 }
 0x7a6   : > { %v2545_v51 = vpop.xlane.xlu1 %2544 }
 0x7a7   : > { %v2553_v52 = vsub.f32 %v10030_v16, %v2545_v51  ;;  %v2542_v57 = vpop.xlane.xlu0 %2541  ;;  %v8940_v51 = vld [vmem:[%s13479_s29 + $0x60] sm:$0xff] }
 0x7a8   : > { %v2552_v58 = vsub.f32 %v2521_v17, %v2542_v57  ;;  %v8907_v17 = vld [vmem:[%s13480_s2 + $0x40] sm:$0xff] }
 0x7a9   : > { %v2558_v59 = vmul.f32 1.442695, %v2553_v52  ;;  %v8941_v52 = vld [vmem:[%s13479_s29 + $0x68] sm:$0xff] }
 0x7aa   : > { %v2556_v60 = vmul.f32 1.442695, %v2552_v58  ;;  %v2551_v61 = vpop.xlane.xlu1 %2550  ;;  %v10905_v57 = vpack.c.bf16 %v8941_v52, %v8940_v51  ;;  %v8942_v58 = vld [vmem:[%s13479_s29 + $0x70] sm:$0xff] }
 0x7ab   : > { %11463 = vpow2.f32 %v2558_v59  ;;  %v2555_v62 = vsub.f32 %v10033_v22, %v2551_v61  ;;  %v2548_v63 = vpop.xlane.xlu0 %2547  ;;  %v8943_v59 = vld [vmem:[%s13479_s29 + $0x78] sm:$0xff] }
 0x7ac   : > { %11465 = vpow2.f32 %v2556_v60  ;;  %v2554_v0 = vsub.f32 %v2531_v24, %v2548_v63  ;;  %v10869_v24 = vpack.c.bf16 %v8908_v19, %v8907_v17 }
 0x7ad   : > { %v2562_v1 = vmul.f32 1.442695, %v2555_v62  ;;  %v10909_v62 = vpack.c.bf16 %v8943_v59, %v8942_v58  ;;  %v8973_v58 = vld [vmem:[%s13488_s3] ss:$0 sm:$0xff] }
 0x7ae   : > { %v2560_v2 = vmul.f32 1.442695, %v2554_v0 }
 0x7af   : > { %11467 = vpow2.f32 %v2562_v1 }
 0x7b0   : > { %11469 = vpow2.f32 %v2560_v2 }
 0x7b5   : > { %v12238_v4 = vpop.eup %11463 }
 0x7b6   : > { %v11466_v5 = vpop.eup %11465  ;;  %v2567_v10 = vsel %vm844_vm0, %v12238_v4, 0.0 }
 0x7b7   : > { %2568 = vadd.xlane.f32.xlu1 %v2567_v10  ;;  %v2564_v12 = vsel %vm844_vm0, %v11466_v5, 0.0 }
 0x7b8   : > { %2565 = vadd.xlane.f32.xlu0 %v2564_v12 }
 0x7b9   : > { %v12243_v13 = vpop.eup %11467 }
 0x7ba   : > { %v11470_v14 = vpop.eup %11469  ;;  %v2573_v15 = vsel %vm844_vm0, %v12243_v13, 0.0 }
 0x7bb   : > { %2574 = vadd.xlane.f32.xlu1 %v2573_v15  ;;  %v2570_v16 = vsel %vm844_vm0, %v11470_v14, 0.0 }
 0x7bc   : > { %2571 = vadd.xlane.f32.xlu0 %v2570_v16 }
 0x82f   : > { %v9958_v21 = vpop.f32.mrb[20].mxu0 }
 0x830   : > { %v1946_v22 = vpop.f32.mrb[21].mxu0 }
 0x831   : > { %9964 = vmatprep.mubr.msk.f32.mxu0 %vm1193_vm1, %v1946_v22 }
 0x832   : > { %9965 = vmatmul.mubr.msk.f32.vlgmr.msra.gmra.mrb[24].mxu0 %vm1193_vm1, %v9958_v21 }
 0x833   : > { %v9961_v25 = vpop.f32.mrb[22].mxu0  ;;  %9971 = vmatpush3.msra.mxu0 %v1444_v3 }
 0x834   : > { %v1956_v26 = vpop.f32.mrb[23].mxu0  ;;  %10870 = vmatprep.subr.bf16.mxu0 %v10869_v24 }
 0x835   : > { %9967 = vmatprep.mubr.msk.f32.mxu0 %vm1193_vm1, %v1956_v26 }
 0x836   : > { %9968 = vmatmul.mubr.msk.f32.gmra.mrb[26].mxu0 %vm1193_vm1, %v9961_v25 }
 0x837   : > { %9972 = vmatprep.mubr.msk.f32.mxu0 %vm1193_vm1, %v12101_v54 }
 0x83a   : > { %9973 = vmatmul.mubr.msk.f32.vlgmr.msra.gmra.mrb[24].mxu0 %vm1193_vm1, %v12099_v53 }
 0x83b   : > { %9975 = vmatprep.mubr.msk.f32.mxu0 %vm1193_vm1, %v12105_v56  ;;  %10872 = vmatpush3.bf16.msra.mxu0 %v10869_v24 }
 0x83c   : > { %10874 = vmatprep.subr.bf16.mxu0 %v10873_v33 }
 0x83e   : > { %9976 = vmatmul.mubr.msk.f32.gmra.mrb[26].mxu0 %vm1193_vm1, %v12103_v55 }
 0x83f   : > { %10876 = vmatpush3.bf16.msra.mxu0 %v10873_v33  ;;  %10014 = vmatprep.mubr.msk.f32.mxu0 %vm844_vm0, %v11955_v6 }
 0x842   : > { %10015 = vmatmul.mubr.msk.f32.vlgmr.msra.gmra.mrb[28].mxu0 %vm844_vm0, %v11968_v18 }
 0x843   : > { %10017 = vmatprep.mubr.msk.f32.mxu0 %vm844_vm0, %v11971_v20 }
 0x844   : > { %v2569_v55 = vpop.xlane.xlu1 %2568 }
 0x845   : > { %v2566_v54 = vpop.xlane.xlu0 %2565 }
 0x846   : > { %11471 = vrcp.f32 %v2566_v54  ;;  %10018 = vmatmul.mubr.msk.f32.gmra.mrb[30].mxu0 %vm844_vm0, %v11981_v23 }
 0x847   : > { %11473 = vrcp.f32 %v2569_v55 }
 0x848   : > { %v2575_v36 = vpop.xlane.xlu1 %2574 }
 0x849   : > { %v2572_v35 = vpop.xlane.xlu0 %2571 }
 0x84a   : > { %11475 = vrcp.f32 %v2572_v35  ;;  %v8968_v35 = vld [vmem:[%s13487_s6 + $0x18] sm:$0xff] }
 0x84b   : > { %11477 = vrcp.f32 %v2575_v36 }
 0x850   : > { %v11472_v53 = vpop.eup %11471 }
 0x851   : > { %v2580_v56 = vmul.f32 %v11472_v53, %v11466_v5  ;;  %v11474_v44 = vpop.eup %11473 }
 0x852   : > { %v2581_v47 = vmul.f32 %v11474_v44, %v12238_v4 }
 0x853   : > { %10042 = vmatprep.mubr.msk.f32.mxu0 %vm844_vm0, %v2580_v56 }
 0x854   : > { %v11476_v46 = vpop.eup %11475 }
 0x855   : > { %v11478_v48 = vpop.eup %11477  ;;  %v2582_v49 = vmul.f32 %v11476_v46, %v11470_v14 }
 0x856   : > { %v2583_v50 = vmul.f32 %v11478_v48, %v12243_v13 }
 0x915   : > { %v10016_v38 = vpop.f32.mrb[28].mxu0 }
 0x916   : > { %v2412_v39 = vpop.f32.mrb[29].mxu0 }
 0x917   : > { %v10889_v40 = vpack.c.bf16 %v10016_v38, %v2412_v39 }
 0x919   : > { %v10019_v41 = vpop.f32.mrb[30].mxu0  ;;  %10890 = vmatprep.subr.bf16.mxu0 %v10889_v40 }
 0x91a   : > { %v2422_v42 = vpop.f32.mrb[31].mxu0  ;;  %10892 = vmatpush3.bf16.msra.mxu0 %v10889_v40 }
 0x91b   : > { %v10893_v43 = vpack.c.bf16 %v10019_v41, %v2422_v42 }
 0x91d   : > { %10894 = vmatprep.subr.bf16.mxu0 %v10893_v43 }
 0x91e   : > { %10896 = vmatpush3.bf16.msra.mxu0 %v10893_v43 }
 0x91f   : > { %10048 = vmatprep.subr.mxu0 %v8927_v45 }
 0x921   : > { %10043 = vmatmul.mubr.msk.f32.vlgmr.msra.gmra.mrb[32].mxu0 %vm844_vm0, %v2581_v47 }
 0x922   : > { %10045 = vmatprep.mubr.msk.f32.mxu0 %vm844_vm0, %v2582_v49  ;;  %10049 = vmatpush3.msra.mxu0 %v8927_v45 }
 0x923   : > { %10906 = vmatprep.subr.bf16.mxu0 %v10905_v57 }
 0x925   : > { %10046 = vmatmul.mubr.msk.f32.gmra.mrb[34].mxu0 %vm844_vm0, %v2583_v50 }
 0x9f4   : > { %v10044_v60 = vpop.f32.mrb[32].mxu0 }
 0x9f5   : > { %v2662_v61 = vpop.f32.mrb[33].mxu0 }
 0x9f6   : > { %10050 = vmatprep.mubr.msk.f32.mxu0 %vm1193_vm1, %v2662_v61 }
 0x9f7   : > { %10051 = vmatmul.mubr.msk.f32.vlgmr.msra.gmra.mrb[24].mxu0 %vm1193_vm1, %v10044_v60 }
 0x9f8   : > { %v10047_v63 = vpop.f32.mrb[34].mxu0  ;;  %10908 = vmatpush3.bf16.msra.mxu0 %v10905_v57 }
 0x9f9   : > { %v2672_v0 = vpop.f32.mrb[35].mxu0  ;;  %10910 = vmatprep.subr.bf16.mxu0 %v10909_v62 }
 0x9fa   : > { %10053 = vmatprep.mubr.msk.f32.mxu0 %vm1193_vm1, %v2672_v0 }
 0x9fb   : > { %10054 = vmatmul.mubr.msk.f32.gmra.mrb[26].mxu0 %vm1193_vm1, %v10047_v63 }
 0x9fc   : > { %10912 = vmatpush3.bf16.msra.mxu0 %v10909_v62  ;;  %10078 = vmatprep.mubr.msk.f32.mxu0 %vm844_vm0, %v11955_v6 }
 0x9fd   : > { %10126 = vmatprep.subr.mxu0 %v8968_v35 }
 0x9ff   : > { %10079 = vmatmul.mubr.msk.f32.vlgmr.msra.gmra.mrb[36].mxu0 %vm844_vm0, %v11968_v18 }
 0xa00   : > { %10081 = vmatprep.mubr.msk.f32.mxu0 %vm844_vm0, %v11971_v20  ;;  %10127 = vmatpush3.msra.mxu0 %v8968_v35 }
 0xa03   : > { %10082 = vmatmul.mubr.msk.f32.gmra.mrb[38].mxu0 %vm844_vm0, %v11981_v23 }
 0xad2   : > { %v10080_v1 = vpop.f32.mrb[36].mxu0 }
 0xad3   : > { %v2945_v2 = vpop.f32.mrb[37].mxu0 }
 0xad4   : > { %v10921_v3 = vpack.c.bf16 %v10080_v1, %v2945_v2 }
 0xad6   : > { %v10083_v4 = vpop.f32.mrb[38].mxu0  ;;  %10923 = vmatprep.subr.msk.bf16.mxu1 %vm11997_vm2, %v10921_v3 }
 0xad7   : > { %v2955_v5 = vpop.f32.mrb[39].mxu0  ;;  %10926 = vmatpush3.bf16.xpose.msk.msra.mxu1 %vm11997_vm2, %v10921_v3 }
 0xad8   : > { %v10927_v6 = vpack.c.bf16 %v10083_v4, %v2955_v5 }
 0xada   : > { %10929 = vmatprep.subr.msk.bf16.mxu1 %vm11997_vm2, %v10927_v6 }
 0xadf   : > { %10932 = vmatpush3.bf16.xpose.msk.msra.mxu1 %vm11997_vm2, %v10927_v6 }
 0xae0   : > { %10934 = vmatprep.subr.bf16.mxu1 %v12224_v34 }
 0xae6   : > { %10107 = vmatmul.mubr.msk.f32.vlgmr.msra.gmra.mrb[36].mxu1 %vm1193_vm1, %v12217_v27 }
 0xae7   : > { %10109 = vmatprep.mubr.msk.f32.mxu1 %vm1193_vm1, %v12222_v31  ;;  %10936 = vmatpush3.bf16.msra.mxu1 %v12224_v34 }
 0xae8   : > { %10938 = vmatprep.subr.bf16.mxu1 %v12226_v37 }
 0xaea   : > { %10110 = vmatmul.mubr.msk.f32.gmra.mrb[38].mxu1 %vm1193_vm1, %v12220_v30 }
 0xaeb   : > { %10940 = vmatpush3.bf16.msra.mxu1 %v12226_v37 }
 0xbb9   : > { %v10108_v18 = vpop.f32.mrb[36].mxu1 }
 0xbba   : > { %v3144_v20 = vpop.f32.mrb[37].mxu1  ;;  %v3166_v23 = vsel %vm844_vm0, %v10108_v18, -inf }
 0xbbb   : > { %3167 = vmax.xlane.f32.xlu1 %v3166_v23  ;;  %v3163_v10 = vsel %vm844_vm0, %v3144_v20, -inf }
 0xbbc   : > { %3164 = vmax.xlane.f32.xlu0 %v3163_v10 }
 0xbbd   : > { %v10111_v27 = vpop.f32.mrb[38].mxu1 }
 0xbbe   : > { %v3154_v12 = vpop.f32.mrb[39].mxu1  ;;  %v3172_v31 = vsel %vm844_vm0, %v10111_v27, -inf }
 0xbbf   : > { %3173 = vmax.xlane.f32.xlu1 %v3172_v31  ;;  %v3169_v34 = vsel %vm844_vm0, %v3154_v12, -inf }
 0xbc0   : > { %3170 = vmax.xlane.f32.xlu0 %v3169_v34 }
 0xc48   : > { %v3168_v13 = vpop.xlane.xlu1 %3167 }
 0xc49   : > { %v3176_v30 = vsub.f32 %v10108_v18, %v3168_v13  ;;  %v3165_v14 = vpop.xlane.xlu0 %3164 }
 0xc4a   : > { %v3175_v37 = vsub.f32 %v3144_v20, %v3165_v14 }
 0xc4b   : > { %v3181_v15 = vmul.f32 1.442695, %v3176_v30 }
 0xc4c   : > { %v3179_v16 = vmul.f32 1.442695, %v3175_v37  ;;  %v3174_v17 = vpop.xlane.xlu1 %3173 }
 0xc4d   : > { %11479 = vpow2.f32 %v3181_v15  ;;  %v3178_v19 = vsub.f32 %v10111_v27, %v3174_v17  ;;  %v3171_v21 = vpop.xlane.xlu0 %3170 }
 0xc4e   : > { %11481 = vpow2.f32 %v3179_v16  ;;  %v3177_v22 = vsub.f32 %v3154_v12, %v3171_v21 }
 0xc4f   : > { %v3185_v24 = vmul.f32 1.442695, %v3178_v19 }
 0xc50   : > { %v3183_v25 = vmul.f32 1.442695, %v3177_v22 }
 0xc51   : > { %11483 = vpow2.f32 %v3185_v24 }
 0xc52   : > { %11485 = vpow2.f32 %v3183_v25  ;;  %v3490_v25 = vld [vmem:[%s13489_s23] sm:$0xff] }
 0xc57   : > { %v11480_v26 = vpop.eup %11479 }
 0xc58   : > { %v11482_v29 = vpop.eup %11481  ;;  %v3190_v32 = vsel %vm844_vm0, %v11480_v26, 0.0 }
 0xc59   : > { %3191 = vadd.xlane.f32.xlu1 %v3190_v32  ;;  %v3187_v33 = vsel %vm844_vm0, %v11482_v29, 0.0  ;;  %v3492_v32 = vld [vmem:[%s13489_s23 + $0x10] sm:$0xff] }
 0xc5a   : > { %3188 = vadd.xlane.f32.xlu0 %v3187_v33  ;;  %v3493_v33 = vld [vmem:[%s13489_s23 + $0x18] sm:$0xff] }
 0xc5b   : > { %v11484_v54 = vpop.eup %11483 }
 0xc5c   : > { %v11486_v53 = vpop.eup %11485  ;;  %v3196_v56 = vsel %vm844_vm0, %v11484_v54, 0.0 }
 0xc5d   : > { %3197 = vadd.xlane.f32.xlu1 %v3196_v56  ;;  %v3193_v55 = vsel %vm844_vm0, %v11486_v53, 0.0  ;;  %v3633_v56 = vld [vmem:[%s13490_s13 + $0x8] sm:$0xff] }
 0xc5e   : > { %3194 = vadd.xlane.f32.xlu0 %v3193_v55 }
 0xce6   : > { %v3192_v36 = vpop.xlane.xlu1 %3191 }
 0xce7   : > { %11487 = vrcp.f32 %v3192_v36  ;;  %v3189_v38 = vpop.xlane.xlu0 %3188 }
 0xce8   : > { %11489 = vrcp.f32 %v3189_v38 }
 0xcea   : > { %v3198_v39 = vpop.xlane.xlu1 %3197 }
 0xceb   : > { %11491 = vrcp.f32 %v3198_v39  ;;  %v3195_v40 = vpop.xlane.xlu0 %3194 }
 0xcec   : > { %11493 = vrcp.f32 %v3195_v40 }
 0xcf1   : > { %v11488_v41 = vpop.eup %11487 }
 0xcf2   : > { %v11490_v42 = vpop.eup %11489  ;;  %v3204_v44 = vmul.f32 %v11488_v41, %v11480_v26  ;;  %v3491_v26 = vld [vmem:[%s13489_s23 + $0x8] sm:$0xff] }
 0xcf3   : > { %v3203_v43 = vmul.f32 %v11490_v42, %v11482_v29  ;;  %v10941_v29 = vpack.c.bf16 %v3491_v26, %v3490_v25  ;;  %v8976_v26 = vld [vmem:[%s13494_s12] ss:$0 sm:$0xff] }
 0xcf5   : > { %v11492_v45 = vpop.eup %11491  ;;  %10120 = vmatprep.mubr.msk.f32.mxu1 %vm844_vm0, %v3203_v43  ;;  %10942 = vmatprep.subr.bf16.mxu1 %v10941_v29 }
 0xcf6   : > { %v11494_v46 = vpop.eup %11493  ;;  %10121 = vmatmul.mubr.msk.f32.vlgmr.msra.gmra.mrb[40].mxu1 %vm844_vm0, %v3204_v44  ;;  %v3206_v48 = vmul.f32 %v11492_v45, %v11484_v54  ;;  %v10945_v54 = vpack.c.bf16 %v3493_v33, %v3492_v32 }
 0xcf7   : > { %v3205_v47 = vmul.f32 %v11494_v46, %v11486_v53  ;;  %10944 = vmatpush3.bf16.msra.mxu1 %v10941_v29  ;;  %v3632_v53 = vld [vmem:[%s13490_s13] sm:$0xff] }
 0xcf8   : > { %10946 = vmatprep.subr.bf16.mxu1 %v10945_v54  ;;  %v10949_v55 = vpack.c.bf16 %v3633_v56, %v3632_v53 }
 0xcf9   : > { %10123 = vmatprep.mubr.msk.f32.mxu1 %vm844_vm0, %v3205_v47 }
 0xcfa   : > { %10124 = vmatmul.mubr.msk.f32.gmra.mrb[42].mxu1 %vm844_vm0, %v3206_v48 }
 0xcfb   : > { %10948 = vmatpush3.bf16.msra.mxu1 %v10945_v54 }
 0xcfc   : > { %10950 = vmatprep.subr.bf16.mxu1 %v10949_v55 }
 0xdc9   : > { %v10122_v49 = vpop.f32.mrb[40].mxu1 }
 0xdca   : > { %v3285_v50 = vpop.f32.mrb[41].mxu1 }
 0xdcb   : > { %10128 = vmatprep.mubr.msk.f32.mxu0 %vm1193_vm1, %v3285_v50 }
 0xdcc   : > { %10129 = vmatmul.mubr.msk.f32.vlgmr.msra.gmra.mrb[24].mxu0 %vm1193_vm1, %v10122_v49  ;;  %v8974_v49 = vld [vmem:[%s13491_s8] ss:$0 sm:$0xff]  ;;  %s13497_s8 = sld [smem:[#allocation31_spill]] }
 0xdcd   : > { %v10125_v51 = vpop.f32.mrb[42].mxu1 }
 0xdce   : > { %v3295_v52 = vpop.f32.mrb[43].mxu1 }
 0xdcf   : > { %10131 = vmatprep.mubr.msk.f32.mxu0 %vm1193_vm1, %v3295_v52 }
 0xdd0   : > { %10132 = vmatmul.mubr.msk.f32.gmra.mrb[26].mxu0 %vm1193_vm1, %v10125_v51 }
 0xe9f   : > { %v10130_v57 = vpop.f32.mrb[24].mxu0 }
 0xea0   : > { %v3408_v59 = vadd.f32 %v10130_v57, %v11891_v9  ;;  %v3384_v60 = vpop.f32.mrb[25].mxu0  ;;  %v8975_v57 = vld [vmem:[%s13493_s0] ss:$0 sm:$0xff] }
 0xea1   : > { %v3407_v61 = vadd.f32 %v3384_v60, %v11887_v7 }
 0xea2   : > { %v12355_v62 = vadd.f32 %v8973_v58, %v3408_v59 }
 0xea3   : > { %v12357_v63 = vadd.f32 %v8973_v58, %v3407_v61  ;;  %v10133_v0 = vpop.f32.mrb[26].mxu0 }
 0xea4   : > { %v3410_v1 = vadd.f32 %v10133_v0, %v11893_v11  ;;  %v3394_v2 = vpop.f32.mrb[27].mxu0  ;;  %v3425_v3 = vsel %vm844_vm0, %v12355_v62, 0.0 }
 0xea5   : > { %v3409_v4 = vadd.f32 %v3394_v2, %v11889_v8  ;;  %3426 = vadd.xlane.f32.xlu1 %v3425_v3  ;;  %v3422_v9 = vsel %vm844_vm0, %v12357_v63, 0.0 }
 0xea6   : > { %v12365_v5 = vadd.f32 %v8973_v58, %v3410_v1  ;;  %3423 = vadd.xlane.f32.xlu0 %v3422_v9 }
 0xea7   : > { %v12367_v7 = vadd.f32 %v8973_v58, %v3409_v4 }
 0xea8   : > { %v3431_v6 = vsel %vm844_vm0, %v12365_v5, 0.0 }
 0xea9   : > { %3432 = vadd.xlane.f32.xlu1 %v3431_v6  ;;  %v3428_v11 = vsel %vm844_vm0, %v12367_v7, 0.0 }
 0xeaa   : > { %3429 = vadd.xlane.f32.xlu0 %v3428_v11 }
 0xf32   : > { %v3427_v18 = vpop.xlane.xlu1 %3426 }
 0xf33   : > { %v3435_v20 = vmul.f32 0.03125, %v3427_v18  ;;  %v3424_v8 = vpop.xlane.xlu0 %3423  ;;  %v3634_v18 = vld [vmem:[%s13490_s13 + $0x10] sm:$0xff] }
 0xf34   : > { %v3434_v23 = vmul.f32 0.03125, %v3424_v8 }
 0xf35   : > { %v3439_v10 = vsub.f32 %v12355_v62, %v3435_v20  ;;  %v3635_v20 = vld [vmem:[%s13490_s13 + $0x18] sm:$0xff] }
 0xf36   : > { %v3438_v27 = vsub.f32 %v12357_v63, %v3434_v23  ;;  %v3433_v12 = vpop.xlane.xlu1 %3432  ;;  %v10953_v8 = vpack.c.bf16 %v3635_v20, %v3634_v18  ;;  %v3636_v23 = vld [vmem:[%s13490_s13 + $0x20] sm:$0xff] }
 0xf37   : > { %v3437_v31 = vmul.f32 0.03125, %v3433_v12  ;;  %v3430_v34 = vpop.xlane.xlu0 %3429  ;;  %v3443_v13 = vmul.f32 %v3439_v10, %v3439_v10  ;;  %v3638_v12 = vld [vmem:[%s13490_s13 + $0x30] sm:$0xff] }
 0xf38   : > { %v3436_v30 = vmul.f32 0.03125, %v3430_v34  ;;  %v3442_v14 = vmul.f32 %v3438_v27, %v3438_v27 }
 0xf39   : > { %v3441_v37 = vsub.f32 %v12365_v5, %v3437_v31  ;;  %v3449_v15 = vsel %vm844_vm0, %v3443_v13, 0.0  ;;  %v3639_v31 = vld [vmem:[%s13490_s13 + $0x38] sm:$0xff]  ;;  %v3640_v13 = vld [vmem:[%s13490_s13 + $0x40] sm:$0xff] }
 0xf3a   : > { %v3440_v16 = vsub.f32 %v12367_v7, %v3436_v30  ;;  %3450 = vadd.xlane.f32.xlu1 %v3449_v15  ;;  %v3446_v17 = vsel %vm844_vm0, %v3442_v14, 0.0  ;;  %v10961_v34 = vpack.c.bf16 %v3639_v31, %v3638_v12  ;;  %v3641_v30 = vld [vmem:[%s13490_s13 + $0x48] sm:$0xff]  ;;  %v3643_v15 = vld [vmem:[%s13490_s13 + $0x58] sm:$0xff]  ;;  %v8981_v31 = vld [vmem:[%s13399_s14] ss:$0 sm:$0xff] }
 0xf3b   : > { %3447 = vadd.xlane.f32.xlu0 %v3446_v17  ;;  %v3445_v19 = vmul.f32 %v3441_v37, %v3441_v37  ;;  %v10965_v14 = vpack.c.bf16 %v3641_v30, %v3640_v13  ;;  %v3644_v17 = vld [vmem:[%s13490_s13 + $0x60] sm:$0xff] }
 0xf3c   : > { %v3444_v21 = vmul.f32 %v3440_v16, %v3440_v16 }
 0xf3d   : > { %v3455_v22 = vsel %vm844_vm0, %v3445_v19, 0.0  ;;  %v3645_v19 = vld [vmem:[%s13490_s13 + $0x68] sm:$0xff] }
 0xf3e   : > { %3456 = vadd.xlane.f32.xlu1 %v3455_v22  ;;  %v3452_v24 = vsel %vm844_vm0, %v3444_v21, 0.0  ;;  %v10973_v21 = vpack.c.bf16 %v3645_v19, %v3644_v17  ;;  %v3646_v22 = vld [vmem:[%s13490_s13 + $0x70] sm:$0xff] }
 0xf3f   : > { %3453 = vadd.xlane.f32.xlu0 %v3452_v24  ;;  %v3647_v24 = vld [vmem:[%s13490_s13 + $0x78] sm:$0xff] }
 0xf40   : > { %v10977_v25 = vpack.c.bf16 %v3647_v24, %v3646_v22 }
 0xfc7   : > { %v3451_v35 = vpop.xlane.xlu1 %3450 }
 0xfc8   : > { %v3459_v36 = vmul.f32 0.03125, %v3451_v35  ;;  %v3448_v38 = vpop.xlane.xlu0 %3447 }
 0xfc9   : > { %v3458_v39 = vmul.f32 0.03125, %v3448_v38 }
 0xfca   : > { %v3463_v40 = vadd.f32 1e-05, %v3459_v36 }
 0xfcb   : > { %v3462_v41 = vadd.f32 1e-05, %v3458_v39  ;;  %v3457_v42 = vpop.xlane.xlu1 %3456 }
 0xfcc   : > { %11495 = vrsqrt.f32 %v3463_v40  ;;  %v3461_v43 = vmul.f32 0.03125, %v3457_v42  ;;  %v3454_v44 = vpop.xlane.xlu0 %3453 }
 0xfcd   : > { %11497 = vrsqrt.f32 %v3462_v41  ;;  %v3460_v45 = vmul.f32 0.03125, %v3454_v44 }
 0xfce   : > { %v3465_v46 = vadd.f32 1e-05, %v3461_v43 }
 0xfcf   : > { %v3464_v47 = vadd.f32 1e-05, %v3460_v45 }
 0xfd0   : > { %11499 = vrsqrt.f32 %v3465_v46 }
 0xfd1   : > { %11501 = vrsqrt.f32 %v3464_v47 }
 0xfd6   : > { %v11496_v48 = vpop.eup %11495 }
 0xfd7   : > { %v11498_v50 = vpop.eup %11497  ;;  %v3471_v51 = vmul.f32 %v11496_v48, %v3439_v10  ;;  %v3637_v10 = vld [vmem:[%s13490_s13 + $0x28] sm:$0xff] }
 0xfd8   : > { %v3470_v52 = vmul.f32 %v11498_v50, %v3438_v27  ;;  %v10957_v27 = vpack.c.bf16 %v3637_v10, %v3636_v23 }
 0xfd9   : > { %v3479_v58 = vmul.f32 %v8974_v49, %v3471_v51 }
 0xfda   : > { %v11500_v59 = vpop.eup %11499  ;;  %v3478_v60 = vmul.f32 %v8974_v49, %v3470_v52 }
 0xfdb   : > { %v11502_v61 = vpop.eup %11501  ;;  %v3473_v0 = vmul.f32 %v11500_v59, %v3441_v37  ;;  %v3487_v3 = vadd.f32 %v8975_v57, %v3479_v58  ;;  %v3642_v37 = vld [vmem:[%s13490_s13 + $0x50] sm:$0xff] }
 0xfdc   : > { %v3486_v1 = vadd.f32 %v8975_v57, %v3478_v60  ;;  %v3472_v2 = vmul.f32 %v11502_v61, %v3440_v16  ;;  %v10969_v16 = vpack.c.bf16 %v3643_v15, %v3642_v37 }
 0xfdd   : > { %v3481_v4 = vmul.f32 %v8974_v49, %v3473_v0 }
 0xfde   : > { %10142 = vmatprep.mubr.msk.f32.mxu1 %vm844_vm0, %v3486_v1  ;;  %v3480_v9 = vmul.f32 %v8974_v49, %v3472_v2 }
 0xfdf   : > { %10143 = vmatmul.mubr.msk.f32.vlgmr.msra.gmra.mrb[44].mxu1 %vm844_vm0, %v3487_v3  ;;  %v3489_v11 = vadd.f32 %v8975_v57, %v3481_v4 }
 0xfe0   : > { %v3488_v6 = vadd.f32 %v8975_v57, %v3480_v9  ;;  %10952 = vmatpush3.bf16.msra.mxu1 %v10949_v55 }
 0xfe1   : > { %10954 = vmatprep.subr.bf16.mxu1 %v10953_v8 }
 0xfe2   : > { %10145 = vmatprep.mubr.msk.f32.mxu1 %vm844_vm0, %v3488_v6 }
 0xfe3   : > { %10146 = vmatmul.mubr.msk.f32.gmra.mrb[46].mxu1 %vm844_vm0, %v3489_v11 }
 0xfe4   : > { %10956 = vmatpush3.bf16.msra.mxu1 %v10953_v8 }
 0xfe5   : > { %10958 = vmatprep.subr.bf16.mxu1 %v10957_v27 }
 0xfe8   : > { %10960 = vmatpush3.bf16.msra.mxu1 %v10957_v27 }
 0xfe9   : > { %10962 = vmatprep.subr.bf16.mxu1 %v10961_v34 }
 0xfec   : > { %10964 = vmatpush3.bf16.msra.mxu1 %v10961_v34 }
 0xfed   : > { %10966 = vmatprep.subr.bf16.mxu1 %v10965_v14 }
 0xff0   : > { %10968 = vmatpush3.bf16.msra.mxu1 %v10965_v14 }
 0xff1   : > { %10970 = vmatprep.subr.bf16.mxu1 %v10969_v16 }
 0xff4   : > { %10972 = vmatpush3.bf16.msra.mxu1 %v10969_v16 }
 0xff5   : > { %10974 = vmatprep.subr.bf16.mxu1 %v10973_v21 }
 0xff8   : > { %10976 = vmatpush3.bf16.msra.mxu1 %v10973_v21 }
 0xff9   : > { %10978 = vmatprep.subr.bf16.mxu1 %v10977_v25 }
 0xffc   : > { %10980 = vmatpush3.bf16.msra.mxu1 %v10977_v25 }
0x10b2   : > { %v10144_v29 = vpop.f32.mrb[44].mxu1 }
0x10b3   : > { %v3583_v32 = vadd.f32 %v10144_v29, %v8976_v26  ;;  %v3577_v33 = vpop.f32.mrb[45].mxu1 }
0x10b4   : > { %v3578_v54 = vadd.f32 %v8976_v26, %v3577_v33 }
0x10b5   : > { %v3601_v53 = vmul.f32 0.044715, %v3583_v32  ;;  %v3597_v4 = vmul.f32 0.5, %v3583_v32 }
0x10b6   : > { %v3600_v56 = vmul.f32 0.044715, %v3578_v54  ;;  %v10147_v55 = vpop.f32.mrb[46].mxu1  ;;  %v3596_v2 = vmul.f32 0.5, %v3578_v54 }
0x10b7   : > { %v3605_v35 = vmul.f32 %v3601_v53, %v3583_v32  ;;  %v3593_v36 = vadd.f32 %v10147_v55, %v8976_v26  ;;  %v3587_v38 = vpop.f32.mrb[47].mxu1 }
0x10b8   : > { %v3604_v39 = vmul.f32 %v3600_v56, %v3578_v54  ;;  %v3588_v40 = vadd.f32 %v8976_v26, %v3587_v38 }
0x10b9   : > { %v3609_v41 = vmul.f32 %v3605_v35, %v3583_v32  ;;  %v3603_v42 = vmul.f32 0.044715, %v3593_v36  ;;  %v3599_v10 = vmul.f32 0.5, %v3593_v36 }
0x10ba   : > { %v3602_v43 = vmul.f32 0.044715, %v3588_v40  ;;  %v3608_v44 = vmul.f32 %v3604_v39, %v3578_v54  ;;  %v3598_v8 = vmul.f32 0.5, %v3588_v40 }
0x10bb   : > { %v3613_v45 = vadd.f32 %v3609_v41, %v3583_v32  ;;  %v3607_v46 = vmul.f32 %v3603_v42, %v3593_v36 }
0x10bc   : > { %v3606_v47 = vmul.f32 %v3602_v43, %v3588_v40  ;;  %v3612_v48 = vadd.f32 %v3608_v44, %v3578_v54 }
0x10bd   : > { %v3617_v49 = vmul.f32 0.7978846, %v3613_v45  ;;  %v3611_v50 = vmul.f32 %v3607_v46, %v3593_v36 }
0x10be   : > { %v3616_v51 = vmul.f32 0.7978846, %v3612_v48  ;;  %v3610_v52 = vmul.f32 %v3606_v47, %v3588_v40  ;;  %v8984_v47 = vld [vmem:[%s13478_s27 + $0x80] sm:$0xff]  ;;  %v8985_v48 = vld [vmem:[%s13478_s27 + $0x88] sm:$0xff] }
0x10bf   : > { %11503 = vtanh.f32 %v3617_v49  ;;  %v3615_v57 = vadd.f32 %v3611_v50, %v3593_v36  ;;  %v10981_v49 = vpack.c.bf16 %v8985_v48, %v8984_v47  ;;  %v8986_v50 = vld [vmem:[%s13478_s27 + $0x90] sm:$0xff]  ;;  %v9030_v47 = vld [vmem:[%s13479_s29 + $0xa8] sm:$0xff] }
0x10c0   : > { %11505 = vtanh.f32 %v3616_v51  ;;  %v3614_v58 = vadd.f32 %v3610_v52, %v3588_v40  ;;  %v8987_v51 = vld [vmem:[%s13478_s27 + $0x98] sm:$0xff] }
0x10c1   : > { %v3619_v59 = vmul.f32 0.7978846, %v3615_v57  ;;  %10982 = vmatprep.subr.bf16.mxu0 %v10981_v49  ;;  %v10985_v52 = vpack.c.bf16 %v8987_v51, %v8986_v50  ;;  %v8992_v57 = vld [vmem:[%s13479_s29 + $0x80] sm:$0xff] }
0x10c2   : > { %v3618_v60 = vmul.f32 0.7978846, %v3614_v58  ;;  %10984 = vmatpush3.bf16.msra.mxu0 %v10981_v49  ;;  %v8993_v58 = vld [vmem:[%s13479_s29 + $0x88] sm:$0xff] }
0x10c3   : > { %11507 = vtanh.f32 %v3619_v59  ;;  %10986 = vmatprep.subr.bf16.mxu0 %v10985_v52  ;;  %v10989_v59 = vpack.c.bf16 %v8993_v58, %v8992_v57 }
0x10c4   : > { %11509 = vtanh.f32 %v3618_v60 }
0x10c6   : > { %10988 = vmatpush3.bf16.msra.mxu0 %v10985_v52 }
0x10c7   : > { %10990 = vmatprep.subr.bf16.mxu0 %v10989_v59 }
0x10c9   : > { %v11504_v61 = vpop.eup %11503 }
0x10ca   : > { %v11506_v0 = vpop.eup %11505  ;;  %v3625_v1 = vadd.f32 1.0, %v11504_v61 }
0x10cb   : > { %v3624_v3 = vadd.f32 1.0, %v11506_v0 }
0x10cc   : > { %v3629_v18 = vmul.f32 %v3625_v1, %v3597_v4 }
0x10cd   : > { %v11508_v9 = vpop.eup %11507  ;;  %v3628_v6 = vmul.f32 %v3624_v3, %v3596_v2 }
0x10ce   : > { %v11510_v11 = vpop.eup %11509  ;;  %v3627_v20 = vadd.f32 1.0, %v11508_v9 }
0x10cf   : > { %10180 = vmatprep.mubr.f32.mxu1 %v3628_v6  ;;  %v3626_v23 = vadd.f32 1.0, %v11510_v11 }
0x10d0   : > { %10181 = vmatmul.mubr.f32.vlgmr.msra.gmra.mrb[48].mxu1 %v3629_v18  ;;  %v3631_v12 = vmul.f32 %v3627_v20, %v3599_v10 }
0x10d1   : > { %v3630_v27 = vmul.f32 %v3626_v23, %v3598_v8  ;;  %v8982_v23 = vld [vmem:[%s13481_s26 + $0x1] ss:$0 sm:$0xff] }
0x10d3   : > { %10183 = vmatprep.mubr.f32.mxu1 %v3630_v27 }
0x10d4   : > { %10184 = vmatmul.mubr.f32.gmra.mrb[50].mxu1 %v3631_v12 }
0x11a3   : > { %v10182_v34 = vpop.f32.mrb[48].mxu1 }
0x11a4   : > { %v3725_v13 = vadd.f32 %v10182_v34, %v8981_v31  ;;  %v3719_v30 = vpop.f32.mrb[49].mxu1 }
0x11a5   : > { %v3720_v14 = vadd.f32 %v8981_v31, %v3719_v30 }
0x11a6   : > { %v12458_v37 = vadd.f32 %v3725_v13, %v12355_v62 }
0x11a7   : > { %v12461_v15 = vadd.f32 %v3720_v14, %v12357_v63  ;;  %v10185_v16 = vpop.f32.mrb[50].mxu1  ;;  %v8994_v14 = vld [vmem:[%s13479_s29 + $0x90] sm:$0xff] }
0x11a8   : > { %v3735_v17 = vadd.f32 %v10185_v16, %v8981_v31  ;;  %v3729_v19 = vpop.f32.mrb[51].mxu1  ;;  %v3747_v21 = vsel %vm844_vm0, %v12458_v37, 0.0  ;;  %v8995_v16 = vld [vmem:[%s13479_s29 + $0x98] sm:$0xff] }
0x11a9   : > { %v3730_v22 = vadd.f32 %v8981_v31, %v3729_v19  ;;  %3748 = vadd.xlane.f32.xlu1 %v3747_v21  ;;  %v3744_v24 = vsel %vm844_vm0, %v12461_v15, 0.0  ;;  %v8983_v31 = vld [vmem:[%s13483_s28 + $0x1] ss:$0 sm:$0xff] }
0x11aa   : > { %v12468_v25 = vadd.f32 %v3735_v17, %v12365_v5  ;;  %3745 = vadd.xlane.f32.xlu0 %v3744_v24 }
0x11ab   : > { %v12471_v62 = vadd.f32 %v3730_v22, %v12367_v7 }
0x11ac   : > { %v3753_v63 = vsel %vm844_vm0, %v12468_v25, 0.0 }
0x11ad   : > { %3754 = vadd.xlane.f32.xlu1 %v3753_v63  ;;  %v3750_v26 = vsel %vm844_vm0, %v12471_v62, 0.0 }
0x11ae   : > { %3751 = vadd.xlane.f32.xlu0 %v3750_v26  ;;  %v10993_v26 = vpack.c.bf16 %v8995_v16, %v8994_v14 }
0x1236   : > { %v3749_v29 = vpop.xlane.xlu1 %3748 }
0x1237   : > { %v3757_v32 = vmul.f32 0.03125, %v3749_v29  ;;  %v3746_v33 = vpop.xlane.xlu0 %3745 }
0x1238   : > { %v3756_v54 = vmul.f32 0.03125, %v3746_v33  ;;  %v9001_v33 = vld [vmem:[%s13480_s2 + $0x88] sm:$0xff] }
0x1239   : > { %v3761_v53 = vsub.f32 %v12458_v37, %v3757_v32  ;;  %v9000_v32 = vld [vmem:[%s13480_s2 + $0x80] sm:$0xff] }
0x123a   : > { %v3760_v5 = vsub.f32 %v12461_v15, %v3756_v54  ;;  %v3755_v56 = vpop.xlane.xlu1 %3754 }
0x123b   : > { %v3759_v55 = vmul.f32 0.03125, %v3755_v56  ;;  %v3752_v7 = vpop.xlane.xlu0 %3751  ;;  %v3765_v35 = vmul.f32 %v3761_v53, %v3761_v53  ;;  %v9002_v56 = vld [vmem:[%s13480_s2 + $0x90] sm:$0xff] }
0x123c   : > { %v3758_v36 = vmul.f32 0.03125, %v3752_v7  ;;  %v3764_v38 = vmul.f32 %v3760_v5, %v3760_v5 }
0x123d   : > { %v3763_v39 = vsub.f32 %v12468_v25, %v3759_v55  ;;  %v3771_v40 = vsel %vm844_vm0, %v3765_v35, 0.0  ;;  %v9003_v55 = vld [vmem:[%s13480_s2 + $0x98] sm:$0xff] }
0x123e   : > { %v3762_v41 = vsub.f32 %v12471_v62, %v3758_v36  ;;  %3772 = vadd.xlane.f32.xlu1 %v3771_v40  ;;  %v3768_v42 = vsel %vm844_vm0, %v3764_v38, 0.0  ;;  %v11001_v7 = vpack.c.bf16 %v9003_v55, %v9002_v56 }
0x123f   : > { %3769 = vadd.xlane.f32.xlu0 %v3768_v42  ;;  %v3767_v43 = vmul.f32 %v3763_v39, %v3763_v39 }
0x1240   : > { %v3766_v44 = vmul.f32 %v3762_v41, %v3762_v41 }
0x1241   : > { %v3777_v45 = vsel %vm844_vm0, %v3767_v43, 0.0 }
0x1242   : > { %3778 = vadd.xlane.f32.xlu1 %v3777_v45  ;;  %v3774_v46 = vsel %vm844_vm0, %v3766_v44, 0.0 }
0x1243   : > { %3775 = vadd.xlane.f32.xlu0 %v3774_v46  ;;  %v9029_v46 = vld [vmem:[%s13479_s29 + $0xa0] sm:$0xff] }
0x1244   : > { %v11033_v51 = vpack.c.bf16 %v9030_v47, %v9029_v46  ;;  %v9024_v46 = vld [vmem:[%s13478_s27 + $0xb8] sm:$0xff] }
0x12cb   : > { %v3773_v60 = vpop.xlane.xlu1 %3772 }
0x12cc   : > { %v3781_v61 = vmul.f32 0.03125, %v3773_v60  ;;  %v3770_v0 = vpop.xlane.xlu0 %3769  ;;  %v9032_v60 = vld [vmem:[%s13479_s29 + $0xb8] sm:$0xff] }
0x12cd   : > { %v3780_v1 = vmul.f32 0.03125, %v3770_v0 }
0x12ce   : > { %v3785_v2 = vadd.f32 1e-05, %v3781_v61 }
0x12cf   : > { %v3784_v3 = vadd.f32 1e-05, %v3780_v1  ;;  %v3779_v4 = vpop.xlane.xlu1 %3778 }
0x12d0   : > { %11511 = vrsqrt.f32 %v3785_v2  ;;  %v3783_v9 = vmul.f32 0.03125, %v3779_v4  ;;  %v3776_v6 = vpop.xlane.xlu0 %3775 }
0x12d1   : > { %11513 = vrsqrt.f32 %v3784_v3  ;;  %v3782_v11 = vmul.f32 0.03125, %v3776_v6 }
0x12d2   : > { %v3787_v18 = vadd.f32 1e-05, %v3783_v9 }
0x12d3   : > { %v3786_v20 = vadd.f32 1e-05, %v3782_v11 }
0x12d4   : > { %11515 = vrsqrt.f32 %v3787_v18 }
0x12d5   : > { %11517 = vrsqrt.f32 %v3786_v20 }
0x12da   : > { %v11512_v8 = vpop.eup %11511 }
0x12db   : > { %v11514_v10 = vpop.eup %11513  ;;  %v3793_v27 = vmul.f32 %v11512_v8, %v3761_v53 }
0x12dc   : > { %v3792_v12 = vmul.f32 %v11514_v10, %v3760_v5  ;;  %v10997_v5 = vpack.c.bf16 %v9001_v33, %v9000_v32 }
0x12dd   : > { %v3801_v34 = vmul.f32 %v8982_v23, %v3793_v27 }
0x12de   : > { %v11516_v13 = vpop.eup %11515  ;;  %v3800_v30 = vmul.f32 %v8982_v23, %v3792_v12 }
0x12df   : > { %v11518_v17 = vpop.eup %11517  ;;  %v3795_v19 = vmul.f32 %v11516_v13, %v3763_v39  ;;  %v12517_v24 = vadd.f32 %v8983_v31, %v3801_v34 }
0x12e0   : > { %v12515_v21 = vadd.f32 %v8983_v31, %v3800_v30  ;;  %v3794_v22 = vmul.f32 %v11518_v17, %v3762_v41 }
0x12e1   : > { %v3803_v63 = vmul.f32 %v8982_v23, %v3795_v19 }
0x12e2   : > { %v3802_v29 = vmul.f32 %v8982_v23, %v3794_v22  ;;  %10194 = vmatprep.mubr.msk.f32.mxu0 %vm844_vm0, %v12515_v21 }
0x12e3   : > { %10195 = vmatmul.mubr.msk.f32.vlgmr.msra.gmra.mrb[40].mxu0 %vm844_vm0, %v12517_v24  ;;  %v12531_v53 = vadd.f32 %v8983_v31, %v3803_v63 }
0x12e4   : > { %v12529_v54 = vadd.f32 %v8983_v31, %v3802_v29  ;;  %10992 = vmatpush3.bf16.msra.mxu0 %v10989_v59  ;;  %v9031_v59 = vld [vmem:[%s13479_s29 + $0xb0] sm:$0xff] }
0x12e5   : > { %10994 = vmatprep.subr.bf16.mxu0 %v10993_v26  ;;  %v11037_v61 = vpack.c.bf16 %v9032_v60, %v9031_v59 }
0x12e6   : > { %10197 = vmatprep.mubr.msk.f32.mxu0 %vm844_vm0, %v12529_v54 }
0x12e7   : > { %10198 = vmatmul.mubr.msk.f32.gmra.mrb[42].mxu0 %vm844_vm0, %v12531_v53 }
0x12e8   : > { %10996 = vmatpush3.bf16.msra.mxu0 %v10993_v26  ;;  %10208 = vmatprep.mubr.msk.f32.mxu0 %vm844_vm0, %v12515_v21 }
0x12e9   : > { %10998 = vmatprep.subr.bf16.mxu0 %v10997_v5 }
0x12eb   : > { %10209 = vmatmul.mubr.msk.f32.vlgmr.msra.gmra.mrb[44].mxu0 %vm844_vm0, %v12517_v24 }
0x12ec   : > { %10211 = vmatprep.mubr.msk.f32.mxu0 %vm844_vm0, %v12529_v54  ;;  %11000 = vmatpush3.bf16.msra.mxu0 %v10997_v5 }
0x12ed   : > { %11002 = vmatprep.subr.bf16.mxu0 %v11001_v7 }
0x12ef   : > { %10212 = vmatmul.mubr.msk.f32.gmra.mrb[46].mxu0 %vm844_vm0, %v12531_v53 }
0x12f0   : > { %11004 = vmatpush3.bf16.msra.mxu0 %v11001_v7  ;;  %10222 = vmatprep.mubr.msk.f32.mxu0 %vm844_vm0, %v12515_v21 }
0x12f3   : > { %10223 = vmatmul.mubr.msk.f32.vlgmr.msra.gmra.mrb[48].mxu0 %vm844_vm0, %v12517_v24 }
0x12f4   : > { %10225 = vmatprep.mubr.msk.f32.mxu0 %vm844_vm0, %v12529_v54 }
0x12f7   : > { %10226 = vmatmul.mubr.msk.f32.gmra.mrb[50].mxu0 %vm844_vm0, %v12531_v53 }
0x13b6   : > { %v10196_v35 = vpop.f32.mrb[40].mxu0 }
0x13b7   : > { %v3895_v36 = vpop.f32.mrb[41].mxu0 }
0x13b8   : > { %10236 = vmatprep.mubr.msk.f32.mxu0 %vm1193_vm1, %v3895_v36  ;;  %v9021_v36 = vld [vmem:[%s13478_s27 + $0xa0] sm:$0xff] }
0x13ba   : > { %v10199_v38 = vpop.f32.mrb[42].mxu0 }
0x13bb   : > { %v3905_v39 = vpop.f32.mrb[43].mxu0 }
0x13be   : > { %v10210_v40 = vpop.f32.mrb[44].mxu0 }
0x13bf   : > { %v3985_v41 = vpop.f32.mrb[45].mxu0 }
0x13c0   : > { %v11005_v42 = vpack.c.bf16 %v10210_v40, %v3985_v41 }
0x13c2   : > { %v10213_v43 = vpop.f32.mrb[46].mxu0  ;;  %11007 = vmatprep.subr.msk.bf16.mxu0 %vm11997_vm2, %v11005_v42 }
0x13c3   : > { %v3995_v44 = vpop.f32.mrb[47].mxu0  ;;  %11010 = vmatpush3.bf16.xpose.msk.msra.mxu0 %vm11997_vm2, %v11005_v42 }
0x13c4   : > { %v11011_v45 = vpack.c.bf16 %v10213_v43, %v3995_v44 }
0x13c6   : > { %v10224_v48 = vpop.f32.mrb[48].mxu0  ;;  %11013 = vmatprep.subr.msk.bf16.mxu0 %vm11997_vm2, %v11011_v45 }
0x13c7   : > { %v4075_v49 = vpop.f32.mrb[49].mxu0 }
0x13c8   : > { %v11017_v50 = vpack.c.bf16 %v10224_v48, %v4075_v49 }
0x13ca   : > { %v10227_v52 = vpop.f32.mrb[50].mxu0  ;;  %11018 = vmatprep.subr.bf16.mxu1 %v11017_v50 }
0x13cb   : > { %v4085_v57 = vpop.f32.mrb[51].mxu0  ;;  %11016 = vmatpush3.bf16.xpose.msk.msra.mxu0 %vm11997_vm2, %v11011_v45  ;;  %11020 = vmatpush3.bf16.msra.mxu1 %v11017_v50  ;;  %v9023_v45 = vld [vmem:[%s13478_s27 + $0xb0] sm:$0xff] }
0x13cc   : > { %v11021_v58 = vpack.c.bf16 %v10227_v52, %v4085_v57  ;;  %11034 = vmatprep.subr.bf16.mxu0 %v11033_v51  ;;  %v11029_v50 = vpack.c.bf16 %v9024_v46, %v9023_v45  ;;  %v9037_v52 = vld [vmem:[%s13480_s2 + $0xa0] sm:$0xff]  ;;  %v9038_v57 = vld [vmem:[%s13480_s2 + $0xa8] sm:$0xff] }
0x13ce   : > { %11022 = vmatprep.subr.bf16.mxu1 %v11021_v58 }
0x13cf   : > { %11024 = vmatpush3.bf16.msra.mxu1 %v11021_v58 }
0x13d2   : > { %10237 = vmatmul.mubr.msk.f32.vlgmr.msra.gmra.mrb[52].mxu0 %vm1193_vm1, %v10196_v35 }
0x13d3   : > { %10239 = vmatprep.mubr.msk.f32.mxu0 %vm1193_vm1, %v3905_v39  ;;  %11036 = vmatpush3.bf16.msra.mxu0 %v11033_v51 }
0x13d4   : > { %11038 = vmatprep.subr.bf16.mxu0 %v11037_v61 }
0x13d6   : > { %10240 = vmatmul.mubr.msk.f32.gmra.mrb[54].mxu0 %vm1193_vm1, %v10199_v38  ;;  %v9022_v38 = vld [vmem:[%s13478_s27 + $0xa8] sm:$0xff] }
0x13d7   : > { %11040 = vmatpush3.bf16.msra.mxu0 %v11037_v61  ;;  %10278 = vmatprep.mubr.msk.f32.mxu0 %vm844_vm0, %v12515_v21  ;;  %v11025_v39 = vpack.c.bf16 %v9022_v38, %v9021_v36  ;;  %v11041_v61 = vpack.c.bf16 %v9038_v57, %v9037_v52  ;;  %v9109_v57 = vld [vmem:[%s13478_s27 + $0xf0] sm:$0xff] }
0x13d9   : > { %11026 = vmatprep.subr.bf16.mxu1 %v11025_v39 }
0x13da   : > { %10279 = vmatmul.mubr.msk.f32.vlgmr.msra.gmra.mrb[56].mxu0 %vm844_vm0, %v12517_v24 }
0x13db   : > { %10281 = vmatprep.mubr.msk.f32.mxu0 %vm844_vm0, %v12529_v54 }
0x13de   : > { %10282 = vmatmul.mubr.msk.f32.gmra.mrb[58].mxu0 %vm844_vm0, %v12531_v53 }
0x14a5   : > { %v10238_v0 = vpop.f32.mrb[52].mxu0 }
0x14a6   : > { %v4184_v1 = vpop.f32.mrb[53].mxu0  ;;  %v4206_v2 = vsel %vm844_vm0, %v10238_v0, -inf }
0x14a7   : > { %4207 = vmax.xlane.f32.xlu1 %v4206_v2  ;;  %v4203_v3 = vsel %vm844_vm0, %v4184_v1, -inf }
0x14a8   : > { %4204 = vmax.xlane.f32.xlu0 %v4203_v3  ;;  %v9066_v3 = vld [vmem:[%s13478_s27 + $0xc0] sm:$0xff] }
0x14a9   : > { %v10241_v4 = vpop.f32.mrb[54].mxu0 }
0x14aa   : > { %v4194_v9 = vpop.f32.mrb[55].mxu0  ;;  %v4212_v6 = vsel %vm844_vm0, %v10241_v4, -inf }
0x14ab   : > { %4213 = vmax.xlane.f32.xlu1 %v4212_v6  ;;  %v4209_v11 = vsel %vm844_vm0, %v4194_v9, -inf }
0x14ac   : > { %4210 = vmax.xlane.f32.xlu0 %v4209_v11 }
0x14ad   : > { %v10280_v18 = vpop.f32.mrb[56].mxu0 }
0x14ae   : > { %v4507_v20 = vpop.f32.mrb[57].mxu0 }
0x14af   : > { %v11049_v8 = vpack.c.bf16 %v10280_v18, %v4507_v20 }
0x14b1   : > { %v10283_v23 = vpop.f32.mrb[58].mxu0  ;;  %11051 = vmatprep.subr.msk.bf16.mxu0 %vm11997_vm2, %v11049_v8 }
0x14b2   : > { %v4517_v10 = vpop.f32.mrb[59].mxu0  ;;  %11054 = vmatpush3.bf16.xpose.msk.msra.mxu0 %vm11997_vm2, %v11049_v8  ;;  %v9068_v8 = vld [vmem:[%s13478_s27 + $0xd0] sm:$0xff] }
0x14b3   : > { %v11055_v27 = vpack.c.bf16 %v10283_v23, %v4517_v10  ;;  %v9069_v23 = vld [vmem:[%s13478_s27 + $0xd8] sm:$0xff] }
0x14b5   : > { %11057 = vmatprep.subr.msk.bf16.mxu0 %vm11997_vm2, %v11055_v27 }
0x14ba   : > { %11060 = vmatpush3.bf16.xpose.msk.msra.mxu0 %vm11997_vm2, %v11055_v27 }
0x1534   : > { %v4208_v12 = vpop.xlane.xlu1 %4207 }
0x1535   : > { %v4216_v31 = vsub.f32 %v10238_v0, %v4208_v12  ;;  %v4205_v34 = vpop.xlane.xlu0 %4204  ;;  %v9039_v0 = vld [vmem:[%s13480_s2 + $0xb0] sm:$0xff]  ;;  %v11073_v12 = vpack.c.bf16 %v9069_v23, %v9068_v8 }
0x1536   : > { %v4215_v13 = vsub.f32 %v4184_v1, %v4205_v34  ;;  %v9040_v1 = vld [vmem:[%s13480_s2 + $0xb8] sm:$0xff]  ;;  %v9075_v34 = vld [vmem:[%s13479_s29 + $0xc8] sm:$0xff] }
0x1537   : > { %v4221_v30 = vmul.f32 1.442695, %v4216_v31  ;;  %v11045_v2 = vpack.c.bf16 %v9040_v1, %v9039_v0  ;;  %v9074_v31 = vld [vmem:[%s13479_s29 + $0xc0] sm:$0xff]  ;;  %v9125_v1 = vld [vmem:[%s13480_s2 + $0xf0] sm:$0xff] }
0x1538   : > { %v4219_v14 = vmul.f32 1.442695, %v4215_v13  ;;  %v4214_v16 = vpop.xlane.xlu1 %4213 }
0x1539   : > { %11519 = vpow2.f32 %v4221_v30  ;;  %v4218_v17 = vsub.f32 %v10241_v4, %v4214_v16  ;;  %v4211_v19 = vpop.xlane.xlu0 %4210  ;;  %v9067_v4 = vld [vmem:[%s13478_s27 + $0xc8] sm:$0xff]  ;;  %v9076_v16 = vld [vmem:[%s13479_s29 + $0xd0] sm:$0xff] }
0x153a   : > { %11521 = vpow2.f32 %v4219_v14  ;;  %v4217_v22 = vsub.f32 %v4194_v9, %v4211_v19  ;;  %v11069_v9 = vpack.c.bf16 %v9067_v4, %v9066_v3  ;;  %v11077_v14 = vpack.c.bf16 %v9075_v34, %v9074_v31 }
0x153b   : > { %v4225_v63 = vmul.f32 1.442695, %v4218_v17  ;;  %v9077_v17 = vld [vmem:[%s13479_s29 + $0xd8] sm:$0xff] }
0x153c   : > { %v4223_v26 = vmul.f32 1.442695, %v4217_v22  ;;  %11070 = vmatprep.subr.bf16.mxu0 %v11069_v9 }
0x153d   : > { %11523 = vpow2.f32 %v4225_v63 }
0x153e   : > { %11525 = vpow2.f32 %v4223_v26  ;;  %v11081_v26 = vpack.c.bf16 %v9077_v17, %v9076_v16 }
0x1543   : > { %v11520_v29 = vpop.eup %11519 }
0x1544   : > { %v11522_v32 = vpop.eup %11521  ;;  %v4230_v33 = vsel %vm844_vm0, %v11520_v29, 0.0 }
0x1545   : > { %4231 = vadd.xlane.f32.xlu1 %v4230_v33  ;;  %v4227_v5 = vsel %vm844_vm0, %v11522_v32, 0.0 }
0x1546   : > { %4228 = vadd.xlane.f32.xlu0 %v4227_v5 }
0x1547   : > { %v11524_v56 = vpop.eup %11523 }
0x1548   : > { %v11526_v55 = vpop.eup %11525  ;;  %v4236_v7 = vsel %vm844_vm0, %v11524_v56, 0.0 }
0x1549   : > { %4237 = vadd.xlane.f32.xlu1 %v4236_v7  ;;  %v4233_v35 = vsel %vm844_vm0, %v11526_v55, 0.0 }
0x154a   : > { %4234 = vadd.xlane.f32.xlu0 %v4233_v35 }
0x15d2   : > { %v4232_v40 = vpop.xlane.xlu1 %4231 }
0x15d3   : > { %11527 = vrcp.f32 %v4232_v40  ;;  %v4229_v41 = vpop.xlane.xlu0 %4228 }
0x15d4   : > { %11529 = vrcp.f32 %v4229_v41 }
0x15d6   : > { %v4238_v42 = vpop.xlane.xlu1 %4237 }
0x15d7   : > { %11531 = vrcp.f32 %v4238_v42  ;;  %v4235_v43 = vpop.xlane.xlu0 %4234 }
0x15d8   : > { %11533 = vrcp.f32 %v4235_v43 }
0x15dd   : > { %v11528_v44 = vpop.eup %11527 }
0x15de   : > { %v11530_v47 = vpop.eup %11529  ;;  %v4244_v49 = vmul.f32 %v11528_v44, %v11520_v29 }
0x15df   : > { %v4243_v48 = vmul.f32 %v11530_v47, %v11522_v32 }
0x15e1   : > { %v11532_v51 = vpop.eup %11531  ;;  %10250 = vmatprep.mubr.msk.f32.mxu1 %vm844_vm0, %v4243_v48 }
0x15e2   : > { %v11534_v58 = vpop.eup %11533  ;;  %10251 = vmatmul.mubr.msk.f32.vlgmr.msra.gmra.mrb[52].mxu1 %vm844_vm0, %v4244_v49  ;;  %v4246_v60 = vmul.f32 %v11532_v51, %v11524_v56  ;;  %v9108_v51 = vld [vmem:[%s13478_s27 + $0xe8] sm:$0xff] }
0x15e3   : > { %11028 = vmatpush3.bf16.msra.mxu1 %v11025_v39  ;;  %v4245_v59 = vmul.f32 %v11534_v58, %v11526_v55  ;;  %v9110_v58 = vld [vmem:[%s13478_s27 + $0xf8] sm:$0xff] }
0x15e4   : > { %11030 = vmatprep.subr.bf16.mxu1 %v11029_v50 }
0x15e5   : > { %10253 = vmatprep.mubr.msk.f32.mxu1 %vm844_vm0, %v4245_v59  ;;  %v11117_v59 = vpack.c.bf16 %v9110_v58, %v9109_v57 }
0x15e6   : > { %10254 = vmatmul.mubr.msk.f32.gmra.mrb[54].mxu1 %vm844_vm0, %v4246_v60  ;;  %v9123_v60 = vld [vmem:[%s13480_s2 + $0xe0] sm:$0xff] }
0x15e7   : > { %11032 = vmatpush3.bf16.msra.mxu1 %v11029_v50  ;;  %10264 = vmatprep.mubr.msk.f32.mxu1 %vm844_vm0, %v12515_v21  ;;  %v9107_v50 = vld [vmem:[%s13478_s27 + $0xe0] sm:$0xff] }
0x15e8   : > { %11042 = vmatprep.subr.bf16.mxu1 %v11041_v61  ;;  %v11113_v52 = vpack.c.bf16 %v9108_v51, %v9107_v50 }
0x15ea   : > { %10265 = vmatmul.mubr.msk.f32.vlgmr.msra.gmra.mrb[56].mxu1 %vm844_vm0, %v12517_v24 }
0x15eb   : > { %10267 = vmatprep.mubr.msk.f32.mxu1 %vm844_vm0, %v12529_v54  ;;  %11044 = vmatpush3.bf16.msra.mxu1 %v11041_v61  ;;  %v9124_v61 = vld [vmem:[%s13480_s2 + $0xe8] sm:$0xff] }
0x15ec   : > { %11046 = vmatprep.subr.bf16.mxu1 %v11045_v2  ;;  %v11129_v0 = vpack.c.bf16 %v9124_v61, %v9123_v60 }
0x15ee   : > { %10268 = vmatmul.mubr.msk.f32.gmra.mrb[58].mxu1 %vm844_vm0, %v12531_v53 }
0x15ef   : > { %11048 = vmatpush3.bf16.msra.mxu1 %v11045_v2  ;;  %10292 = vmatprep.mubr.msk.f32.mxu1 %vm844_vm0, %v12515_v21  ;;  %v9126_v2 = vld [vmem:[%s13480_s2 + $0xf8] sm:$0xff] }
0x15f0   : > { %v11133_v3 = vpack.c.bf16 %v9126_v2, %v9125_v1 }
0x15f2   : > { %10293 = vmatmul.mubr.msk.f32.vlgmr.msra.gmra.mrb[60].mxu1 %vm844_vm0, %v12517_v24 }
0x15f3   : > { %10295 = vmatprep.mubr.msk.f32.mxu1 %vm844_vm0, %v12529_v54 }
0x15f6   : > { %10296 = vmatmul.mubr.msk.f32.gmra.mrb[62].mxu1 %vm844_vm0, %v12531_v53 }
0x16b5   : > { %v12657_v6 = vpop.f32.mrb[52].mxu1 }
0x16b6   : > { %v12659_v11 = vpop.f32.mrb[53].mxu1 }
0x16b9   : > { %v12661_v18 = vpop.f32.mrb[54].mxu1 }
0x16ba   : > { %v12663_v20 = vpop.f32.mrb[55].mxu1 }
0x16bd   : > { %v10266_v10 = vpop.f32.mrb[56].mxu1 }
0x16be   : > { %v4417_v27 = vpop.f32.mrb[57].mxu1 }
0x16bf   : > { %10306 = vmatprep.mubr.msk.f32.mxu0 %vm1193_vm1, %v4417_v27 }
0x16c0   : > { %10307 = vmatmul.mubr.msk.f32.vlgmr.msra.gmra.mrb[60].mxu0 %vm1193_vm1, %v10266_v10 }
0x16c1   : > { %v10269_v13 = vpop.f32.mrb[58].mxu1  ;;  %11072 = vmatpush3.bf16.msra.mxu0 %v11069_v9 }
0x16c2   : > { %v4427_v30 = vpop.f32.mrb[59].mxu1  ;;  %11074 = vmatprep.subr.bf16.mxu0 %v11073_v12 }
0x16c3   : > { %10309 = vmatprep.mubr.msk.f32.mxu0 %vm1193_vm1, %v4427_v30 }
0x16c4   : > { %10310 = vmatmul.mubr.msk.f32.gmra.mrb[62].mxu0 %vm1193_vm1, %v10269_v13 }
0x16c5   : > { %v10294_v19 = vpop.f32.mrb[60].mxu1  ;;  %11076 = vmatpush3.bf16.msra.mxu0 %v11073_v12  ;;  %10350 = vmatprep.mubr.msk.f32.mxu0 %vm844_vm0, %v12515_v21 }
0x16c6   : > { %v4597_v22 = vpop.f32.mrb[61].mxu1  ;;  %11078 = vmatprep.subr.bf16.mxu0 %v11077_v14 }
0x16c7   : > { %v11061_v63 = vpack.c.bf16 %v10294_v19, %v4597_v22 }
0x16c8   : > { %10351 = vmatmul.mubr.msk.f32.vlgmr.msra.gmra.mrb[64].mxu0 %vm844_vm0, %v12517_v24 }
0x16c9   : > { %v10297_v29 = vpop.f32.mrb[62].mxu1  ;;  %11062 = vmatprep.subr.bf16.mxu1 %v11061_v63  ;;  %10353 = vmatprep.mubr.msk.f32.mxu0 %vm844_vm0, %v12529_v54 }
0x16ca   : > { %11080 = vmatpush3.bf16.msra.mxu0 %v11077_v14  ;;  %v4607_v32 = vpop.f32.mrb[63].mxu1  ;;  %11064 = vmatpush3.bf16.msra.mxu1 %v11061_v63 }
0x16cb   : > { %v11065_v33 = vpack.c.bf16 %v10297_v29, %v4607_v32  ;;  %11082 = vmatprep.subr.bf16.mxu0 %v11081_v26 }
0x16cc   : > { %10354 = vmatmul.mubr.msk.f32.gmra.mrb[66].mxu0 %vm844_vm0, %v12531_v53 }
0x16cd   : > { %11066 = vmatprep.subr.bf16.mxu1 %v11065_v33  ;;  %10364 = vmatprep.mubr.msk.f32.mxu0 %vm844_vm0, %v12515_v21 }
0x16ce   : > { %11084 = vmatpush3.bf16.msra.mxu0 %v11081_v26  ;;  %11068 = vmatpush3.bf16.msra.mxu1 %v11065_v33 }
0x16d1   : > { %10365 = vmatmul.mubr.msk.f32.vlgmr.msra.gmra.mrb[68].mxu0 %vm844_vm0, %v12517_v24 }
0x16d2   : > { %10367 = vmatprep.mubr.msk.f32.mxu0 %vm844_vm0, %v12529_v54 }
0x16d5   : > { %10368 = vmatmul.mubr.msk.f32.gmra.mrb[70].mxu0 %vm844_vm0, %v12531_v53 }
0x1793   : > { %v10308_v5 = vpop.f32.mrb[60].mxu0 }
0x1794   : > { %v4706_v56 = vpop.f32.mrb[61].mxu0  ;;  %v4728_v55 = vsel %vm844_vm0, %v10308_v5, -inf }
0x1795   : > { %4729 = vmax.xlane.f32.xlu1 %v4728_v55  ;;  %v4725_v7 = vsel %vm844_vm0, %v4706_v56, -inf }
0x1796   : > { %4726 = vmax.xlane.f32.xlu0 %v4725_v7 }
0x1797   : > { %v12705_v35 = vpop.f32.mrb[62].mxu0 }
0x1798   : > { %v12707_v36 = vpop.f32.mrb[63].mxu0  ;;  %v4734_v38 = vsel %vm844_vm0, %v12705_v35, -inf }
0x1799   : > { %4735 = vmax.xlane.f32.xlu1 %v4734_v38  ;;  %v4731_v39 = vsel %vm844_vm0, %v12707_v36, -inf }
0x179a   : > { %4732 = vmax.xlane.f32.xlu0 %v4731_v39 }
0x179b   : > { %v10352_v40 = vpop.f32.mrb[64].mxu0 }
0x179c   : > { %v5133_v41 = vpop.f32.mrb[65].mxu0 }
0x179d   : > { %10392 = vmatprep.mubr.msk.f32.mxu0 %vm1193_vm1, %v5133_v41 }
0x179f   : > { %v10355_v42 = vpop.f32.mrb[66].mxu0 }
0x17a0   : > { %v5143_v43 = vpop.f32.mrb[67].mxu0 }
0x17a4   : > { %v10366_v44 = vpop.f32.mrb[68].mxu0 }
0x17a5   : > { %v5223_v45 = vpop.f32.mrb[69].mxu0 }
0x17a6   : > { %v11093_v46 = vpack.c.bf16 %v10366_v44, %v5223_v45 }
0x17a8   : > { %v10369_v47 = vpop.f32.mrb[70].mxu0  ;;  %11095 = vmatprep.subr.msk.bf16.mxu0 %vm11997_vm2, %v11093_v46 }
0x17a9   : > { %v5233_v48 = vpop.f32.mrb[71].mxu0  ;;  %11098 = vmatpush3.bf16.xpose.msk.msra.mxu0 %vm11997_vm2, %v11093_v46 }
0x17aa   : > { %v11099_v49 = vpack.c.bf16 %v10369_v47, %v5233_v48 }
0x17ac   : > { %11101 = vmatprep.subr.msk.bf16.mxu0 %vm11997_vm2, %v11099_v49 }
0x17b1   : > { %11104 = vmatpush3.bf16.xpose.msk.msra.mxu0 %vm11997_vm2, %v11099_v49  ;;  %v9057_v49 = vld [vmem:[%s13487_s6 + $0x28] sm:$0xff] }
0x17b2   : > { %11114 = vmatprep.subr.bf16.mxu0 %v11113_v52  ;;  %10326 = vmatprep.subr.mxu1 %v9057_v49 }
0x17b8   : > { %10393 = vmatmul.mubr.msk.f32.vlgmr.msra.gmra.mrb[72].mxu0 %vm1193_vm1, %v10352_v40 }
0x17b9   : > { %10395 = vmatprep.mubr.msk.f32.mxu0 %vm1193_vm1, %v5143_v43  ;;  %11116 = vmatpush3.bf16.msra.mxu0 %v11113_v52 }
0x17ba   : > { %11118 = vmatprep.subr.bf16.mxu0 %v11117_v59 }
0x17bc   : > { %10396 = vmatmul.mubr.msk.f32.gmra.mrb[74].mxu0 %vm1193_vm1, %v10355_v42 }
0x17bd   : > { %11120 = vmatpush3.bf16.msra.mxu0 %v11117_v59  ;;  %10428 = vmatprep.mubr.msk.f32.mxu0 %vm844_vm0, %v12515_v21 }
0x17be   : > { %11130 = vmatprep.subr.bf16.mxu0 %v11129_v0 }
0x17c0   : > { %10429 = vmatmul.mubr.msk.f32.vlgmr.msra.gmra.mrb[76].mxu0 %vm844_vm0, %v12517_v24 }
0x17c1   : > { %10431 = vmatprep.mubr.msk.f32.mxu0 %vm844_vm0, %v12529_v54  ;;  %11132 = vmatpush3.bf16.msra.mxu0 %v11129_v0 }
0x17c2   : > { %11134 = vmatprep.subr.bf16.mxu0 %v11133_v3 }
0x17c4   : > { %10432 = vmatmul.mubr.msk.f32.gmra.mrb[78].mxu0 %vm844_vm0, %v12531_v53 }
0x17c5   : > { %11136 = vmatpush3.bf16.msra.mxu0 %v11133_v3  ;;  %10456 = vmatprep.mubr.msk.f32.mxu0 %vm844_vm0, %v12515_v21 }
0x17c8   : > { %10457 = vmatmul.mubr.msk.f32.vlgmr.msra.gmra.mrb[80].mxu0 %vm844_vm0, %v12517_v24 }
0x17c9   : > { %10459 = vmatprep.mubr.msk.f32.mxu0 %vm844_vm0, %v12529_v54 }
0x17cc   : > { %10460 = vmatmul.mubr.msk.f32.gmra.mrb[82].mxu0 %vm844_vm0, %v12531_v53 }
0x1822   : > { %v4730_v4 = vpop.xlane.xlu1 %4729 }
0x1823   : > { %v4738_v9 = vsub.f32 %v10308_v5, %v4730_v4  ;;  %v4727_v8 = vpop.xlane.xlu0 %4726 }
0x1824   : > { %v4737_v23 = vsub.f32 %v4706_v56, %v4727_v8 }
0x1825   : > { %v4743_v10 = vmul.f32 1.442695, %v4738_v9 }
0x1826   : > { %v4741_v27 = vmul.f32 1.442695, %v4737_v23  ;;  %v4736_v12 = vpop.xlane.xlu1 %4735 }
0x1827   : > { %11535 = vpow2.f32 %v4743_v10  ;;  %v4740_v31 = vsub.f32 %v12705_v35, %v4736_v12  ;;  %v4733_v34 = vpop.xlane.xlu0 %4732 }
0x1828   : > { %11537 = vpow2.f32 %v4741_v27  ;;  %v4739_v13 = vsub.f32 %v12707_v36, %v4733_v34 }
0x1829   : > { %v4747_v30 = vmul.f32 1.442695, %v4740_v31 }
0x182a   : > { %v4745_v14 = vmul.f32 1.442695, %v4739_v13 }
0x182b   : > { %11539 = vpow2.f32 %v4747_v30 }
0x182c   : > { %11541 = vpow2.f32 %v4745_v14 }
0x1831   : > { %v11536_v16 = vpop.eup %11535 }
0x1832   : > { %v11538_v17 = vpop.eup %11537  ;;  %v4752_v19 = vsel %vm844_vm0, %v11536_v16, 0.0 }
0x1833   : > { %4753 = vadd.xlane.f32.xlu1 %v4752_v19  ;;  %v4749_v22 = vsel %vm844_vm0, %v11538_v17, 0.0 }
0x1834   : > { %4750 = vadd.xlane.f32.xlu0 %v4749_v22 }
0x1835   : > { %v11540_v63 = vpop.eup %11539 }
0x1836   : > { %v11542_v26 = vpop.eup %11541  ;;  %v4758_v29 = vsel %vm844_vm0, %v11540_v63, 0.0 }
0x1837   : > { %4759 = vadd.xlane.f32.xlu1 %v4758_v29  ;;  %v4755_v32 = vsel %vm844_vm0, %v11542_v26, 0.0 }
0x1838   : > { %4756 = vadd.xlane.f32.xlu0 %v4755_v32 }
0x188b   : > { %v10394_v33 = vpop.f32.mrb[72].mxu0 }
0x188c   : > { %v5422_v5 = vpop.f32.mrb[73].mxu0  ;;  %v5444_v56 = vsel %vm844_vm0, %v10394_v33, -inf }
0x188d   : > { %5445 = vmax.xlane.f32.xlu1 %v5444_v56  ;;  %v5441_v55 = vsel %vm844_vm0, %v5422_v5, -inf  ;;  %v9083_v56 = vld [vmem:[%s13480_s2 + $0xc8] sm:$0xff] }
0x188e   : > { %5442 = vmax.xlane.f32.xlu0 %v5441_v55 }
0x188f   : > { %v10397_v7 = vpop.f32.mrb[74].mxu0 }
0x1890   : > { %v5432_v35 = vpop.f32.mrb[75].mxu0  ;;  %v5450_v36 = vsel %vm844_vm0, %v10397_v7, -inf }
0x1891   : > { %5451 = vmax.xlane.f32.xlu1 %v5450_v36  ;;  %v5447_v38 = vsel %vm844_vm0, %v5432_v35, -inf }
0x1892   : > { %5448 = vmax.xlane.f32.xlu0 %v5447_v38 }
0x1893   : > { %v12775_v39 = vpop.f32.mrb[76].mxu0 }
0x1894   : > { %v12777_v40 = vpop.f32.mrb[77].mxu0 }
0x1897   : > { %v12779_v41 = vpop.f32.mrb[78].mxu0 }
0x1898   : > { %v12781_v42 = vpop.f32.mrb[79].mxu0 }
0x189b   : > { %v10458_v43 = vpop.f32.mrb[80].mxu0 }
0x189c   : > { %v5936_v44 = vpop.f32.mrb[81].mxu0 }
0x189d   : > { %v11149_v45 = vpack.c.bf16 %v10458_v43, %v5936_v44  ;;  %v9084_v43 = vld [vmem:[%s13480_s2 + $0xd0] sm:$0xff]  ;;  %v9085_v44 = vld [vmem:[%s13480_s2 + $0xd8] sm:$0xff] }
0x189f   : > { %v10461_v46 = vpop.f32.mrb[82].mxu0  ;;  %11150 = vmatprep.subr.bf16.mxu0 %v11149_v45 }
0x18a0   : > { %v5946_v47 = vpop.f32.mrb[83].mxu0  ;;  %11152 = vmatpush3.bf16.msra.mxu0 %v11149_v45  ;;  %v11089_v45 = vpack.c.bf16 %v9085_v44, %v9084_v43 }
0x18a1   : > { %v11153_v48 = vpack.c.bf16 %v10461_v46, %v5946_v47 }
0x18a3   : > { %11154 = vmatprep.subr.bf16.mxu0 %v11153_v48 }
0x18a4   : > { %11156 = vmatpush3.bf16.msra.mxu0 %v11153_v48 }
0x18c0   : > { %v4754_v50 = vpop.xlane.xlu1 %4753 }
0x18c1   : > { %11543 = vrcp.f32 %v4754_v50  ;;  %v4751_v51 = vpop.xlane.xlu0 %4750 }
0x18c2   : > { %11545 = vrcp.f32 %v4751_v51 }
0x18c4   : > { %v4760_v52 = vpop.xlane.xlu1 %4759 }
0x18c5   : > { %11547 = vrcp.f32 %v4760_v52  ;;  %v4757_v57 = vpop.xlane.xlu0 %4756 }
0x18c6   : > { %11549 = vrcp.f32 %v4757_v57 }
0x18cb   : > { %v11544_v58 = vpop.eup %11543 }
0x18cc   : > { %v11546_v59 = vpop.eup %11545  ;;  %v4766_v61 = vmul.f32 %v11544_v58, %v11536_v16  ;;  %v9020_v16 = vld [vmem:[%s13487_s6 + $0x20] sm:$0xff] }
0x18cd   : > { %v4765_v60 = vmul.f32 %v11546_v59, %v11538_v17  ;;  %v9102_v59 = vld [vmem:[%s13487_s6 + $0x30] sm:$0xff] }
0x18cf   : > { %v11548_v0 = vpop.eup %11547  ;;  %10320 = vmatprep.mubr.msk.f32.mxu1 %vm844_vm0, %v4765_v60 }
0x18d0   : > { %v11550_v1 = vpop.eup %11549  ;;  %10321 = vmatmul.mubr.msk.f32.vlgmr.msra.gmra.mrb[64].mxu1 %vm844_vm0, %v4766_v61  ;;  %v4768_v3 = vmul.f32 %v11548_v0, %v11540_v63 }
0x18d1   : > { %v4767_v2 = vmul.f32 %v11550_v1, %v11542_v26  ;;  %10327 = vmatpush3.msra.mxu1 %v9057_v49 }
0x18d2   : > { %10334 = vmatprep.subr.mxu1 %v9020_v16 }
0x18d3   : > { %10323 = vmatprep.mubr.msk.f32.mxu1 %vm844_vm0, %v4767_v2 }
0x18d4   : > { %10324 = vmatmul.mubr.msk.f32.gmra.mrb[66].mxu1 %vm844_vm0, %v4768_v3  ;;  %v9115_v3 = vld [vmem:[%s13479_s29 + $0xe0] sm:$0xff] }
0x191a   : > { %v5446_v4 = vpop.xlane.xlu1 %5445 }
0x191b   : > { %v5454_v9 = vsub.f32 %v10394_v33, %v5446_v4  ;;  %v5443_v8 = vpop.xlane.xlu0 %5442  ;;  %v9116_v4 = vld [vmem:[%s13479_s29 + $0xe8] sm:$0xff] }
0x191c   : > { %v5453_v23 = vsub.f32 %v5422_v5, %v5443_v8  ;;  %v9082_v5 = vld [vmem:[%s13480_s2 + $0xc0] sm:$0xff]  ;;  %v9117_v8 = vld [vmem:[%s13479_s29 + $0xf0] sm:$0xff] }
0x191d   : > { %v5459_v10 = vmul.f32 1.442695, %v5454_v9  ;;  %v11121_v9 = vpack.c.bf16 %v9116_v4, %v9115_v3 }
0x191e   : > { %v5457_v27 = vmul.f32 1.442695, %v5453_v23  ;;  %v5452_v12 = vpop.xlane.xlu1 %5451  ;;  %v9118_v23 = vld [vmem:[%s13479_s29 + $0xf8] sm:$0xff] }
0x191f   : > { %11551 = vpow2.f32 %v5459_v10  ;;  %v5456_v31 = vsub.f32 %v10397_v7, %v5452_v12  ;;  %v5449_v34 = vpop.xlane.xlu0 %5448  ;;  %v11125_v12 = vpack.c.bf16 %v9118_v23, %v9117_v8 }
0x1920   : > { %11553 = vpow2.f32 %v5457_v27  ;;  %v5455_v13 = vsub.f32 %v5432_v35, %v5449_v34  ;;  %v11085_v35 = vpack.c.bf16 %v9083_v56, %v9082_v5 }
0x1921   : > { %v5463_v30 = vmul.f32 1.442695, %v5456_v31 }
0x1922   : > { %v5461_v14 = vmul.f32 1.442695, %v5455_v13 }
0x1923   : > { %11555 = vpow2.f32 %v5463_v30 }
0x1924   : > { %11557 = vpow2.f32 %v5461_v14 }
0x1929   : > { %v12793_v17 = vpop.eup %11551 }
0x192a   : > { %v11554_v19 = vpop.eup %11553  ;;  %v5468_v22 = vsel %vm844_vm0, %v12793_v17, 0.0 }
0x192b   : > { %5469 = vadd.xlane.f32.xlu1 %v5468_v22  ;;  %v5465_v63 = vsel %vm844_vm0, %v11554_v19, 0.0 }
0x192c   : > { %5466 = vadd.xlane.f32.xlu0 %v5465_v63 }
0x192d   : > { %v12798_v26 = vpop.eup %11555 }
0x192e   : > { %v11558_v29 = vpop.eup %11557  ;;  %v5474_v32 = vsel %vm844_vm0, %v12798_v26, 0.0 }
0x192f   : > { %5475 = vadd.xlane.f32.xlu1 %v5474_v32  ;;  %v5471_v33 = vsel %vm844_vm0, %v11558_v29, 0.0 }
0x1930   : > { %5472 = vadd.xlane.f32.xlu0 %v5471_v33 }
0x19a3   : > { %v10322_v55 = vpop.f32.mrb[64].mxu1 }
0x19a4   : > { %v4847_v7 = vpop.f32.mrb[65].mxu1 }
0x19a5   : > { %10328 = vmatprep.mubr.msk.f32.mxu1 %vm1193_vm1, %v4847_v7 }
0x19a6   : > { %10329 = vmatmul.mubr.msk.f32.vlgmr.msra.gmra.mrb[68].mxu1 %vm1193_vm1, %v10322_v55 }
0x19a7   : > { %v10325_v36 = vpop.f32.mrb[66].mxu1  ;;  %10335 = vmatpush3.msra.mxu1 %v9020_v16 }
0x19a8   : > { %v4857_v38 = vpop.f32.mrb[67].mxu1  ;;  %11086 = vmatprep.subr.bf16.mxu1 %v11085_v35 }
0x19a9   : > { %10331 = vmatprep.mubr.msk.f32.mxu1 %vm1193_vm1, %v4857_v38 }
0x19aa   : > { %10332 = vmatmul.mubr.msk.f32.gmra.mrb[70].mxu1 %vm1193_vm1, %v10325_v36 }
0x19ab   : > { %10336 = vmatprep.mubr.msk.f32.mxu1 %vm1193_vm1, %v12659_v11 }
0x19ae   : > { %10337 = vmatmul.mubr.msk.f32.vlgmr.msra.gmra.mrb[68].mxu1 %vm1193_vm1, %v12657_v6 }
0x19af   : > { %10339 = vmatprep.mubr.msk.f32.mxu1 %vm1193_vm1, %v12663_v20  ;;  %11088 = vmatpush3.bf16.msra.mxu1 %v11085_v35 }
0x19b0   : > { %11090 = vmatprep.subr.bf16.mxu1 %v11089_v45 }
0x19b2   : > { %10340 = vmatmul.mubr.msk.f32.gmra.mrb[70].mxu1 %vm1193_vm1, %v12661_v18 }
0x19b3   : > { %11092 = vmatpush3.bf16.msra.mxu1 %v11089_v45  ;;  %10378 = vmatprep.mubr.msk.f32.mxu1 %vm844_vm0, %v12515_v21 }
0x19b6   : > { %10379 = vmatmul.mubr.msk.f32.vlgmr.msra.gmra.mrb[72].mxu1 %vm844_vm0, %v12517_v24 }
0x19b7   : > { %10381 = vmatprep.mubr.msk.f32.mxu1 %vm844_vm0, %v12529_v54 }
0x19b8   : > { %v5470_v18 = vpop.xlane.xlu1 %5469 }
0x19b9   : > { %v5467_v11 = vpop.xlane.xlu0 %5466 }
0x19ba   : > { %11559 = vrcp.f32 %v5467_v11  ;;  %10382 = vmatmul.mubr.msk.f32.gmra.mrb[74].mxu1 %vm844_vm0, %v12531_v53 }
0x19bb   : > { %11561 = vrcp.f32 %v5470_v18 }
0x19bc   : > { %v5476_v47 = vpop.xlane.xlu1 %5475 }
0x19bd   : > { %v5473_v46 = vpop.xlane.xlu0 %5472 }
0x19be   : > { %11563 = vrcp.f32 %v5473_v46 }
0x19bf   : > { %11565 = vrcp.f32 %v5476_v47 }
0x19c4   : > { %v11560_v6 = vpop.eup %11559 }
0x19c5   : > { %v5481_v20 = vmul.f32 %v11560_v6, %v11554_v19  ;;  %v11562_v58 = vpop.eup %11561 }
0x19c6   : > { %v5482_v61 = vmul.f32 %v11562_v58, %v12793_v17 }
0x19c7   : > { %10406 = vmatprep.mubr.msk.f32.mxu1 %vm844_vm0, %v5481_v20 }
0x19c8   : > { %v11564_v60 = vpop.eup %11563 }
0x19c9   : > { %v11566_v0 = vpop.eup %11565  ;;  %v5483_v1 = vmul.f32 %v11564_v60, %v11558_v29 }
0x19ca   : > { %v5484_v2 = vmul.f32 %v11566_v0, %v12798_v26 }
0x1a89   : > { %v10380_v48 = vpop.f32.mrb[72].mxu1 }
0x1a8a   : > { %v5313_v49 = vpop.f32.mrb[73].mxu1 }
0x1a8b   : > { %v11105_v50 = vpack.c.bf16 %v10380_v48, %v5313_v49 }
0x1a8d   : > { %v10383_v51 = vpop.f32.mrb[74].mxu1  ;;  %11106 = vmatprep.subr.bf16.mxu1 %v11105_v50 }
0x1a8e   : > { %v5323_v52 = vpop.f32.mrb[75].mxu1  ;;  %11108 = vmatpush3.bf16.msra.mxu1 %v11105_v50 }
0x1a8f   : > { %v11109_v57 = vpack.c.bf16 %v10383_v51, %v5323_v52  ;;  %v9143_v51 = vld [vmem:[%s13487_s6 + $0x38] sm:$0xff] }
0x1a91   : > { %11110 = vmatprep.subr.bf16.mxu1 %v11109_v57 }
0x1a92   : > { %11112 = vmatpush3.bf16.msra.mxu1 %v11109_v57 }
0x1a93   : > { %10412 = vmatprep.subr.mxu1 %v9102_v59 }
0x1a95   : > { %10407 = vmatmul.mubr.msk.f32.vlgmr.msra.gmra.mrb[76].mxu1 %vm844_vm0, %v5482_v61 }
0x1a96   : > { %10409 = vmatprep.mubr.msk.f32.mxu1 %vm844_vm0, %v5483_v1  ;;  %10413 = vmatpush3.msra.mxu1 %v9102_v59 }
0x1a97   : > { %11122 = vmatprep.subr.bf16.mxu1 %v11121_v9 }
0x1a99   : > { %10410 = vmatmul.mubr.msk.f32.gmra.mrb[78].mxu1 %vm844_vm0, %v5484_v2 }
0x1b68   : > { %v10408_v10 = vpop.f32.mrb[76].mxu1 }
0x1b69   : > { %v5563_v27 = vpop.f32.mrb[77].mxu1 }
0x1b6a   : > { %10414 = vmatprep.mubr.msk.f32.mxu1 %vm1193_vm1, %v5563_v27 }
0x1b6b   : > { %10415 = vmatmul.mubr.msk.f32.vlgmr.msra.gmra.mrb[68].mxu1 %vm1193_vm1, %v10408_v10 }
0x1b6c   : > { %v10411_v31 = vpop.f32.mrb[78].mxu1  ;;  %11124 = vmatpush3.bf16.msra.mxu1 %v11121_v9  ;;  %v9148_v9 = vld [vmem:[%s13488_s3 + $0x1] ss:$0 sm:$0xff]  ;;  %s13330_s3 = scalar_lea.hbm %s13501_s10, %s9284_s7 }
0x1b6d   : > { %v5573_v34 = vpop.f32.mrb[79].mxu1  ;;  %11126 = vmatprep.subr.bf16.mxu1 %v11125_v12 }
0x1b6e   : > { %10417 = vmatprep.mubr.msk.f32.mxu1 %vm1193_vm1, %v5573_v34 }
0x1b6f   : > { %10418 = vmatmul.mubr.msk.f32.gmra.mrb[70].mxu1 %vm1193_vm1, %v10411_v31 }
0x1b70   : > { %11128 = vmatpush3.bf16.msra.mxu1 %v11125_v12  ;;  %10442 = vmatprep.mubr.msk.f32.mxu1 %vm844_vm0, %v12515_v21 }
0x1b73   : > { %10443 = vmatmul.mubr.msk.f32.vlgmr.msra.gmra.mrb[80].mxu1 %vm844_vm0, %v12517_v24 }
0x1b74   : > { %10445 = vmatprep.mubr.msk.f32.mxu1 %vm844_vm0, %v12529_v54 }
0x1b77   : > { %10446 = vmatmul.mubr.msk.f32.gmra.mrb[82].mxu1 %vm844_vm0, %v12531_v53 }
0x1b78   : > { %10470 = vmatprep.mubr.msk.f32.mxu1 %vm1193_vm1, %v12777_v40 }
0x1c46   : > { %v10444_v13 = vpop.f32.mrb[80].mxu1 }
0x1c47   : > { %v5846_v30 = vpop.f32.mrb[81].mxu1 }
0x1c48   : > { %v11137_v14 = vpack.c.bf16 %v10444_v13, %v5846_v30 }
0x1c4a   : > { %v10447_v16 = vpop.f32.mrb[82].mxu1  ;;  %11139 = vmatprep.subr.msk.bf16.mxu1 %vm11997_vm2, %v11137_v14 }
0x1c4b   : > { %v5856_v21 = vpop.f32.mrb[83].mxu1  ;;  %11142 = vmatpush3.bf16.xpose.msk.msra.mxu1 %vm11997_vm2, %v11137_v14 }
0x1c4c   : > { %v11143_v24 = vpack.c.bf16 %v10447_v16, %v5856_v21 }
0x1c4e   : > { %11145 = vmatprep.subr.msk.bf16.mxu1 %vm11997_vm2, %v11143_v24 }
0x1c53   : > { %11148 = vmatpush3.bf16.xpose.msk.msra.mxu1 %vm11997_vm2, %v11143_v24 }
0x1c54   : > { %10490 = vmatprep.subr.mxu1 %v9143_v51 }
0x1c5a   : > { %10471 = vmatmul.mubr.msk.f32.vlgmr.msra.gmra.mrb[84].mxu1 %vm1193_vm1, %v12775_v39 }
0x1c5b   : > { %10473 = vmatprep.mubr.msk.f32.mxu1 %vm1193_vm1, %v12781_v42  ;;  %10491 = vmatpush3.msra.mxu1 %v9143_v51 }
0x1c5e   : > { %10474 = vmatmul.mubr.msk.f32.gmra.mrb[86].mxu1 %vm1193_vm1, %v12779_v41 }
0x1d2d   : > { %v10472_v54 = vpop.f32.mrb[84].mxu1 }
0x1d2e   : > { %v6045_v53 = vpop.f32.mrb[85].mxu1  ;;  %v6067_v40 = vsel %vm844_vm0, %v10472_v54, -inf }
0x1d2f   : > { %6068 = vmax.xlane.f32.xlu1 %v6067_v40  ;;  %v6064_v17 = vsel %vm844_vm0, %v6045_v53, -inf }
0x1d30   : > { %6065 = vmax.xlane.f32.xlu0 %v6064_v17 }
0x1d31   : > { %v10475_v19 = vpop.f32.mrb[86].mxu1 }
0x1d32   : > { %v6055_v28 = vpop.f32.mrb[87].mxu1  ;;  %v6073_v56 = vsel %vm844_vm0, %v10475_v19, -inf }
0x1d33   : > { %v6070_v55 = vsel %vm844_vm0, %v6055_v28, -inf }
0x1dbc   : > { %v6069_v22 = vpop.xlane.xlu1 %6068 }
0x1dbd   : > { %v6077_v63 = vsub.f32 %v10472_v54, %v6069_v22  ;;  %v6066_v26 = vpop.xlane.xlu0 %6065 }
0x1dbe   : > { %v6076_v39 = vsub.f32 %v6045_v53, %v6066_v26 }
0x1dbf   : > { %v6082_v29 = vmul.f32 1.442695, %v6077_v63 }
0x1dc0   : > { %v6080_v32 = vmul.f32 1.442695, %v6076_v39 }
0x1dc1   : > { %11567 = vpow2.f32 %v6082_v29  ;;  %v9151_v29 = vld [vmem:[%s13489_s23 + $0x20] sm:$0xff] }
0x1dc2   : > { %11569 = vpow2.f32 %v6080_v32  ;;  %v9152_v32 = vld [vmem:[%s13489_s23 + $0x28] sm:$0xff] }
0x1dcb   : > { %v11568_v42 = vpop.eup %11567 }
0x1dcc   : > { %v11570_v41 = vpop.eup %11569  ;;  %v6091_v33 = vsel %vm844_vm0, %v11568_v42, 0.0 }
0x1dcd   : > { %6092 = vadd.xlane.f32.xlu1 %v6091_v33  ;;  %v6088_v5 = vsel %vm844_vm0, %v11570_v41, 0.0 }
0x1dce   : > { %6089 = vadd.xlane.f32.xlu0 %v6088_v5 }
0x1dd1   : > { %6074 = vmax.xlane.f32.xlu1 %v6073_v56 }
0x1dd2   : > { %6071 = vmax.xlane.f32.xlu0 %v6070_v55 }
0x1e5a   : > { %v6093_v7 = vpop.xlane.xlu1 %6092 }
0x1e5b   : > { %11571 = vrcp.f32 %v6093_v7  ;;  %v6090_v35 = vpop.xlane.xlu0 %6089 }
0x1e5c   : > { %11573 = vrcp.f32 %v6090_v35 }
0x1e5e   : > { %v6075_v36 = vpop.xlane.xlu1 %6074 }
0x1e5f   : > { %v6079_v38 = vsub.f32 %v10475_v19, %v6075_v36  ;;  %v6072_v43 = vpop.xlane.xlu0 %6071 }
0x1e60   : > { %v6078_v44 = vsub.f32 %v6055_v28, %v6072_v43 }
0x1e61   : > { %v6086_v45 = vmul.f32 1.442695, %v6079_v38 }
0x1e62   : > { %v6084_v11 = vmul.f32 1.442695, %v6078_v44 }
0x1e63   : > { %11575 = vpow2.f32 %v6086_v45 }
0x1e64   : > { %11577 = vpow2.f32 %v6084_v11  ;;  %v12939_v11 = vld [vmem:[%s13492_s5 + $0x1] ss:$0 sm:$0xff] }
0x1e65   : > { %v11572_v6 = vpop.eup %11571 }
0x1e66   : > { %v11574_v20 = vpop.eup %11573  ;;  %v6105_v46 = vmul.f32 %v11572_v6, %v11568_v42  ;;  %v9154_v42 = vld [vmem:[%s13489_s23 + $0x38] sm:$0xff] }
0x1e67   : > { %v6104_v18 = vmul.f32 %v11574_v20, %v11570_v41 }
0x1e69   : > { %10484 = vmatprep.mubr.msk.f32.mxu0 %vm844_vm0, %v6104_v18 }
0x1e6a   : > { %10485 = vmatmul.mubr.msk.f32.vlgmr.msra.gmra.mrb[84].mxu0 %vm844_vm0, %v6105_v46 }
0x1e6d   : > { %v11576_v47 = vpop.eup %11575 }
0x1e6e   : > { %v11578_v48 = vpop.eup %11577  ;;  %v6097_v49 = vsel %vm844_vm0, %v11576_v47, 0.0 }
0x1e6f   : > { %6098 = vadd.xlane.f32.xlu1 %v6097_v49  ;;  %v6094_v50 = vsel %vm844_vm0, %v11578_v48, 0.0  ;;  %v12950_v49 = vld [vmem:[%s13493_s0 + $0x1] ss:$0 sm:$0xff]  ;;  %s13498_s0 = sld [smem:[#allocation6_spill]] }
0x1e70   : > { %6095 = vadd.xlane.f32.xlu0 %v6094_v50 }
0x1e75   : > { %s817_s25 = sand.u32 1, %s13498_s0  }
0x1e76   : > { %s8815_s9 = sshll.u32 %s817_s25, 3  ;;  %s8711_s5 = scalar_lea.sflag [#allocation3], %s817_s25 }
0x1e77   : > { %s819_s2 = scalar_lea.vmem [#allocation2], %s8815_s9  ;;  %s11615_s9 = sshll.u32 %s11678_s1, 4  ;;  %s11616_s9 = int_to_ptr.vmem [resolvable:$false] %s11615_s9 }
0x1e78   : > { %s8727_s11 = sshll.u32 %s819_s2, 4  ;;  %s11617_s7 = scalar_lea.vmem %s11616_s9, 256  ;;  %s13332_s11 = int_to_ptr.vmem [resolvable:$true] %s8727_s11 }
0x1e79   : > { %s11611_s0 = scalar_lea.vmem %s13332_s11, 128  ;;  %p11618_p0 = scmp.lt.s32.totalorder %s13332_s11, %s11616_s9 }
0x1e7a   : > { %p11612_p11 = scmp.ne.s32.totalorder %s13332_s11, %s11611_s0  ;;  %p11619_p1 = scmp.lt.s32.totalorder %s11617_s7, %s11611_s0 }
0x1e7c   : > { %p11613_p12 = pnand %p11612_p11, %p11857_p5  ;;  %p11620_p2 = por %p11619_p1, %p11618_p0 }
0x1e7e   : > { %p11614_p13 = pneg %p11613_p12 }
0x1e80   : > { %p11621_p3 = pnand %p11620_p2, %p11614_p13 }
0x1efc   : > { %v6099_v52 = vpop.xlane.xlu1 %6098 }
0x1efd   : > { %11579 = vrcp.f32 %v6099_v52  ;;  %v6096_v57 = vpop.xlane.xlu0 %6095 }
0x1efe   : > { %11581 = vrcp.f32 %v6096_v57 }
0x1f07   : > { %v11580_v58 = vpop.eup %11579 }
0x1f08   : > { %v11582_v59 = vpop.eup %11581  ;;  %v6107_v61 = vmul.f32 %v11580_v58, %v11576_v47 }
0x1f09   : > { %v6106_v60 = vmul.f32 %v11582_v59, %v11578_v48 }
0x1f0b   : > { %10487 = vmatprep.mubr.msk.f32.mxu0 %vm844_vm0, %v6106_v60 }
0x1f0c   : > { %10488 = vmatmul.mubr.msk.f32.gmra.mrb[86].mxu0 %vm844_vm0, %v6107_v61  ;;  %v9160_v61 = vld [vmem:[%s13490_s13 + $0x80] sm:$0xff] }
0x1f3d   : > { %v10486_v0 = vpop.f32.mrb[84].mxu0 }
0x1f3e   : > { %v6186_v1 = vpop.f32.mrb[85].mxu0 }
0x1f3f   : > { %10492 = vmatprep.mubr.msk.f32.mxu1 %vm1193_vm1, %v6186_v1 }
0x1f40   : > { %10493 = vmatmul.mubr.msk.f32.vlgmr.msra.gmra.mrb[68].mxu1 %vm1193_vm1, %v10486_v0  ;;  %v9161_v0 = vld [vmem:[%s13490_s13 + $0x88] sm:$0xff] }
0x1f41   : > { %v11165_v1 = vpack.c.bf16 %v9161_v0, %v9160_v61  ;;  %v6642_v61 = vld [vmem:[%s13400_s15 + $0x8] sm:$0xff] }
0x1fdf   : > { %v10489_v2 = vpop.f32.mrb[86].mxu0 }
0x1fe0   : > { %v6196_v3 = vpop.f32.mrb[87].mxu0 }
0x1fe1   : > { %10495 = vmatprep.mubr.msk.f32.mxu1 %vm1193_vm1, %v6196_v3  ;;  %v9163_v3 = vld [vmem:[%s13490_s13 + $0x98] sm:$0xff] }
0x1fe2   : > { %10496 = vmatmul.mubr.msk.f32.gmra.mrb[70].mxu1 %vm1193_vm1, %v10489_v2  ;;  %v9162_v2 = vld [vmem:[%s13490_s13 + $0x90] sm:$0xff] }
0x2013   : > { %v10494_v4 = vpop.f32.mrb[68].mxu1 }
0x2014   : > { %v6309_v8 = vadd.f32 %v10494_v4, %v12458_v37  ;;  %v6285_v23 = vpop.f32.mrb[69].mxu1  ;;  %v11169_v4 = vpack.c.bf16 %v9163_v3, %v9162_v2  ;;  %v6644_v2 = vld [vmem:[%s13400_s15 + $0x18] sm:$0xff] }
0x2015   : > { %v6308_v10 = vadd.f32 %v6285_v23, %v12461_v15 }
0x2016   : > { %v12908_v27 = vadd.f32 %v9148_v9, %v6309_v8  ;;  %v9165_v8 = vld [vmem:[%s13490_s13 + $0xa8] sm:$0xff] }
0x2017   : > { %v12910_v12 = vadd.f32 %v9148_v9, %v6308_v10  ;;  %v9166_v10 = vld [vmem:[%s13490_s13 + $0xb0] sm:$0xff] }
0x2018   : > { %v6326_v31 = vsel %vm844_vm0, %v12908_v27, 0.0 }
0x2019   : > { %6327 = vadd.xlane.f32.xlu1 %v6326_v31  ;;  %v6323_v34 = vsel %vm844_vm0, %v12910_v12, 0.0  ;;  %v9167_v31 = vld [vmem:[%s13490_s13 + $0xb8] sm:$0xff] }
0x201a   : > { %6324 = vadd.xlane.f32.xlu0 %v6323_v34  ;;  %v11177_v34 = vpack.c.bf16 %v9167_v31, %v9166_v10 }
0x20a6   : > { %v6328_v13 = vpop.xlane.xlu1 %6327 }
0x20a7   : > { %v6336_v30 = vmul.f32 0.03125, %v6328_v13  ;;  %v6325_v14 = vpop.xlane.xlu0 %6324  ;;  %v9168_v13 = vld [vmem:[%s13490_s13 + $0xc0] sm:$0xff] }
0x20a8   : > { %v6335_v16 = vmul.f32 0.03125, %v6325_v14 }
0x20a9   : > { %v6340_v37 = vsub.f32 %v12908_v27, %v6336_v30  ;;  %v9169_v30 = vld [vmem:[%s13490_s13 + $0xc8] sm:$0xff] }
0x20aa   : > { %v6339_v15 = vsub.f32 %v12910_v12, %v6335_v16  ;;  %v11181_v14 = vpack.c.bf16 %v9169_v30, %v9168_v13  ;;  %v9170_v16 = vld [vmem:[%s13490_s13 + $0xd0] sm:$0xff] }
0x20ab   : > { %v6344_v21 = vmul.f32 %v6340_v37, %v6340_v37 }
0x20ac   : > { %v6343_v24 = vmul.f32 %v6339_v15, %v6339_v15 }
0x20ad   : > { %v6350_v54 = vsel %vm844_vm0, %v6344_v21, 0.0  ;;  %v9172_v21 = vld [vmem:[%s13490_s13 + $0xe0] sm:$0xff] }
0x20ae   : > { %6351 = vadd.xlane.f32.xlu1 %v6350_v54  ;;  %v6347_v53 = vsel %vm844_vm0, %v6343_v24, 0.0  ;;  %v9173_v24 = vld [vmem:[%s13490_s13 + $0xe8] sm:$0xff] }
0x20af   : > { %6348 = vadd.xlane.f32.xlu0 %v6347_v53  ;;  %v11189_v54 = vpack.c.bf16 %v9173_v24, %v9172_v21  ;;  %v9174_v53 = vld [vmem:[%s13490_s13 + $0xf0] sm:$0xff] }
0x20b5   : > { %v10497_v40 = vpop.f32.mrb[70].mxu1 }
0x20b6   : > { %v6311_v17 = vadd.f32 %v10497_v40, %v12468_v25  ;;  %v6295_v19 = vpop.f32.mrb[71].mxu1  ;;  %v11157_v25 = vpack.c.bf16 %v9152_v32, %v9151_v29  ;;  %v9175_v40 = vld [vmem:[%s13490_s13 + $0xf8] sm:$0xff] }
0x20b7   : > { %v6310_v28 = vadd.f32 %v6295_v19, %v12471_v62  ;;  %v9153_v62 = vld [vmem:[%s13489_s23 + $0x30] sm:$0xff] }
0x20b8   : > { %v6320_v22 = vadd.f32 %v9148_v9, %v6311_v17  ;;  %11158 = vmatprep.subr.bf16.mxu0 %v11157_v25  ;;  %v11161_v41 = vpack.c.bf16 %v9154_v42, %v9153_v62  ;;  %v11193_v17 = vpack.c.bf16 %v9175_v40, %v9174_v53 }
0x20b9   : > { %v6319_v63 = vadd.f32 %v9148_v9, %v6310_v28  ;;  %11160 = vmatpush3.bf16.msra.mxu0 %v11157_v25  ;;  %v9164_v9 = vld [vmem:[%s13490_s13 + $0xa0] sm:$0xff] }
0x20ba   : > { %v6332_v26 = vsel %vm844_vm0, %v6320_v22, 0.0  ;;  %11162 = vmatprep.subr.bf16.mxu0 %v11161_v41  ;;  %v11173_v23 = vpack.c.bf16 %v9165_v8, %v9164_v9 }
0x20bb   : > { %6333 = vadd.xlane.f32.xlu1 %v6332_v26  ;;  %v6329_v39 = vsel %vm844_vm0, %v6319_v63, 0.0 }
0x20bc   : > { %6330 = vadd.xlane.f32.xlu0 %v6329_v39 }
0x20bd   : > { %11164 = vmatpush3.bf16.msra.mxu0 %v11161_v41 }
0x20be   : > { %11166 = vmatprep.subr.bf16.mxu0 %v11165_v1 }
0x213b   : > { %v6352_v33 = vpop.xlane.xlu1 %6351 }
0x213c   : > { %v6360_v5 = vmul.f32 0.03125, %v6352_v33  ;;  %v6349_v56 = vpop.xlane.xlu0 %6348 }
0x213d   : > { %v6359_v55 = vmul.f32 0.03125, %v6349_v56  ;;  %v9155_v56 = vld [vmem:[%s13494_s12 + $0x1] ss:$0 sm:$0xff] }
0x213e   : > { %v6364_v7 = vadd.f32 1e-05, %v6360_v5 }
0x213f   : > { %v6363_v35 = vadd.f32 1e-05, %v6359_v55 }
0x2140   : > { %11583 = vrsqrt.f32 %v6364_v7 }
0x2141   : > { %11585 = vrsqrt.f32 %v6363_v35 }
0x2148   : > { %v6334_v36 = vpop.xlane.xlu1 %6333 }
0x2149   : > { %v6338_v38 = vmul.f32 0.03125, %v6334_v36  ;;  %v6331_v43 = vpop.xlane.xlu0 %6330 }
0x214a   : > { %v11584_v44 = vpop.eup %11583  ;;  %v6337_v45 = vmul.f32 0.03125, %v6331_v43 }
0x214b   : > { %v11586_v6 = vpop.eup %11585  ;;  %v6372_v20 = vmul.f32 %v11584_v44, %v6340_v37  ;;  %v12941_v18 = vsub.f32 %v6320_v22, %v6338_v38  ;;  %v9171_v37 = vld [vmem:[%s13490_s13 + $0xd8] sm:$0xff] }
0x214c   : > { %v12943_v46 = vsub.f32 %v6319_v63, %v6337_v45  ;;  %v6371_v47 = vmul.f32 %v11586_v6, %v6339_v15  ;;  %v11185_v15 = vpack.c.bf16 %v9171_v37, %v9170_v16 }
0x214d   : > { %v6346_v48 = vmul.f32 %v12941_v18, %v12941_v18  ;;  %v6380_v50 = vmul.f32 %v12939_v11, %v6372_v20 }
0x214e   : > { %v6345_v51 = vmul.f32 %v12943_v46, %v12943_v46  ;;  %v6379_v52 = vmul.f32 %v12939_v11, %v6371_v47 }
0x214f   : > { %v6356_v57 = vsel %vm844_vm0, %v6346_v48, 0.0  ;;  %v6388_v60 = vadd.f32 %v12950_v49, %v6380_v50 }
0x2150   : > { %6357 = vadd.xlane.f32.xlu1 %v6356_v57  ;;  %v6353_v58 = vsel %vm844_vm0, %v6345_v51, 0.0  ;;  %v6387_v59 = vadd.f32 %v12950_v49, %v6379_v52 }
0x2151   : > { %6354 = vadd.xlane.f32.xlu0 %v6353_v58 }
0x2152   : > { %10506 = vmatprep.mubr.msk.f32.mxu0 %vm844_vm0, %v6387_v59 }
0x2153   : > { %10507 = vmatmul.mubr.msk.f32.vlgmr.msra.gmra.mrb[88].mxu0 %vm844_vm0, %v6388_v60  ;;  %v6641_v60 = vld [vmem:[%s13400_s15] sm:$0xff] }
0x2154   : > { %11168 = vmatpush3.bf16.msra.mxu0 %v11165_v1  ;;  %v11197_v0 = vpack.c.bf16 %v6642_v61, %v6641_v60  ;;  %v6643_v1 = vld [vmem:[%s13400_s15 + $0x10] sm:$0xff] }
0x2155   : > { %11170 = vmatprep.subr.bf16.mxu0 %v11169_v4  ;;  %v11201_v3 = vpack.c.bf16 %v6644_v2, %v6643_v1 }
0x2156   : > { %11198 = vmatprep.subr.bf16.mxu1 %v11197_v0 }
0x2157   : > { %11200 = vmatpush3.bf16.msra.mxu1 %v11197_v0 }
0x2158   : > { %11172 = vmatpush3.bf16.msra.mxu0 %v11169_v4  ;;  %11202 = vmatprep.subr.bf16.mxu1 %v11201_v3 }
0x2159   : > { %11174 = vmatprep.subr.bf16.mxu0 %v11173_v23 }
0x215b   : > { %11204 = vmatpush3.bf16.msra.mxu1 %v11201_v3  ;;  %v9185_v3 = vld [vmem:[%s13400_s15 + $0x30] sm:$0xff] }
0x215c   : > { %11176 = vmatpush3.bf16.msra.mxu0 %v11173_v23 }
0x215d   : > { %11178 = vmatprep.subr.bf16.mxu0 %v11177_v34 }
0x2160   : > { %11180 = vmatpush3.bf16.msra.mxu0 %v11177_v34 }
0x2161   : > { %11182 = vmatprep.subr.bf16.mxu0 %v11181_v14 }
0x2164   : > { %11184 = vmatpush3.bf16.msra.mxu0 %v11181_v14 }
0x2165   : > { %11186 = vmatprep.subr.bf16.mxu0 %v11185_v15 }
0x2168   : > { %11188 = vmatpush3.bf16.msra.mxu0 %v11185_v15 }
0x2169   : > { %11190 = vmatprep.subr.bf16.mxu0 %v11189_v54 }
0x216c   : > { %11192 = vmatpush3.bf16.msra.mxu0 %v11189_v54 }
0x216d   : > { %11194 = vmatprep.subr.bf16.mxu0 %v11193_v17 }
0x2170   : > { %11196 = vmatpush3.bf16.msra.mxu0 %v11193_v17 }
0x21dd   : > { %v6358_v19 = vpop.xlane.xlu1 %6357 }
0x21de   : > { %v6362_v28 = vmul.f32 0.03125, %v6358_v19  ;;  %v6355_v22 = vpop.xlane.xlu0 %6354 }
0x21df   : > { %v6361_v63 = vmul.f32 0.03125, %v6355_v22 }
0x21e0   : > { %v6366_v26 = vadd.f32 1e-05, %v6362_v28 }
0x21e1   : > { %v6365_v39 = vadd.f32 1e-05, %v6361_v63  ;;  %v9176_v63 = vld [vmem:[%s13399_s14 + $0x1] ss:$0 sm:$0xff] }
0x21e2   : > { %11587 = vrsqrt.f32 %v6366_v26 }
0x21e3   : > { %11589 = vrsqrt.f32 %v6365_v39 }
0x21ec   : > { %v11588_v29 = vpop.eup %11587 }
0x21ed   : > { %v11590_v32 = vpop.eup %11589  ;;  %v6374_v25 = vmul.f32 %v11588_v29, %v12941_v18 }
0x21ee   : > { %v6373_v62 = vmul.f32 %v11590_v32, %v12943_v46 }
0x21ef   : > { %v6382_v42 = vmul.f32 %v12939_v11, %v6374_v25 }
0x21f0   : > { %v6381_v41 = vmul.f32 %v12939_v11, %v6373_v62 }
0x21f1   : > { %v6390_v5 = vadd.f32 %v12950_v49, %v6382_v42  ;;  %v6749_v42 = vld [vmem:[%s13402_s17] sm:$0xff] }
0x21f2   : > { %v6389_v33 = vadd.f32 %v12950_v49, %v6381_v41  ;;  %v6750_v41 = vld [vmem:[%s13402_s17 + $0x8] sm:$0xff] }
0x21f4   : > { %10509 = vmatprep.mubr.msk.f32.mxu0 %vm844_vm0, %v6389_v33  ;;  %v11205_v33 = vpack.c.bf16 %v6750_v41, %v6749_v42 }
0x21f5   : > { %10510 = vmatmul.mubr.msk.f32.gmra.mrb[90].mxu0 %vm844_vm0, %v6390_v5 }
0x21f6   : > { %11206 = vmatprep.subr.bf16.mxu1 %v11205_v33 }
0x2226   : > { %v10508_v55 = vpop.f32.mrb[88].mxu0 }
0x2227   : > { %v6485_v7 = vadd.f32 %v10508_v55, %v9155_v56  ;;  %v6479_v35 = vpop.f32.mrb[89].mxu0  ;;  %v9184_v55 = vld [vmem:[%s13400_s15 + $0x28] sm:$0xff] }
0x2228   : > { %v6480_v36 = vadd.f32 %v9155_v56, %v6479_v35 }
0x2229   : > { %v6503_v38 = vmul.f32 0.044715, %v6485_v7  ;;  %v6499_v57 = vmul.f32 0.5, %v6485_v7 }
0x222a   : > { %v6502_v43 = vmul.f32 0.044715, %v6480_v36  ;;  %v6498_v51 = vmul.f32 0.5, %v6480_v36 }
0x222b   : > { %v6507_v44 = vmul.f32 %v6503_v38, %v6485_v7  ;;  %v9177_v38 = vld [vmem:[%s13401_s16] ss:$0 sm:$0xff] }
0x222c   : > { %v6506_v45 = vmul.f32 %v6502_v43, %v6480_v36 }
0x222d   : > { %v6511_v11 = vmul.f32 %v6507_v44, %v6485_v7 }
0x222e   : > { %v6510_v6 = vmul.f32 %v6506_v45, %v6480_v36 }
0x222f   : > { %v6515_v20 = vadd.f32 %v6511_v11, %v6485_v7 }
0x2230   : > { %v6514_v18 = vadd.f32 %v6510_v6, %v6480_v36 }
0x2231   : > { %v6519_v46 = vmul.f32 0.7978846, %v6515_v20 }
0x2232   : > { %v6518_v47 = vmul.f32 0.7978846, %v6514_v18 }
0x2233   : > { %11591 = vtanh.f32 %v6519_v46 }
0x2234   : > { %11593 = vtanh.f32 %v6518_v47 }
0x223d   : > { %v11592_v48 = vpop.eup %11591 }
0x223e   : > { %v11594_v49 = vpop.eup %11593  ;;  %v6527_v50 = vadd.f32 1.0, %v11592_v48 }
0x223f   : > { %v6526_v52 = vadd.f32 1.0, %v11594_v49 }
0x2240   : > { %v6531_v59 = vmul.f32 %v6527_v50, %v6499_v57 }
0x2241   : > { %v6530_v58 = vmul.f32 %v6526_v52, %v6498_v51 }
0x2243   : > { %10544 = vmatprep.mubr.f32.mxu0 %v6530_v58 }
0x2244   : > { %10545 = vmatmul.mubr.f32.vlgmr.msra.gmra.mrb[92].mxu0 %v6531_v59 }
0x22c8   : > { %v10511_v4 = vpop.f32.mrb[90].mxu0 }
0x22c9   : > { %v6495_v9 = vadd.f32 %v10511_v4, %v9155_v56  ;;  %v6489_v8 = vpop.f32.mrb[91].mxu0  ;;  %v9186_v4 = vld [vmem:[%s13400_s15 + $0x38] sm:$0xff] }
0x22ca   : > { %v6490_v23 = vadd.f32 %v9155_v56, %v6489_v8  ;;  %v9183_v56 = vld [vmem:[%s13400_s15 + $0x20] sm:$0xff] }
0x22cb   : > { %v6505_v10 = vmul.f32 0.044715, %v6495_v9  ;;  %v6501_v19 = vmul.f32 0.5, %v6495_v9  ;;  %v11213_v7 = vpack.c.bf16 %v9184_v55, %v9183_v56  ;;  %v9180_v8 = vld [vmem:[%s13403_s18] ss:$0 sm:$0xff] }
0x22cc   : > { %v6504_v31 = vmul.f32 0.044715, %v6490_v23  ;;  %v6500_v40 = vmul.f32 0.5, %v6490_v23 }
0x22cd   : > { %v6509_v34 = vmul.f32 %v6505_v10, %v6495_v9 }
0x22ce   : > { %v6508_v13 = vmul.f32 %v6504_v31, %v6490_v23 }
0x22cf   : > { %v6513_v30 = vmul.f32 %v6509_v34, %v6495_v9 }
0x22d0   : > { %v6512_v14 = vmul.f32 %v6508_v13, %v6490_v23  ;;  %v9190_v13 = vld [vmem:[%s13402_s17 + $0x20] sm:$0xff] }
0x22d1   : > { %v6517_v16 = vadd.f32 %v6513_v30, %v6495_v9  ;;  %v11217_v9 = vpack.c.bf16 %v9186_v4, %v9185_v3  ;;  %v9191_v30 = vld [vmem:[%s13402_s17 + $0x28] sm:$0xff] }
0x22d2   : > { %v6516_v37 = vadd.f32 %v6512_v14, %v6490_v23  ;;  %v9192_v14 = vld [vmem:[%s13402_s17 + $0x30] sm:$0xff] }
0x22d3   : > { %v6521_v15 = vmul.f32 0.7978846, %v6517_v16  ;;  %v11221_v16 = vpack.c.bf16 %v9191_v30, %v9190_v13  ;;  %v9198_v13 = vld [vmem:[%s13405_s20] ss:$0 sm:$0xff] }
0x22d4   : > { %v6520_v21 = vmul.f32 0.7978846, %v6516_v37  ;;  %v9193_v37 = vld [vmem:[%s13402_s17 + $0x38] sm:$0xff] }
0x22d5   : > { %11595 = vtanh.f32 %v6521_v15  ;;  %v11225_v15 = vpack.c.bf16 %v9193_v37, %v9192_v14 }
0x22d6   : > { %11597 = vtanh.f32 %v6520_v21  ;;  %v9187_v21 = vld [vmem:[%s13401_s16 + $0x1] ss:$0 sm:$0xff] }
0x22df   : > { %v11596_v24 = vpop.eup %11595 }
0x22e0   : > { %v11598_v54 = vpop.eup %11597  ;;  %v6529_v53 = vadd.f32 1.0, %v11596_v24 }
0x22e1   : > { %v6528_v17 = vadd.f32 1.0, %v11598_v54 }
0x22e2   : > { %v6533_v22 = vmul.f32 %v6529_v53, %v6501_v19 }
0x22e3   : > { %v6532_v28 = vmul.f32 %v6528_v17, %v6500_v40 }
0x22e5   : > { %10547 = vmatprep.mubr.f32.mxu0 %v6532_v28 }
0x22e6   : > { %10548 = vmatmul.mubr.f32.gmra.mrb[94].mxu0 %v6533_v22 }
0x2317   : > { %v10546_v26 = vpop.f32.mrb[92].mxu0 }
0x2318   : > { %v6628_v39 = vadd.f32 %v10546_v26, %v9176_v63  ;;  %v6622_v29 = vpop.f32.mrb[93].mxu0 }
0x2319   : > { %v6623_v32 = vadd.f32 %v9176_v63, %v6622_v29 }
0x231a   : > { %v6640_v62 = vadd.f32 %v6628_v39, %v12908_v27  ;;  %v6752_v27 = vld [vmem:[%s13402_s17 + $0x18] sm:$0xff] }
0x231b   : > { %v13037_v25 = vadd.f32 %v6623_v32, %v12910_v12  ;;  %v6751_v12 = vld [vmem:[%s13402_s17 + $0x10] sm:$0xff] }
0x231c   : > { %v11209_v5 = vpack.c.bf16 %v6752_v27, %v6751_v12 }
0x231d   : > { %10558 = vmatprep.mubr.msk.f32.mxu1 %vm844_vm0, %v13037_v25 }
0x231e   : > { %10559 = vmatmul.mubr.msk.f32.vlgmr.msra.gmra.mrb[88].mxu1 %vm844_vm0, %v6640_v62 }
0x231f   : > { %11208 = vmatpush3.bf16.msra.mxu1 %v11205_v33 }
0x2320   : > { %11210 = vmatprep.subr.bf16.mxu1 %v11209_v5 }
0x2323   : > { %11212 = vmatpush3.bf16.msra.mxu1 %v11209_v5 }
0x2324   : > { %11214 = vmatprep.subr.bf16.mxu1 %v11213_v7 }
0x23b9   : > { %v10549_v35 = vpop.f32.mrb[94].mxu0 }
0x23ba   : > { %v6632_v36 = vpop.f32.mrb[95].mxu0 }
0x23f1   : > { %v10560_v43 = vpop.f32.mrb[88].mxu1 }
0x23f2   : > { %v6728_v44 = vadd.f32 %v10560_v43, %v9177_v38  ;;  %v6722_v45 = vpop.f32.mrb[89].mxu1 }
0x23f3   : > { %v6723_v11 = vadd.f32 %v9177_v38, %v6722_v45 }
0x23f4   : > { %v6734_v6 = vmul.f32 0.044715, %v6728_v44  ;;  %v6732_v0 = vmul.f32 0.5, %v6728_v44 }
0x23f5   : > { %v6733_v20 = vmul.f32 0.044715, %v6723_v11  ;;  %v6731_v60 = vmul.f32 0.5, %v6723_v11 }
0x23f6   : > { %v6736_v18 = vmul.f32 %v6734_v6, %v6728_v44 }
0x23f7   : > { %v6735_v46 = vmul.f32 %v6733_v20, %v6723_v11 }
0x23f8   : > { %v6738_v47 = vmul.f32 %v6736_v18, %v6728_v44 }
0x23f9   : > { %v6737_v48 = vmul.f32 %v6735_v46, %v6723_v11 }
0x23fa   : > { %v6740_v49 = vadd.f32 %v6738_v47, %v6728_v44 }
0x23fb   : > { %v6739_v50 = vadd.f32 %v6737_v48, %v6723_v11 }
0x23fc   : > { %v6742_v51 = vmul.f32 0.7978846, %v6740_v49 }
0x23fd   : > { %v6741_v52 = vmul.f32 0.7978846, %v6739_v50 }
0x23fe   : > { %11599 = vtanh.f32 %v6742_v51 }
0x23ff   : > { %11601 = vtanh.f32 %v6741_v52  ;;  %v7085_v52 = vld [vmem:[%s13406_s21] sm:$0xff] }
0x2408   : > { %v11600_v57 = vpop.eup %11599 }
0x2409   : > { %v11602_v58 = vpop.eup %11601  ;;  %v6746_v59 = vadd.f32 1.0, %v11600_v57  ;;  %v7169_v57 = vld [vmem:[%s13407_s22] sm:$0xff] }
0x240a   : > { %v6745_v61 = vadd.f32 1.0, %v11602_v58  ;;  %v7170_v58 = vld [vmem:[%s13407_s22 + $0x8] sm:$0xff] }
0x240b   : > { %v6748_v2 = vmul.f32 %v6746_v59, %v6732_v0  ;;  %v7171_v59 = vld [vmem:[%s13407_s22 + $0x10] sm:$0xff] }
0x240c   : > { %v6747_v1 = vmul.f32 %v6745_v61, %v6731_v60  ;;  %v11233_v60 = vpack.c.bf16 %v7170_v58, %v7169_v57  ;;  %v7172_v61 = vld [vmem:[%s13407_s22 + $0x18] sm:$0xff]  ;;  %v9227_v58 = vld [vmem:[%s13407_s22 + $0x60] sm:$0xff] }
0x240d   : > { %v11237_v0 = vpack.c.bf16 %v7172_v61, %v7171_v59  ;;  %v9228_v59 = vld [vmem:[%s13407_s22 + $0x68] sm:$0xff] }
0x240e   : > { %10569 = vmatprep.mubr.msk.f32.mxu1 %vm844_vm0, %v6747_v1  ;;  %11234 = vmatprep.subr.bf16.mxu0 %v11233_v60  ;;  %v11269_v61 = vpack.c.bf16 %v9228_v59, %v9227_v58 }
0x240f   : > { %10570 = vmatmul.mubr.msk.f32.vlgmr.msra.gmra.mrb[90].mxu1 %vm844_vm0, %v6748_v2  ;;  %11236 = vmatpush3.bf16.msra.mxu0 %v11233_v60 }
0x2410   : > { %11216 = vmatpush3.bf16.msra.mxu1 %v11213_v7  ;;  %v9194_v7 = vld [vmem:[%s13403_s18 + $0x1] ss:$0 sm:$0xff]  ;;  %11238 = vmatprep.subr.bf16.mxu0 %v11237_v0 }
0x2411   : > { %11218 = vmatprep.subr.bf16.mxu1 %v11217_v9 }
0x2413   : > { %11240 = vmatpush3.bf16.msra.mxu0 %v11237_v0 }
0x2414   : > { %11220 = vmatpush3.bf16.msra.mxu1 %v11217_v9 }
0x2415   : > { %11222 = vmatprep.subr.bf16.mxu1 %v11221_v16 }
0x24e2   : > { %v10571_v23 = vpop.f32.mrb[90].mxu1 }
0x24e3   : > { %v6830_v10 = vpop.f32.mrb[91].mxu1  ;;  %v6836_v34 = vadd.f32 %v10571_v23, %v9180_v8 }
0x24e4   : > { %v6831_v31 = vadd.f32 %v9180_v8, %v6830_v10  ;;  %v9197_v10 = vld [vmem:[%s13404_s19] ss:$0 sm:$0xff] }
0x24e6   : > { %10580 = vmatprep.mubr.msk.f32.mxu1 %vm844_vm0, %v6831_v31 }
0x24e7   : > { %10581 = vmatmul.mubr.msk.f32.vlgmr.msra.gmra.mrb[92].mxu1 %vm844_vm0, %v6836_v34 }
0x24e8   : > { %11224 = vmatpush3.bf16.msra.mxu1 %v11221_v16 }
0x24e9   : > { %11226 = vmatprep.subr.bf16.mxu1 %v11225_v15 }
0x24ec   : > { %11228 = vmatpush3.bf16.msra.mxu1 %v11225_v15 }
0x25ba   : > { %v10582_v24 = vpop.f32.mrb[92].mxu1 }
0x25bb   : > { %v6927_v54 = vadd.f32 %v10582_v24, %v9187_v21  ;;  %v6921_v53 = vpop.f32.mrb[93].mxu1  ;;  %v7086_v24 = vld [vmem:[%s13406_s21 + $0x8] sm:$0xff] }
0x25bc   : > { %v6922_v40 = vadd.f32 %v9187_v21, %v6921_v53  ;;  %v9204_v53 = vld [vmem:[%s13406_s21 + $0x18] sm:$0xff] }
0x25bd   : > { %v6933_v17 = vmul.f32 0.044715, %v6927_v54  ;;  %v6931_v5 = vmul.f32 0.5, %v6927_v54 }
0x25be   : > { %v6932_v19 = vmul.f32 0.044715, %v6922_v40  ;;  %v6930_v33 = vmul.f32 0.5, %v6922_v40 }
0x25bf   : > { %v6935_v28 = vmul.f32 %v6933_v17, %v6927_v54  ;;  %v9214_v17 = vld [vmem:[%s13406_s21 + $0x28] sm:$0xff] }
0x25c0   : > { %v6934_v22 = vmul.f32 %v6932_v19, %v6922_v40  ;;  %v9223_v19 = vld [vmem:[%s13406_s21 + $0x30] sm:$0xff] }
0x25c1   : > { %v6937_v63 = vmul.f32 %v6935_v28, %v6927_v54  ;;  %v9224_v28 = vld [vmem:[%s13406_s21 + $0x38] sm:$0xff] }
0x25c2   : > { %v6936_v26 = vmul.f32 %v6934_v22, %v6922_v40  ;;  %v9239_v22 = vld [vmem:[%s13406_s21 + $0x50] sm:$0xff] }
0x25c3   : > { %v6939_v39 = vadd.f32 %v6937_v63, %v6927_v54  ;;  %v9203_v54 = vld [vmem:[%s13406_s21 + $0x10] sm:$0xff]  ;;  %v9240_v63 = vld [vmem:[%s13406_s21 + $0x58] sm:$0xff] }
0x25c4   : > { %v6938_v29 = vadd.f32 %v6936_v26, %v6922_v40  ;;  %v9213_v40 = vld [vmem:[%s13406_s21 + $0x20] sm:$0xff] }
0x25c5   : > { %v6941_v32 = vmul.f32 0.7978846, %v6939_v39  ;;  %v9249_v26 = vld [vmem:[%s13406_s21 + $0x60] sm:$0xff]  ;;  %v9250_v39 = vld [vmem:[%s13406_s21 + $0x68] sm:$0xff] }
0x25c6   : > { %v6940_v62 = vmul.f32 0.7978846, %v6938_v29  ;;  %v9259_v29 = vld [vmem:[%s13406_s21 + $0x70] sm:$0xff] }
0x25c7   : > { %11603 = vtanh.f32 %v6941_v32  ;;  %v9260_v32 = vld [vmem:[%s13406_s21 + $0x78] sm:$0xff] }
0x25c8   : > { %11605 = vtanh.f32 %v6940_v62  ;;  %v9269_v62 = vld [vmem:[%s13406_s21 + $0x80] sm:$0xff] }
0x25d1   : > { %v11604_v42 = vpop.eup %11603 }
0x25d2   : > { %v11606_v41 = vpop.eup %11605  ;;  %v6945_v12 = vadd.f32 1.0, %v11604_v42  ;;  %v8550_v42 = vld [vmem:[%s13495_s4] sm:$0xff] }
0x25d3   : > { %v6944_v27 = vadd.f32 1.0, %v11606_v41  ;;  %v8551_v41 = vld [vmem:[%s13496_s24 + $0x8] sm:$0xff] }
0x25d4   : > { %v6947_v55 = vmul.f32 %v6945_v12, %v6931_v5  ;;  %v9270_v12 = vld [vmem:[%s13406_s21 + $0x88] sm:$0xff]  ;;  %v8552_v5 = vld [vmem:[%s13496_s24 + $0x10] sm:$0xff] }
0x25d5   : > { %v6946_v56 = vmul.f32 %v6944_v27, %v6930_v33  ;;  %v11334_v33 = vpack.c.bf16 %v8551_v41, %v8550_v42  ;;  %v11675_v27 = vmov 0.0|0.0   ;;  %v9255_v42 = vld [vmem:[%s13407_s22 + $0xd0] sm:$0xff]  ;;  %v9256_v41 = vld [vmem:[%s13407_s22 + $0xd8] sm:$0xff] }
0x25d7   : > { %10591 = vmatprep.mubr.msk.f32.mxu1 %vm844_vm0, %v6946_v56  ;;  %v8553_v56 = vld [vmem:[%s13496_s24 + $0x18] sm:$0xff] }
0x25d8   : > { %10592 = vmatmul.mubr.msk.f32.vlgmr.msra.gmra.mrb[94].mxu1 %vm844_vm0, %v6947_v55  ;;  %v11337_v55 = vpack.c.bf16 %v8553_v56, %v8552_v5  ;;  %v9265_v5 = vld [vmem:[%s13407_s22 + $0xf0] sm:$0xff] }
0x25d9   : > { %10598 = vmatprep.mubr.msk.f32.mxu1 %vm7087_vm3, %v7085_v52 }
0x26ab   : > { %v10593_v35 = vpop.f32.mrb[94].mxu1 }
0x26ac   : > { %v7036_v36 = vadd.f32 %v10593_v35, %v9194_v7  ;;  %v7030_v38 = vpop.f32.mrb[95].mxu1  ;;  %v9207_v35 = vld [vmem:[%s13407_s22 + $0x20] sm:$0xff] }
0x26ad   : > { %v7031_v43 = vadd.f32 %v9194_v7, %v7030_v38  ;;  %v11677_v7 = vmov 0.0  }
0x26ae   : > { %v7044_v44 = vsel %vm844_vm0, %v7036_v36, 0.0 }
0x26af   : > { %7045 = vadd.xlane.f32.xlu1 %v7044_v44  ;;  %v7041_v45 = vsel %vm844_vm0, %v7031_v43, 0.0  ;;  %v9210_v44 = vld [vmem:[%s13407_s22 + $0x38] sm:$0xff] }
0x26b0   : > { %7042 = vadd.xlane.f32.xlu0 %v7041_v45 }
0x273c   : > { %v7046_v11 = vpop.xlane.xlu1 %7045 }
0x273d   : > { %v7048_v6 = vmul.f32 0.03125, %v7046_v11  ;;  %v7043_v20 = vpop.xlane.xlu0 %7042 }
0x273e   : > { %v7047_v18 = vmul.f32 0.03125, %v7043_v20  ;;  %v9217_v20 = vld [vmem:[%s13407_s22 + $0x40] sm:$0xff] }
0x273f   : > { %v7050_v46 = vsub.f32 %v7036_v36, %v7048_v6  ;;  %v9208_v36 = vld [vmem:[%s13407_s22 + $0x28] sm:$0xff] }
0x2740   : > { %v7049_v47 = vsub.f32 %v7031_v43, %v7047_v18  ;;  %v11245_v38 = vpack.c.bf16 %v9208_v36, %v9207_v35  ;;  %v9209_v43 = vld [vmem:[%s13407_s22 + $0x30] sm:$0xff]  ;;  %v9218_v18 = vld [vmem:[%s13407_s22 + $0x48] sm:$0xff] }
0x2741   : > { %v7052_v48 = vmul.f32 %v7050_v46, %v7050_v46  ;;  %v11249_v6 = vpack.c.bf16 %v9210_v44, %v9209_v43  ;;  %v9275_v36 = vld [vmem:[%s13407_s22 + $0x110] sm:$0xff] }
0x2742   : > { %v7051_v49 = vmul.f32 %v7049_v47, %v7049_v47  ;;  %11246 = vmatprep.subr.bf16.mxu0 %v11245_v38 }
0x2743   : > { %v7056_v50 = vsel %vm844_vm0, %v7052_v48, 0.0  ;;  %v11257_v48 = vpack.c.bf16 %v9218_v18, %v9217_v20 }
0x2744   : > { %7057 = vadd.xlane.f32.xlu1 %v7056_v50  ;;  %v7053_v51 = vsel %vm844_vm0, %v7051_v49, 0.0  ;;  %v9219_v49 = vld [vmem:[%s13407_s22 + $0x50] sm:$0xff]  ;;  %v9220_v50 = vld [vmem:[%s13407_s22 + $0x58] sm:$0xff] }
0x2745   : > { %7054 = vadd.xlane.f32.xlu0 %v7053_v51  ;;  %v11261_v52 = vpack.c.bf16 %v9220_v50, %v9219_v49 }
0x27d1   : > { %v7058_v1 = vpop.xlane.xlu1 %7057 }
0x27d2   : > { %v7060_v2 = vmul.f32 0.03125, %v7058_v1  ;;  %v7055_v3 = vpop.xlane.xlu0 %7054  ;;  %v9229_v1 = vld [vmem:[%s13407_s22 + $0x70] sm:$0xff] }
0x27d3   : > { %v7059_v4 = vmul.f32 0.03125, %v7055_v3 }
0x27d4   : > { %v7062_v9 = vadd.f32 1e-05, %v7060_v2  ;;  %v9230_v2 = vld [vmem:[%s13407_s22 + $0x78] sm:$0xff] }
0x27d5   : > { %v7061_v8 = vadd.f32 1e-05, %v7059_v4  ;;  %v11273_v4 = vpack.c.bf16 %v9230_v2, %v9229_v1 }
0x27d6   : > { %11607 = vrsqrt.f32 %v7062_v9 }
0x27d7   : > { %11609 = vrsqrt.f32 %v7061_v8  ;;  %v9233_v8 = vld [vmem:[%s13407_s22 + $0x80] sm:$0xff] }
0x27e0   : > { %v11608_v23 = vpop.eup %11607 }
0x27e1   : > { %v11610_v31 = vpop.eup %11609  ;;  %v7066_v34 = vmul.f32 %v11608_v23, %v7050_v46  ;;  %v9234_v23 = vld [vmem:[%s13407_s22 + $0x88] sm:$0xff] }
0x27e2   : > { %v7065_v30 = vmul.f32 %v11610_v31, %v7049_v47  ;;  %v11277_v31 = vpack.c.bf16 %v9234_v23, %v9233_v8 }
0x27e3   : > { %v7074_v14 = vmul.f32 %v9197_v10, %v7066_v34 }
0x27e4   : > { %v7073_v16 = vmul.f32 %v9197_v10, %v7065_v30  ;;  %v9236_v30 = vld [vmem:[%s13407_s22 + $0x98] sm:$0xff] }
0x27e5   : > { %v13123_v37 = vadd.f32 %v9198_v13, %v7074_v14 }
0x27e6   : > { %v13125_v15 = vadd.f32 %v9198_v13, %v7073_v16  ;;  %v9235_v13 = vld [vmem:[%s13407_s22 + $0x90] sm:$0xff] }
0x27e7   : > { %v11281_v16 = vpack.c.bf16 %v9236_v30, %v9235_v13 }
0x27e8   : > { %v11229_v21 = vpack.c.bf16 %v13123_v37, %v13125_v15 }
0x27ea   : > { %11230 = vmatprep.subr.bf16.mxu1 %v11229_v21 }
0x27eb   : > { %11232 = vmatpush3.bf16.msra.mxu1 %v11229_v21 }
0x27ec   : > { %11242 = vmatprep.subr.bf16.mxu1 %v11229_v21 }
0x27ee   : > { %10599 = vmatmul.mubr.msk.f32.vlgmr.msra.gmra.mrb[96].mxu1 %vm7087_vm3, %v7086_v24  ;;  %v9243_v24 = vld [vmem:[%s13407_s22 + $0xa0] sm:$0xff] }
0x27ef   : > { %11244 = vmatpush3.bf16.msra.mxu1 %v11229_v21  ;;  %10616 = vmatprep.mubr.msk.f32.mxu1 %vm7087_vm3, %v9203_v54  ;;  %v9244_v54 = vld [vmem:[%s13407_s22 + $0xa8] sm:$0xff] }
0x27f0   : > { %11254 = vmatprep.subr.bf16.mxu1 %v11229_v21 }
0x27f2   : > { %10617 = vmatmul.mubr.msk.f32.vlgmr.msra.gmra.mrb[98].mxu1 %vm7087_vm3, %v9204_v53 }
0x27f3   : > { %11256 = vmatpush3.bf16.msra.mxu1 %v11229_v21  ;;  %10634 = vmatprep.mubr.msk.f32.mxu1 %vm7087_vm3, %v9213_v40  ;;  %v11289_v40 = vpack.c.bf16 %v9244_v54, %v9243_v24 }
0x27f4   : > { %11266 = vmatprep.subr.bf16.mxu1 %v11229_v21 }
0x27f6   : > { %10635 = vmatmul.mubr.msk.f32.vlgmr.msra.gmra.mrb[100].mxu1 %vm7087_vm3, %v9214_v17 }
0x27f7   : > { %11268 = vmatpush3.bf16.msra.mxu1 %v11229_v21  ;;  %10652 = vmatprep.mubr.msk.f32.mxu1 %vm7087_vm3, %v9223_v19  ;;  %v9245_v19 = vld [vmem:[%s13407_s22 + $0xb0] sm:$0xff] }
0x27f8   : > { %11286 = vmatprep.subr.bf16.mxu1 %v11229_v21 }
0x27fa   : > { %10653 = vmatmul.mubr.msk.f32.vlgmr.msra.gmra.mrb[102].mxu1 %vm7087_vm3, %v9224_v28  ;;  %v9246_v28 = vld [vmem:[%s13407_s22 + $0xb8] sm:$0xff] }
0x27fb   : > { %11288 = vmatpush3.bf16.msra.mxu1 %v11229_v21  ;;  %10681 = vmatprep.mubr.msk.f32.mxu1 %vm7087_vm3, %v9239_v22  ;;  %v11293_v22 = vpack.c.bf16 %v9246_v28, %v9245_v19 }
0x27fc   : > { %11298 = vmatprep.subr.bf16.mxu1 %v11229_v21 }
0x27fe   : > { %10682 = vmatmul.mubr.msk.f32.vlgmr.msra.gmra.mrb[104].mxu1 %vm7087_vm3, %v9240_v63  ;;  %v9279_v63 = vld [vmem:[%s13497_s8] ss:$0 sm:$0xff] }
0x27ff   : > { %11300 = vmatpush3.bf16.msra.mxu1 %v11229_v21  ;;  %10699 = vmatprep.mubr.msk.f32.mxu1 %vm7087_vm3, %v9249_v26  ;;  %v9254_v26 = vld [vmem:[%s13407_s22 + $0xc8] sm:$0xff] }
0x2800   : > { %11310 = vmatprep.subr.bf16.mxu1 %v11229_v21 }
0x2802   : > { %10700 = vmatmul.mubr.msk.f32.vlgmr.msra.gmra.mrb[106].mxu1 %vm7087_vm3, %v9250_v39 }
0x2803   : > { %11312 = vmatpush3.bf16.msra.mxu1 %v11229_v21  ;;  %10717 = vmatprep.mubr.msk.f32.mxu1 %vm7087_vm3, %v9259_v29 }
0x2804   : > { %11322 = vmatprep.subr.bf16.mxu1 %v11229_v21 }
0x2806   : > { %10718 = vmatmul.mubr.msk.f32.vlgmr.msra.gmra.mrb[108].mxu1 %vm7087_vm3, %v9260_v32 }
0x2807   : > { %11324 = vmatpush3.bf16.msra.mxu1 %v11229_v21  ;;  %10735 = vmatprep.mubr.msk.f32.mxu1 %vm7087_vm3, %v9269_v62 }
0x2808   : > { %11333 = vmatprep.subr.bf16.mxu1 %v11675_v27 }
0x280a   : > { %10736 = vmatmul.mubr.msk.f32.vlgmr.msra.gmra.mrb[110].mxu1 %vm7087_vm3, %v9270_v12  ;;  %v9263_v12 = vld [vmem:[%s13407_s22 + $0xe0] sm:$0xff] }
0x280b   : > { %11335 = vmatpush3.bf16.msra.mxu1 %v11334_v33  ;;  %10757 = vmatprep.mubr.msk.f32.mxu1 %vm11676_vm4, %v11677_v7  ;;  %v9264_v33 = vld [vmem:[%s13407_s22 + $0xe8] sm:$0xff] }
0x280c   : > { %11336 = vmatprep.subr.bf16.mxu1 %v11675_v27  ;;  %v11313_v27 = vpack.c.bf16 %v9264_v33, %v9263_v12 }
0x280f   : > { %11338 = vmatpush3.bf16.msra.mxu1 %v11337_v55  ;;  %v9273_v55 = vld [vmem:[%s13407_s22 + $0x100] sm:$0xff] }
0x2810   : > { %10760 = vmatprep.subr.mxu1 %v11677_v7 }
0x2812   : > { %10758 = vmatmul.mubr.msk.f32.vlgmr.msra.gmra.mrb[112].mxu1 %vm844_vm0, %v13037_v25 }
0x2813   : > { %10762 = vmatprep.mubr.msk.f32.mxu1 %vm11676_vm4, %v11677_v7  ;;  %v9274_v7 = vld [vmem:[%s13407_s22 + $0x108] sm:$0xff] }
0x2814   : > { %v11325_v35 = vpack.c.bf16 %v9274_v7, %v9273_v55 }
0x28c1   : > { %v10600_v45 = vpop.f32.mrb[96].mxu1 }
0x28c2   : > { %v7160_v11 = vpop.f32.mrb[97].mxu1 }
0x28c3   : > { %10609 = vmatprep.mubr.msk.f32.mxu0 %vm844_vm0, %v7160_v11 }
0x28c4   : > { %10610 = vmatmul.mubr.msk.f32.vlgmr.msra.gmra.mrb[96].mxu0 %vm844_vm0, %v10600_v45 }
0x28c5   : > { %11248 = vmatpush3.bf16.msra.mxu0 %v11245_v38  ;;  %v10618_v46 = vpop.f32.mrb[98].mxu1  ;;  %v9276_v38 = vld [vmem:[%s13407_s22 + $0x118] sm:$0xff] }
0x28c6   : > { %11250 = vmatprep.subr.bf16.mxu0 %v11249_v6  ;;  %v7331_v47 = vpop.f32.mrb[99].mxu1  ;;  %v11329_v43 = vpack.c.bf16 %v9276_v38, %v9275_v36 }
0x28c7   : > { %10627 = vmatprep.mubr.msk.f32.mxu0 %vm844_vm0, %v7331_v47 }
0x28c9   : > { %11252 = vmatpush3.bf16.msra.mxu0 %v11249_v6  ;;  %v10636_v51 = vpop.f32.mrb[100].mxu1 }
0x28ca   : > { %11258 = vmatprep.subr.bf16.mxu0 %v11257_v48  ;;  %v7503_v57 = vpop.f32.mrb[101].mxu1 }
0x28cc   : > { %10628 = vmatmul.mubr.msk.f32.vlgmr.msra.gmra.mrb[96].mxu0 %vm844_vm0, %v10618_v46 }
0x28cd   : > { %11260 = vmatpush3.bf16.msra.mxu0 %v11257_v48  ;;  %10645 = vmatprep.mubr.msk.f32.mxu0 %vm844_vm0, %v7503_v57  ;;  %v10654_v60 = vpop.f32.mrb[102].mxu1 }
0x28ce   : > { %11262 = vmatprep.subr.bf16.mxu0 %v11261_v52  ;;  %v7675_v0 = vpop.f32.mrb[103].mxu1 }
0x28d1   : > { %11264 = vmatpush3.bf16.msra.mxu0 %v11261_v52  ;;  %v10683_v3 = vpop.f32.mrb[104].mxu1 }
0x28d2   : > { %11270 = vmatprep.subr.bf16.mxu0 %v11269_v61  ;;  %v7935_v9 = vpop.f32.mrb[105].mxu1 }
0x28d4   : > { %10646 = vmatmul.mubr.msk.f32.vlgmr.msra.gmra.mrb[96].mxu0 %vm844_vm0, %v10636_v51 }
0x28d5   : > { %11272 = vmatpush3.bf16.msra.mxu0 %v11269_v61  ;;  %10663 = vmatprep.mubr.msk.f32.mxu0 %vm844_vm0, %v7675_v0  ;;  %v10701_v10 = vpop.f32.mrb[106].mxu1 }
0x28d6   : > { %11274 = vmatprep.subr.bf16.mxu0 %v11273_v4  ;;  %v8107_v34 = vpop.f32.mrb[107].mxu1 }
0x28d9   : > { %11276 = vmatpush3.bf16.msra.mxu0 %v11273_v4  ;;  %v10719_v14 = vpop.f32.mrb[108].mxu1 }
0x28da   : > { %11278 = vmatprep.subr.bf16.mxu0 %v11277_v31  ;;  %v8279_v21 = vpop.f32.mrb[109].mxu1 }
0x28dc   : > { %10664 = vmatmul.mubr.msk.f32.vlgmr.msra.gmra.mrb[96].mxu0 %vm844_vm0, %v10654_v60 }
0x28dd   : > { %11280 = vmatpush3.bf16.msra.mxu0 %v11277_v31  ;;  %10674 = vmatprep.mubr.msk.f32.mxu0 %vm844_vm0, %v13125_v15  ;;  %v10737_v53 = vpop.f32.mrb[110].mxu1  ;;  %v9253_v15 = vld [vmem:[%s13407_s22 + $0xc0] sm:$0xff] }
0x28de   : > { %11282 = vmatprep.subr.bf16.mxu0 %v11281_v16  ;;  %v8451_v17 = vpop.f32.mrb[111].mxu1  ;;  %v11301_v62 = vpack.c.bf16 %v9254_v26, %v9253_v15 }
0x28e1   : > { %11284 = vmatpush3.bf16.msra.mxu0 %v11281_v16 }
0x28e2   : > { %11290 = vmatprep.subr.bf16.mxu0 %v11289_v40 }
0x28e4   : > { %10675 = vmatmul.mubr.msk.f32.vlgmr.msra.gmra.mrb[96].mxu0 %vm844_vm0, %v13123_v37  ;;  %v11305_v37 = vpack.c.bf16 %v9256_v41, %v9255_v42 }
0x28e5   : > { %11292 = vmatpush3.bf16.msra.mxu0 %v11289_v40  ;;  %v8627_v39 = vpop.f32.mrb[112].mxu1  ;;  %10692 = vmatprep.mubr.msk.f32.mxu0 %vm844_vm0, %v7935_v9 }
0x28e6   : > { %v8628_v29 = vadd.f32 %v9279_v63, %v8627_v39  ;;  %v10759_v32 = vpop.f32.mrb[113].mxu1  ;;  %11294 = vmatprep.subr.bf16.mxu0 %v11293_v22 }
0x28e8   : > { %10761 = vmatpush3.xpose.msk.msra.mxu1 %vm844_vm0, %v8628_v29 }
0x28e9   : > { %11296 = vmatpush3.bf16.msra.mxu0 %v11293_v22 }
0x28ea   : > { %11302 = vmatprep.subr.bf16.mxu0 %v11301_v62 }
0x28eb   : > { %10763 = vmatmul.mubr.msk.f32.vlgmr.msra.gmra.mrb[114].mxu1 %vm844_vm0, %v13037_v25  ;;  %v9266_v25 = vld [vmem:[%s13407_s22 + $0xf8] sm:$0xff] }
0x28ec   : > { %10693 = vmatmul.mubr.msk.f32.vlgmr.msra.gmra.mrb[96].mxu0 %vm844_vm0, %v10683_v3  ;;  %v11317_v56 = vpack.c.bf16 %v9266_v25, %v9265_v5 }
0x28ed   : > { %11304 = vmatpush3.bf16.msra.mxu0 %v11301_v62  ;;  %10710 = vmatprep.mubr.msk.f32.mxu0 %vm844_vm0, %v8107_v34 }
0x28ee   : > { %11306 = vmatprep.subr.bf16.mxu0 %v11305_v37 }
0x28f1   : > { %11308 = vmatpush3.bf16.msra.mxu0 %v11305_v37 }
0x28f2   : > { %11314 = vmatprep.subr.bf16.mxu0 %v11313_v27 }
0x28f4   : > { %10711 = vmatmul.mubr.msk.f32.vlgmr.msra.gmra.mrb[96].mxu0 %vm844_vm0, %v10701_v10 }
0x28f5   : > { %11316 = vmatpush3.bf16.msra.mxu0 %v11313_v27  ;;  %10728 = vmatprep.mubr.msk.f32.mxu0 %vm844_vm0, %v8279_v21 }
0x28f6   : > { %11318 = vmatprep.subr.bf16.mxu0 %v11317_v56 }
0x28f9   : > { %11320 = vmatpush3.bf16.msra.mxu0 %v11317_v56 }
0x28fa   : > { %11326 = vmatprep.subr.bf16.mxu0 %v11325_v35 }
0x28fc   : > { %10729 = vmatmul.mubr.msk.f32.vlgmr.msra.gmra.mrb[96].mxu0 %vm844_vm0, %v10719_v14 }
0x28fd   : > { %11328 = vmatpush3.bf16.msra.mxu0 %v11325_v35  ;;  %10746 = vmatprep.mubr.msk.f32.mxu0 %vm844_vm0, %v8451_v17 }
0x28fe   : > { %11330 = vmatprep.subr.bf16.mxu0 %v11329_v43 }
0x2901   : > { %11332 = vmatpush3.bf16.msra.mxu0 %v11329_v43 }
0x2904   : > { %10747 = vmatmul.mubr.msk.f32.vlgmr.msra.gmra.mrb[96].mxu0 %vm844_vm0, %v10737_v53 }
0x29be   : > { %v8700_v44 = vpop.f32.mrb[114].mxu1 }
0x29bf   : > { %8704 = vst.msk [vmem:[%s819_s2] sm:$0xff] %vm1193_vm1, %v8700_v44  ;;  %v10764_v45 = vpop.f32.mrb[115].mxu1 }
0x29c0   : > { %11624 = shalt.err (!%p11621_p3)
}
0x29c1   : > { %s11625_s25 = scalar_lea.hbm %s13330_s3, 128  ;;  %s11629_s30 = scalar_lea.hbm %s13501_s10, 256 }
0x29c2   : > { %p11626_p4 = scmp.ne.s32.totalorder %s13330_s3, %s11625_s25  ;;  %p11630_p9 = scmp.lt.u32.totalorder %s13330_s3, %s13501_s10 }
0x29c3   : > { %p11631_p10 = scmp.lt.u32.totalorder %s11629_s30, %s11625_s25  ;;  %p11633_p12 = scmp.lt.u32.totalorder %s11625_s25, %s13330_s3 }
0x29c4   : > { %p11627_p7 = pnand %p11626_p4, %p11857_p5 }
0x29c5   : > { %p11632_p11 = por %p11631_p10, %p11630_p9 }
0x29c6   : > { %p11628_p8 = pneg %p11627_p7 }
0x29c7   : > { %p11634_p13 = por %p11633_p12, %p11632_p11 }
0x29c9   : > { %p11635_p0 = pnand %p11634_p13, %p11628_p8 }
0x29cb   : > { %11638 = shalt.err (!%p11635_p0)
}
0x29cc   : > { %s13502_s0 = sld [smem:[#allocation14_spill]]  ;;  %s13503_s8 = sld [smem:[#allocation29_spill]] }
0x29cd   : > { %11381 = dma.vmem_to_hbm [thread:$0]  (%p11857_p5), %s13332_s11, 128, %s13330_s3, %s8711_s5  }
0x29ce   : > { %s13505_s9 = sld [smem:[#allocation32_spill]] }
0x29d2   : > { %s9288_s7 = sshll.u32 %s13502_s0, 4  ;;  %s13504_s12 = smov %s13503_s8  ;;  %v7084_v11 = vld [vmem:[%s13503_s8 + $0x8] sm:$0xff] }
0x29d3   : > { %v7083_v6 = vld [vmem:[%s13504_s12] sm:$0xff] }
0x29d4   : > { %s829_s10 = scalar_lea.vmem %s13505_s9, %s9288_s7 }
0x29d7   : > { %v10748_v20 = vpop.f32.mrb[96].mxu0 }
0x29d8   : > { %v11339_v18 = vadd.f32 %v10748_v20, %v7084_v11  ;;  %v8537_v46 = vpop.f32.mrb[97].mxu0 }
0x29d9   : > { %v11340_v47 = vadd.f32 %v8537_v46, %v7083_v6 }
0x29da   : > { %8549 = vst.msk [vmem:[%s829_s10 + $0x8] sm:$0xff] %vm844_vm0, %v11339_v18 }
0x29db   : > { %8548 = vst.msk [vmem:[%s829_s10] sm:$0xff] %vm844_vm0, %v11340_v47 }
0x29dc PF: > { %s13506_s3 = sld [smem:[#allocation8_spill]]  ;;  %s13507_s6 = sld [smem:[#allocation5_spill]] }
0x29e2   : > { %p11387_p5 = scmp.ge.s32.totalorder %s13506_s3, 2  ;;  %s8747_s4 = sand.u32 1, %s13507_s6  }
0x29e3   : > { %s8748_s13 = scalar_lea.sflag [#allocation3], %s8747_s4 }
0x29e4   : > { %p11384_p1 = pnand %p11387_p5, %p11861_p6 }
0x29e6   : > { %11656 = dma.done.wait (!%p11384_p1), %s8748_s13, 128  }
0x29e7   : > { %11658 = vsyncadd (!%p11384_p1), %s8748_s13, 4294967168  ;;  %s13509_s30 = sld [smem:[#allocation10_spill]]  ;;  %s13510_s7 = sld [smem:[#allocation6_spill]] }
0x29e8   : > { %s13511_s4 = sld [smem:[#allocation7_spill]]  ;;  %s13512_s8 = sld [smem:[#allocation11_spill]] }
0x29ed   : > { %p38_p2 = scmp.ge.s32.totalorder %s13509_s30, 4  }
0x29ef   :  { %40 = sbr.rel (!%p38_p2) target bundleno = 23 (0x17), region = 218 }
0x29f6   :  { %8753 = vsyncpa [#allocation3], 1 }
0x29f7   :  { %8755 = vsyncpa [#allocation3 + $0x1], 1 }

</bundles_post_ra>
